<compile_context>
chip_gen: v6e
topology: v6e:2x2x1
jax: 0.10.0
libtpu: 0.0.40
codegen_flags: <defaults>
</compile_context>

<pallas_src>
import numpy as np
import jax
import jax.numpy as jnp
from jax import lax
from jax.experimental import pallas as pl
from jax.experimental.pallas import tpu as pltpu  # noqa: F401  (TPU backend)

# ----------------------- small, module-consistent config -----------------------
N = 2          # batch
C = 16         # in_features (must be divisible by 16 for the grouped pos-conv)
L = 8          # input sequence length
HEADS = 4      # transformer heads   (E % HEADS == 0)
LAYERS = 2     # encoder layers
FFN = 64       # hidden_feedforward
POS_K = 5      # position_encoder kernel size (odd -> symmetric 'same' padding)
GROUPS = 16
E = 3 * C      # transformer dim
DH = E // HEADS
S = L + 1      # sequence length after start token
NS = N * S     # batch-folded token count
NL = N * L
PAD = (POS_K - 1) // 2
START_TOKEN = -5.0
LN_EPS = 1e-5
INV_SQRT2 = float(1.0 / np.sqrt(2.0))
NEG_INF = -1e30
# im2col tap ordering: put the "center" tap first so the residual (= unpadded x)
# is the offset-0 column block of the im2col slab.
TAP_ORDER = [PAD] + [k for k in range(POS_K) if k != PAD]


# ----------------------------- in-kernel helpers -------------------------------
def _erf_approx(x):
    # Abramowitz & Stegun 7.1.26, max abs error ~1.5e-7 (uses exp + EUP recip).
    a1, a2, a3, a4, a5 = 0.254829592, -0.284496736, 1.421413741, -1.453152027, 1.061405429
    p = 0.3275911
    ax = jnp.abs(x)
    t = pl.reciprocal(1.0 + p * ax, approx=True)
    poly = ((((a5 * t + a4) * t + a3) * t + a2) * t + a1) * t
    y = 1.0 - poly * jnp.exp(-ax * ax)
    return jnp.where(x >= 0, y, -y)


def _gelu_exact(x):
    # Matches PyTorch nn.GELU()/F.gelu default (erf formulation).
    return 0.5 * x * (1.0 + _erf_approx(x * INV_SQRT2))


# --------------------------------- fused kernel ---------------------------------
def _fused_forward_kernel(col_ref, posw_ref, posb_ref, lng_ref, lnb_ref,
                          condw_ref, condb_ref, pmat_ref, tok_ref, amask_ref,
                          hmask_ref, wqkv_ref, bqkv_ref, wo_ref, bo_ref,
                          w1_ref, b1_ref, w2_ref, b2_ref, outw_ref, outb_ref,
                          o_ref):
    f32 = jnp.float32

    # ---- relative position encoder: grouped conv as ONE im2col matmul ---------
    col = col_ref[...]                                                 # (N*L, K*C)
    conv = jnp.dot(col, posw_ref[...], preferred_element_type=f32) + posb_ref[...]
    x = col[:, 0:C] + _gelu_exact(conv)                                # (N*L, C)

    # ---- input conditioning: LayerNorm over channels + 1x1 conv C -> 3C -------
    mu = jnp.mean(x, axis=-1, keepdims=True)
    var = jnp.mean((x - mu) ** 2, axis=-1, keepdims=True)
    xn = (x - mu) * lax.rsqrt(var + LN_EPS)
    xn = xn * lng_ref[...] + lnb_ref[...]
    cond = jnp.dot(xn, condw_ref[...], preferred_element_type=f32) + condb_ref[...]  # (N*L, E)

    # ---- prepend start token per batch via a tiny 0/1 scatter-matmul ----------
    # h[b*S]      = START_TOKEN (all E dims)
    # h[b*S+1+l]  = cond[b*L+l]
    h = jnp.dot(pmat_ref[...], cond, preferred_element_type=f32) + tok_ref[...]      # (N*S, E)

    # ---- transformer encoder layers (norm1 = norm2 = Identity, post-residual) -
    amask = amask_ref[...]                      # (N*S, N*S): 0 within batch, -1e30 across
    scale = 1.0 / float(np.sqrt(DH))
    for li in range(LAYERS):
        q = jnp.dot(h, wqkv_ref[li, 0], preferred_element_type=f32) + bqkv_ref[li, 0]
        k = jnp.dot(h, wqkv_ref[li, 1], preferred_element_type=f32) + bqkv_ref[li, 1]
        v = jnp.dot(h, wqkv_ref[li, 2], preferred_element_type=f32) + bqkv_ref[li, 2]
        attn = jnp.zeros((NS, E), f32)
        for hh in range(HEADS):                 # static unroll over heads
            hm = hmask_ref[hh]                  # (1, E) 0/1 mask selecting head hh dims
            # masked full-width operands: zeroed dims contribute exactly 0 to the
            # contraction, so this equals the per-head (DH-sliced) attention, and
            # the PV result lands directly in head hh's column block of `attn`.
            s = lax.dot_general(q * hm, k, (((1,), (1,)), ((), ())),
                                preferred_element_type=f32) * scale + amask   # (NS, NS)
            s = s - jnp.max(s, axis=-1, keepdims=True)
            p = jnp.exp(s)
            p = p * pl.reciprocal(jnp.sum(p, axis=-1, keepdims=True), approx=True)
            attn = attn + jnp.dot(p, v * hm, preferred_element_type=f32)      # (NS, E)
        # single wide output projection on the (implicitly concatenated) heads
        h = h + jnp.dot(attn, wo_ref[li], preferred_element_type=f32) + bo_ref[li]
        ffh = _gelu_exact(jnp.dot(h, w1_ref[li], preferred_element_type=f32) + b1_ref[li])
        h = h + jnp.dot(ffh, w2_ref[li], preferred_element_type=f32) + b2_ref[li]

    # ---- output 1x1 conv 3C -> C: single HBM write -----------------------------
    o_ref[...] = jnp.dot(h, outw_ref[...], preferred_element_type=f32) + outb_ref[...]


# ------------------------------ pallas_call wrapper ------------------------------
def transformer_forward(x_ncl, params):
    """x_ncl: (N, C, L) float32, PyTorch layout.  Returns (N, C, L+1)."""
    x = jnp.transpose(x_ncl, (0, 2, 1)).astype(jnp.float32)            # (N, L, C)
    xp = jnp.pad(x, ((0, 0), (PAD, PAD), (0, 0)))                      # (N, L+2p, C)
    # host-side im2col for the grouped 'same' conv (first block == unpadded x)
    im2col = jnp.concatenate([xp[:, k:k + L, :] for k in TAP_ORDER],
                             axis=-1).reshape(NL, POS_K * C)           # (N*L, K*C)

    y = pl.pallas_call(
        _fused_forward_kernel,
        out_shape=jax.ShapeDtypeStruct((NS, C), jnp.float32),
    )(im2col,
      params["pos_w_flat"], params["pos_b2d"],
      params["ln_g"], params["ln_b"],
      params["cond_w"], params["cond_b"],
      params["pmat"], params["tok"], params["attn_mask"], params["head_mask"],
      params["wqkv"], params["bqkv"], params["wo"], params["bo"],
      params["w1"], params["b1"], params["w2"], params["b2"],
      params["out_w"], params["out_b"])

    return jnp.transpose(y.reshape(N, S, C), (0, 2, 1))                # (N, C, L+1)


# ------------------------------ parameter init ----------------------------------
def init_params(key):
    ks = iter(jax.random.split(key, 8 + 12 * LAYERS))

    def nrm(shape, std):
        return (std * jax.random.normal(next(ks), shape)).astype(jnp.float32)

    cin_g = C // GROUPS
    out_g = C // GROUPS
    pos_w = nrm((C, cin_g, POS_K), 2.0 / E)        # torch: N(0, 2/transformer_dim)
    pos_b = jnp.zeros((C,), jnp.float32)           # torch: constant_(bias, 0)
    # dense block-diagonal per-tap weights, (K, C_in, C_out)
    dense = np.zeros((C, C, POS_K), np.float32)
    pw = np.asarray(pos_w)
    for g in range(GROUPS):
        dense[g * out_g:(g + 1) * out_g, g * cin_g:(g + 1) * cin_g, :] = \
            pw[g * out_g:(g + 1) * out_g]
    pos_w_taps = np.transpose(dense, (2, 1, 0))    # (K, C_in, C_out)
    # flatten taps in TAP_ORDER so the im2col column blocks line up
    pos_w_flat = np.concatenate([pos_w_taps[k] for k in TAP_ORDER], axis=0)  # (K*C, C)

    params = dict(
        pos_w=pos_w, pos_b=pos_b,
        pos_w_flat=jnp.asarray(pos_w_flat),
        pos_b2d=pos_b.reshape(1, C),
        ln_g=jnp.ones((1, C), jnp.float32), ln_b=jnp.zeros((1, C), jnp.float32),
    )

    cond_w = nrm((E, C), 1.0 / np.sqrt(C))         # Conv1d(C, 3C, 1)
    cond_b = nrm((E,), 0.02)
    params["cond_w_raw"], params["cond_b_raw"] = cond_w, cond_b
    params["cond_w"], params["cond_b"] = cond_w.T, cond_b.reshape(1, E)

    # start-token scatter matmul, start-token pattern, batch-block attention mask,
    # and per-head 0/1 feature masks (all constants, DMA'd once).
    pmat = np.zeros((NS, NL), np.float32)
    tok = np.zeros((NS, 1), np.float32)
    for b in range(N):
        tok[b * S, 0] = START_TOKEN
        for l in range(L):
            pmat[b * S + 1 + l, b * L + l] = 1.0
    bid = np.arange(NS) // S
    amask = np.where(bid[:, None] == bid[None, :], 0.0, NEG_INF).astype(np.float32)
    hmask = np.zeros((HEADS, 1, E), np.float32)
    for h in range(HEADS):
        hmask[h, 0, h * DH:(h + 1) * DH] = 1.0
    params["pmat"] = jnp.asarray(pmat)
    params["tok"] = jnp.asarray(tok)
    params["attn_mask"] = jnp.asarray(amask)
    params["head_mask"] = jnp.asarray(hmask)

    tfix = 0.67 * LAYERS ** (-0.25)                # T-fixup scale on nn.Linear weights
    layers_raw = []
    wqkv_s, bqkv_s, wo_s, bo_s, w1_s, b1_s, w2_s, b2_s = ([] for _ in range(8))
    for _ in range(LAYERS):
        in_w = nrm((3 * E, E), 1.0 / np.sqrt(E))   # in_proj_weight
        in_b = nrm((3 * E,), 0.02)
        wo = nrm((E, E), tfix / np.sqrt(E))
        bo = nrm((E,), 0.02)
        w1 = nrm((FFN, E), tfix / np.sqrt(E))
        b1 = nrm((FFN,), 0.02)
        w2 = nrm((E, FFN), tfix / np.sqrt(FFN))
        b2 = nrm((E,), 0.02)
        layers_raw.append(dict(in_w=in_w, in_b=in_b, wo_raw=wo, bo_raw=bo,
                               w1_raw=w1, b1_raw=b1, w2_raw=w2, b2_raw=b2))
        # lane-dense kernel-side packing (x @ W form), stacked with layer axis
        wqkv_s.append(jnp.stack([in_w[:E].T, in_w[E:2 * E].T, in_w[2 * E:].T]))  # (3,E,E)
        bqkv_s.append(jnp.stack([in_b[:E].reshape(1, E),
                                 in_b[E:2 * E].reshape(1, E),
                                 in_b[2 * E:].reshape(1, E)]))                   # (3,1,E)
        wo_s.append(wo.T); bo_s.append(bo.reshape(1, E))
        w1_s.append(w1.T); b1_s.append(b1.reshape(1, FFN))
        w2_s.append(w2.T); b2_s.append(b2.reshape(1, E))
    params["layers"] = layers_raw
    params["wqkv"] = jnp.stack(wqkv_s)   # (LAYERS, 3, E, E)
    params["bqkv"] = jnp.stack(bqkv_s)   # (LAYERS, 3, 1, E)
    params["wo"] = jnp.stack(wo_s)       # (LAYERS, E, E)
    params["bo"] = jnp.stack(bo_s)       # (LAYERS, 1, E)
    params["w1"] = jnp.stack(w1_s)       # (LAYERS, E, FFN)
    params["b1"] = jnp.stack(b1_s)       # (LAYERS, 1, FFN)
    params["w2"] = jnp.stack(w2_s)       # (LAYERS, FFN, E)
    params["b2"] = jnp.stack(b2_s)       # (LAYERS, 1, E)

    out_w = nrm((C, E), 1.0 / np.sqrt(E))          # Conv1d(3C, C, 1)
    out_b = nrm((C,), 0.02)
    params["out_w_raw"], params["out_b_raw"] = out_w, out_b
    params["out_w"], params["out_b"] = out_w.T, out_b.reshape(1, C)
    return params


# ------------------------- pure-JAX reference (checking) ------------------------
def reference_forward(x_ncl, params):
    HI = lax.Precision.HIGHEST
    gelu = lambda v: jax.nn.gelu(v, approximate=False)
    x = x_ncl.astype(jnp.float32)                           # (N, C, L)
    conv = lax.conv_general_dilated(
        x, params["pos_w"], window_strides=(1,), padding=[(PAD, PAD)],
        dimension_numbers=("NCH", "OIH", "NCH"), feature_group_count=GROUPS,
        precision=HI) + params["pos_b"][None, :, None]
    x = x + gelu(conv)
    xt = jnp.transpose(x, (0, 2, 1))                        # (N, L, C)
    mu = jnp.mean(xt, -1, keepdims=True)
    var = jnp.mean((xt - mu) ** 2, -1, keepdims=True)
    xn = (xt - mu) / jnp.sqrt(var + LN_EPS)
    xn = xn * params["ln_g"][0] + params["ln_b"][0]
    h = jnp.einsum("nlc,ec->nle", xn, params["cond_w_raw"], precision=HI) + params["cond_b_raw"]
    h = jnp.concatenate([jnp.full((N, 1, E), START_TOKEN, jnp.float32), h], axis=1)
    for lp in params["layers"]:
        wq, wk, wv = lp["in_w"][:E], lp["in_w"][E:2 * E], lp["in_w"][2 * E:]
        bq, bk, bv = lp["in_b"][:E], lp["in_b"][E:2 * E], lp["in_b"][2 * E:]
        q = (jnp.einsum("nse,fe->nsf", h, wq, precision=HI) + bq).reshape(N, S, HEADS, DH)
        k = (jnp.einsum("nse,fe->nsf", h, wk, precision=HI) + bk).reshape(N, S, HEADS, DH)
        v = (jnp.einsum("nse,fe->nsf", h, wv, precision=HI) + bv).reshape(N, S, HEADS, DH)
        s = jnp.einsum("nshd,nthd->nhst", q, k, precision=HI) / np.sqrt(DH)
        p = jax.nn.softmax(s, axis=-1)
        o = jnp.einsum("nhst,nthd->nshd", p, v, precision=HI).reshape(N, S, E)
        o = jnp.einsum("nse,fe->nsf", o, lp["wo_raw"], precision=HI) + lp["bo_raw"]
        h = h + o
        f = gelu(jnp.einsum("nse,fe->nsf", h, lp["w1_raw"], precision=HI) + lp["b1_raw"])
        f = jnp.einsum("nsf,ef->nse", f, lp["w2_raw"], precision=HI) + lp["b2_raw"]
        h = h + f
    y = jnp.einsum("nse,ce->nsc", h, params["out_w_raw"], precision=HI) + params["out_b_raw"]
    return jnp.transpose(y, (0, 2, 1))                      # (N, C, L+1)


# ------------------------------------ main ---------------------------------------
if __name__ == "__main__":
    key = jax.random.PRNGKey(0)
    pkey, xkey = jax.random.split(key)
    params = init_params(pkey)
    x = jax.random.normal(xkey, (N, C, L), jnp.float32)     # PyTorch layout (N, C, L)

    fwd = jax.jit(transformer_forward)
    y = jax.block_until_ready(fwd(x, params))
    assert y.shape == (N, C, L + 1), y.shape

    y_ref = jax.block_until_ready(reference_forward(x, params))
    np.testing.assert_allclose(np.asarray(y), np.asarray(y_ref), rtol=5e-2, atol=5e-2)

    print("KERNEL_OK")
</pallas_src>

<mosaic_0001>
module attributes {stable_mosaic.version = 11 : i64} {
  func.func @_fused_forward_kernel(%arg0: memref<16x80xf32, #tpu.memory_space<vmem>>, %arg1: memref<80x16xf32, #tpu.memory_space<vmem>>, %arg2: memref<1x16xf32, #tpu.memory_space<vmem>>, %arg3: memref<1x16xf32, #tpu.memory_space<vmem>>, %arg4: memref<1x16xf32, #tpu.memory_space<vmem>>, %arg5: memref<16x48xf32, #tpu.memory_space<vmem>>, %arg6: memref<1x48xf32, #tpu.memory_space<vmem>>, %arg7: memref<18x16xf32, #tpu.memory_space<vmem>>, %arg8: memref<18x1xf32, #tpu.memory_space<vmem>>, %arg9: memref<18x18xf32, #tpu.memory_space<vmem>>, %arg10: memref<4x1x48xf32, #tpu.memory_space<vmem>>, %arg11: memref<2x3x48x48xf32, #tpu.memory_space<vmem>>, %arg12: memref<2x3x1x48xf32, #tpu.memory_space<vmem>>, %arg13: memref<2x48x48xf32, #tpu.memory_space<vmem>>, %arg14: memref<2x1x48xf32, #tpu.memory_space<vmem>>, %arg15: memref<2x48x64xf32, #tpu.memory_space<vmem>>, %arg16: memref<2x1x64xf32, #tpu.memory_space<vmem>>, %arg17: memref<2x64x48xf32, #tpu.memory_space<vmem>>, %arg18: memref<2x1x48xf32, #tpu.memory_space<vmem>>, %arg19: memref<48x16xf32, #tpu.memory_space<vmem>>, %arg20: memref<1x16xf32, #tpu.memory_space<vmem>>, %arg21: memref<18x16xf32, #tpu.memory_space<vmem>>) attributes {dimension_semantics = [], scalar_prefetch = 0 : i64, scratch_operands = 0 : i64, tpu.core_type = #tpu.core_type<tc>} {
    %c0 = arith.constant 0 : index
    %c0_0 = arith.constant 0 : index
    %0 = vector.load %arg0[%c0, %c0_0] : memref<16x80xf32, #tpu.memory_space<vmem>>, vector<16x80xf32>
    %c0_1 = arith.constant 0 : index
    %c0_2 = arith.constant 0 : index
    %1 = vector.load %arg1[%c0_1, %c0_2] : memref<80x16xf32, #tpu.memory_space<vmem>>, vector<80x16xf32>
    %cst = arith.constant dense<0.000000e+00> : vector<16x16xf32>
    %2 = tpu.matmul %0, %1, %cst {dimension_numbers = #tpu.dot_dimension_numbers<[1], [0], [0], [1], [0, 0, 1, 1], [], []>} : vector<16x80xf32>, vector<80x16xf32>, vector<16x16xf32> -> vector<16x16xf32>
    %c0_3 = arith.constant 0 : index
    %c0_4 = arith.constant 0 : index
    %3 = vector.load %arg2[%c0_3, %c0_4] : memref<1x16xf32, #tpu.memory_space<vmem>>, vector<1x16xf32>
    %4 = vector.broadcast %3 : vector<1x16xf32> to vector<16x16xf32>
    %5 = arith.addf %2, %4 : vector<16x16xf32>
    %6 = vector.extract_strided_slice %0 {offsets = [0, 0], sizes = [16, 16], strides = [1, 1]} : vector<16x80xf32> to vector<16x16xf32>
    %cst_5 = arith.constant 5.000000e-01 : f32
    %7 = vector.broadcast %cst_5 : f32 to vector<16x16xf32>
    %8 = arith.mulf %7, %5 : vector<16x16xf32>
    %cst_6 = arith.constant 0.707106769 : f32
    %9 = vector.broadcast %cst_6 : f32 to vector<16x16xf32>
    %10 = arith.mulf %5, %9 : vector<16x16xf32>
    %11 = math.absf %10 : vector<16x16xf32>
    %cst_7 = arith.constant 0.327591091 : f32
    %12 = vector.broadcast %cst_7 : f32 to vector<16x16xf32>
    %13 = arith.mulf %12, %11 : vector<16x16xf32>
    %cst_8 = arith.constant 1.000000e+00 : f32
    %14 = vector.broadcast %cst_8 : f32 to vector<16x16xf32>
    %15 = arith.addf %14, %13 : vector<16x16xf32>
    %16 = tpu.reciprocal %15 {approx = true} : vector<16x16xf32> -> vector<16x16xf32>
    %cst_9 = arith.constant 1.06140542 : f32
    %17 = vector.broadcast %cst_9 : f32 to vector<16x16xf32>
    %18 = arith.mulf %17, %16 : vector<16x16xf32>
    %cst_10 = arith.constant -1.45315206 : f32
    %19 = vector.broadcast %cst_10 : f32 to vector<16x16xf32>
    %20 = arith.addf %18, %19 : vector<16x16xf32>
    %21 = arith.mulf %20, %16 : vector<16x16xf32>
    %cst_11 = arith.constant 1.42141378 : f32
    %22 = vector.broadcast %cst_11 : f32 to vector<16x16xf32>
    %23 = arith.addf %21, %22 : vector<16x16xf32>
    %24 = arith.mulf %23, %16 : vector<16x16xf32>
    %cst_12 = arith.constant -0.284496725 : f32
    %25 = vector.broadcast %cst_12 : f32 to vector<16x16xf32>
    %26 = arith.addf %24, %25 : vector<16x16xf32>
    %27 = arith.mulf %26, %16 : vector<16x16xf32>
    %cst_13 = arith.constant 0.254829586 : f32
    %28 = vector.broadcast %cst_13 : f32 to vector<16x16xf32>
    %29 = arith.addf %27, %28 : vector<16x16xf32>
    %30 = arith.mulf %29, %16 : vector<16x16xf32>
    %cst_14 = arith.constant 0.000000e+00 : f32
    %31 = vector.broadcast %cst_14 : f32 to vector<16x16xf32>
    %32 = arith.subf %31, %11 : vector<16x16xf32>
    %33 = arith.mulf %32, %11 : vector<16x16xf32>
    %34 = math.exp %33 : vector<16x16xf32>
    %35 = arith.mulf %30, %34 : vector<16x16xf32>
    %cst_15 = arith.constant 1.000000e+00 : f32
    %36 = vector.broadcast %cst_15 : f32 to vector<16x16xf32>
    %37 = arith.subf %36, %35 : vector<16x16xf32>
    %cst_16 = arith.constant 0.000000e+00 : f32
    %38 = vector.broadcast %cst_16 : f32 to vector<16x16xf32>
    %39 = arith.cmpf oge, %10, %38 : vector<16x16xf32>
    %cst_17 = arith.constant 0.000000e+00 : f32
    %40 = vector.broadcast %cst_17 : f32 to vector<16x16xf32>
    %41 = arith.subf %40, %37 : vector<16x16xf32>
    %42 = arith.select %39, %37, %41 : vector<16x16xi1>, vector<16x16xf32>
    %cst_18 = arith.constant 1.000000e+00 : f32
    %43 = vector.broadcast %cst_18 : f32 to vector<16x16xf32>
    %44 = arith.addf %43, %42 : vector<16x16xf32>
    %45 = arith.mulf %8, %44 : vector<16x16xf32>
    %46 = arith.addf %6, %45 : vector<16x16xf32>
    %cst_19 = arith.constant dense<0.000000e+00> : vector<16xf32>
    %47 = vector.multi_reduction <add>, %46, %cst_19 [1] : vector<16x16xf32> to vector<16xf32>
    %48 = vector.shape_cast %47 : vector<16xf32> to vector<16x1xf32>
    %cst_20 = arith.constant 1.600000e+01 : f32
    %49 = vector.broadcast %cst_20 : f32 to vector<16x1xf32>
    %50 = arith.divf %48, %49 : vector<16x1xf32>
    %51 = vector.broadcast %50 : vector<16x1xf32> to vector<16x16xf32>
    %52 = arith.subf %46, %51 : vector<16x16xf32>
    %53 = arith.mulf %52, %52 : vector<16x16xf32>
    %cst_21 = arith.constant dense<0.000000e+00> : vector<16xf32>
    %54 = vector.multi_reduction <add>, %53, %cst_21 [1] : vector<16x16xf32> to vector<16xf32>
    %55 = vector.shape_cast %54 : vector<16xf32> to vector<16x1xf32>
    %cst_22 = arith.constant 1.600000e+01 : f32
    %56 = vector.broadcast %cst_22 : f32 to vector<16x1xf32>
    %57 = arith.divf %55, %56 : vector<16x1xf32>
    %58 = vector.broadcast %50 : vector<16x1xf32> to vector<16x16xf32>
    %59 = arith.subf %46, %58 : vector<16x16xf32>
    %cst_23 = arith.constant 9.99999974E-6 : f32
    %60 = vector.broadcast %cst_23 : f32 to vector<16x1xf32>
    %61 = arith.addf %57, %60 : vector<16x1xf32>
    %62 = math.rsqrt %61 : vector<16x1xf32>
    %63 = vector.broadcast %62 : vector<16x1xf32> to vector<16x16xf32>
    %64 = arith.mulf %59, %63 : vector<16x16xf32>
    %c0_24 = arith.constant 0 : index
    %c0_25 = arith.constant 0 : index
    %65 = vector.load %arg3[%c0_24, %c0_25] : memref<1x16xf32, #tpu.memory_space<vmem>>, vector<1x16xf32>
    %66 = vector.broadcast %65 : vector<1x16xf32> to vector<16x16xf32>
    %67 = arith.mulf %64, %66 : vector<16x16xf32>
    %c0_26 = arith.constant 0 : index
    %c0_27 = arith.constant 0 : index
    %68 = vector.load %arg4[%c0_26, %c0_27] : memref<1x16xf32, #tpu.memory_space<vmem>>, vector<1x16xf32>
    %69 = vector.broadcast %68 : vector<1x16xf32> to vector<16x16xf32>
    %70 = arith.addf %67, %69 : vector<16x16xf32>
    %c0_28 = arith.constant 0 : index
    %c0_29 = arith.constant 0 : index
    %71 = vector.load %arg5[%c0_28, %c0_29] : memref<16x48xf32, #tpu.memory_space<vmem>>, vector<16x48xf32>
    %cst_30 = arith.constant dense<0.000000e+00> : vector<16x48xf32>
    %72 = tpu.matmul %70, %71, %cst_30 {dimension_numbers = #tpu.dot_dimension_numbers<[1], [0], [0], [1], [0, 0, 1, 1], [], []>} : vector<16x16xf32>, vector<16x48xf32>, vector<16x48xf32> -> vector<16x48xf32>
    %c0_31 = arith.constant 0 : index
    %c0_32 = arith.constant 0 : index
    %73 = vector.load %arg6[%c0_31, %c0_32] : memref<1x48xf32, #tpu.memory_space<vmem>>, vector<1x48xf32>
    %74 = vector.broadcast %73 : vector<1x48xf32> to vector<16x48xf32>
    %75 = arith.addf %72, %74 : vector<16x48xf32>
    %c0_33 = arith.constant 0 : index
    %c0_34 = arith.constant 0 : index
    %76 = vector.load %arg7[%c0_33, %c0_34] : memref<18x16xf32, #tpu.memory_space<vmem>>, vector<18x16xf32>
    %cst_35 = arith.constant dense<0.000000e+00> : vector<18x48xf32>
    %77 = tpu.matmul %76, %75, %cst_35 {dimension_numbers = #tpu.dot_dimension_numbers<[1], [0], [0], [1], [0, 0, 1, 1], [], []>} : vector<18x16xf32>, vector<16x48xf32>, vector<18x48xf32> -> vector<18x48xf32>
    %c0_36 = arith.constant 0 : index
    %c0_37 = arith.constant 0 : index
    %78 = vector.load %arg8[%c0_36, %c0_37] : memref<18x1xf32, #tpu.memory_space<vmem>>, vector<18x1xf32>
    %79 = vector.broadcast %78 : vector<18x1xf32> to vector<18x48xf32>
    %80 = arith.addf %77, %79 : vector<18x48xf32>
    %c0_38 = arith.constant 0 : index
    %c0_39 = arith.constant 0 : index
    %81 = vector.load %arg9[%c0_38, %c0_39] : memref<18x18xf32, #tpu.memory_space<vmem>>, vector<18x18xf32>
    %c0_40 = arith.constant 0 : index
    %c0_41 = arith.constant 0 : index
    %c0_42 = arith.constant 0 : index
    %c0_43 = arith.constant 0 : index
    %82 = vector.load %arg11[%c0_40, %c0_41, %c0_42, %c0_43] : memref<2x3x48x48xf32, #tpu.memory_space<vmem>>, vector<1x1x48x48xf32>
    %83 = vector.shape_cast %82 : vector<1x1x48x48xf32> to vector<48x48xf32>
    %cst_44 = arith.constant dense<0.000000e+00> : vector<18x48xf32>
    %84 = tpu.matmul %80, %83, %cst_44 {dimension_numbers = #tpu.dot_dimension_numbers<[1], [0], [0], [1], [0, 0, 1, 1], [], []>} : vector<18x48xf32>, vector<48x48xf32>, vector<18x48xf32> -> vector<18x48xf32>
    %c0_45 = arith.constant 0 : index
    %c0_46 = arith.constant 0 : index
    %c0_47 = arith.constant 0 : index
    %c0_48 = arith.constant 0 : index
    %85 = vector.load %arg12[%c0_45, %c0_46, %c0_47, %c0_48] : memref<2x3x1x48xf32, #tpu.memory_space<vmem>>, vector<1x1x1x48xf32>
    %86 = vector.shape_cast %85 : vector<1x1x1x48xf32> to vector<1x48xf32>
    %87 = vector.broadcast %86 : vector<1x48xf32> to vector<18x48xf32>
    %88 = arith.addf %84, %87 : vector<18x48xf32>
    %c0_49 = arith.constant 0 : index
    %c1 = arith.constant 1 : index
    %c0_50 = arith.constant 0 : index
    %c0_51 = arith.constant 0 : index
    %89 = vector.load %arg11[%c0_49, %c1, %c0_50, %c0_51] : memref<2x3x48x48xf32, #tpu.memory_space<vmem>>, vector<1x1x48x48xf32>
    %90 = vector.shape_cast %89 : vector<1x1x48x48xf32> to vector<48x48xf32>
    %cst_52 = arith.constant dense<0.000000e+00> : vector<18x48xf32>
    %91 = tpu.matmul %80, %90, %cst_52 {dimension_numbers = #tpu.dot_dimension_numbers<[1], [0], [0], [1], [0, 0, 1, 1], [], []>} : vector<18x48xf32>, vector<48x48xf32>, vector<18x48xf32> -> vector<18x48xf32>
    %c0_53 = arith.constant 0 : index
    %c1_54 = arith.constant 1 : index
    %c0_55 = arith.constant 0 : index
    %c0_56 = arith.constant 0 : index
    %92 = vector.load %arg12[%c0_53, %c1_54, %c0_55, %c0_56] : memref<2x3x1x48xf32, #tpu.memory_space<vmem>>, vector<1x1x1x48xf32>
    %93 = vector.shape_cast %92 : vector<1x1x1x48xf32> to vector<1x48xf32>
    %94 = vector.broadcast %93 : vector<1x48xf32> to vector<18x48xf32>
    %95 = arith.addf %91, %94 : vector<18x48xf32>
    %c0_57 = arith.constant 0 : index
    %c2 = arith.constant 2 : index
    %c0_58 = arith.constant 0 : index
    %c0_59 = arith.constant 0 : index
    %96 = vector.load %arg11[%c0_57, %c2, %c0_58, %c0_59] : memref<2x3x48x48xf32, #tpu.memory_space<vmem>>, vector<1x1x48x48xf32>
    %97 = vector.shape_cast %96 : vector<1x1x48x48xf32> to vector<48x48xf32>
    %cst_60 = arith.constant dense<0.000000e+00> : vector<18x48xf32>
    %98 = tpu.matmul %80, %97, %cst_60 {dimension_numbers = #tpu.dot_dimension_numbers<[1], [0], [0], [1], [0, 0, 1, 1], [], []>} : vector<18x48xf32>, vector<48x48xf32>, vector<18x48xf32> -> vector<18x48xf32>
    %c0_61 = arith.constant 0 : index
    %c2_62 = arith.constant 2 : index
    %c0_63 = arith.constant 0 : index
    %c0_64 = arith.constant 0 : index
    %99 = vector.load %arg12[%c0_61, %c2_62, %c0_63, %c0_64] : memref<2x3x1x48xf32, #tpu.memory_space<vmem>>, vector<1x1x1x48xf32>
    %100 = vector.shape_cast %99 : vector<1x1x1x48xf32> to vector<1x48xf32>
    %101 = vector.broadcast %100 : vector<1x48xf32> to vector<18x48xf32>
    %102 = arith.addf %98, %101 : vector<18x48xf32>
    %cst_65 = arith.constant 0.000000e+00 : f32
    %103 = vector.broadcast %cst_65 : f32 to vector<18x48xf32>
    %c0_66 = arith.constant 0 : index
    %c0_67 = arith.constant 0 : index
    %c0_68 = arith.constant 0 : index
    %104 = vector.load %arg10[%c0_66, %c0_67, %c0_68] : memref<4x1x48xf32, #tpu.memory_space<vmem>>, vector<1x1x48xf32>
    %105 = vector.shape_cast %104 : vector<1x1x48xf32> to vector<1x48xf32>
    %106 = vector.broadcast %105 : vector<1x48xf32> to vector<18x48xf32>
    %107 = arith.mulf %88, %106 : vector<18x48xf32>
    %cst_69 = arith.constant dense<0.000000e+00> : vector<18x18xf32>
    %108 = tpu.matmul %107, %95, %cst_69 {dimension_numbers = #tpu.dot_dimension_numbers<[1], [1], [0], [0], [0, 0, 1, 0], [], []>} : vector<18x48xf32>, vector<18x48xf32>, vector<18x18xf32> -> vector<18x18xf32>
    %cst_70 = arith.constant 0.288675129 : f32
    %109 = vector.broadcast %cst_70 : f32 to vector<18x18xf32>
    %110 = arith.mulf %108, %109 : vector<18x18xf32>
    %111 = arith.addf %110, %81 : vector<18x18xf32>
    %cst_71 = arith.constant dense<0xFF800000> : vector<18xf32>
    %112 = vector.multi_reduction <maximumf>, %111, %cst_71 [1] : vector<18x18xf32> to vector<18xf32>
    %113 = vector.shape_cast %112 : vector<18xf32> to vector<18x1xf32>
    %114 = vector.broadcast %113 : vector<18x1xf32> to vector<18x18xf32>
    %115 = arith.subf %111, %114 : vector<18x18xf32>
    %116 = math.exp %115 : vector<18x18xf32>
    %cst_72 = arith.constant dense<0.000000e+00> : vector<18xf32>
    %117 = vector.multi_reduction <add>, %116, %cst_72 [1] : vector<18x18xf32> to vector<18xf32>
    %118 = vector.shape_cast %117 : vector<18xf32> to vector<18x1xf32>
    %119 = tpu.reciprocal %118 {approx = true} : vector<18x1xf32> -> vector<18x1xf32>
    %120 = vector.broadcast %119 : vector<18x1xf32> to vector<18x18xf32>
    %121 = arith.mulf %116, %120 : vector<18x18xf32>
    %122 = vector.broadcast %105 : vector<1x48xf32> to vector<18x48xf32>
    %123 = arith.mulf %102, %122 : vector<18x48xf32>
    %cst_73 = arith.constant dense<0.000000e+00> : vector<18x48xf32>
    %124 = tpu.matmul %121, %123, %cst_73 {dimension_numbers = #tpu.dot_dimension_numbers<[1], [0], [0], [1], [0, 0, 1, 1], [], []>} : vector<18x18xf32>, vector<18x48xf32>, vector<18x48xf32> -> vector<18x48xf32>
    %125 = arith.addf %103, %124 : vector<18x48xf32>
    %c1_74 = arith.constant 1 : index
    %c0_75 = arith.constant 0 : index
    %c0_76 = arith.constant 0 : index
    %126 = vector.load %arg10[%c1_74, %c0_75, %c0_76] : memref<4x1x48xf32, #tpu.memory_space<vmem>>, vector<1x1x48xf32>
    %127 = vector.shape_cast %126 : vector<1x1x48xf32> to vector<1x48xf32>
    %128 = vector.broadcast %127 : vector<1x48xf32> to vector<18x48xf32>
    %129 = arith.mulf %88, %128 : vector<18x48xf32>
    %cst_77 = arith.constant dense<0.000000e+00> : vector<18x18xf32>
    %130 = tpu.matmul %129, %95, %cst_77 {dimension_numbers = #tpu.dot_dimension_numbers<[1], [1], [0], [0], [0, 0, 1, 0], [], []>} : vector<18x48xf32>, vector<18x48xf32>, vector<18x18xf32> -> vector<18x18xf32>
    %cst_78 = arith.constant 0.288675129 : f32
    %131 = vector.broadcast %cst_78 : f32 to vector<18x18xf32>
    %132 = arith.mulf %130, %131 : vector<18x18xf32>
    %133 = arith.addf %132, %81 : vector<18x18xf32>
    %cst_79 = arith.constant dense<0xFF800000> : vector<18xf32>
    %134 = vector.multi_reduction <maximumf>, %133, %cst_79 [1] : vector<18x18xf32> to vector<18xf32>
    %135 = vector.shape_cast %134 : vector<18xf32> to vector<18x1xf32>
    %136 = vector.broadcast %135 : vector<18x1xf32> to vector<18x18xf32>
    %137 = arith.subf %133, %136 : vector<18x18xf32>
    %138 = math.exp %137 : vector<18x18xf32>
    %cst_80 = arith.constant dense<0.000000e+00> : vector<18xf32>
    %139 = vector.multi_reduction <add>, %138, %cst_80 [1] : vector<18x18xf32> to vector<18xf32>
    %140 = vector.shape_cast %139 : vector<18xf32> to vector<18x1xf32>
    %141 = tpu.reciprocal %140 {approx = true} : vector<18x1xf32> -> vector<18x1xf32>
    %142 = vector.broadcast %141 : vector<18x1xf32> to vector<18x18xf32>
    %143 = arith.mulf %138, %142 : vector<18x18xf32>
    %144 = vector.broadcast %127 : vector<1x48xf32> to vector<18x48xf32>
    %145 = arith.mulf %102, %144 : vector<18x48xf32>
    %cst_81 = arith.constant dense<0.000000e+00> : vector<18x48xf32>
    %146 = tpu.matmul %143, %145, %cst_81 {dimension_numbers = #tpu.dot_dimension_numbers<[1], [0], [0], [1], [0, 0, 1, 1], [], []>} : vector<18x18xf32>, vector<18x48xf32>, vector<18x48xf32> -> vector<18x48xf32>
    %147 = arith.addf %125, %146 : vector<18x48xf32>
    %c2_82 = arith.constant 2 : index
    %c0_83 = arith.constant 0 : index
    %c0_84 = arith.constant 0 : index
    %148 = vector.load %arg10[%c2_82, %c0_83, %c0_84] : memref<4x1x48xf32, #tpu.memory_space<vmem>>, vector<1x1x48xf32>
    %149 = vector.shape_cast %148 : vector<1x1x48xf32> to vector<1x48xf32>
    %150 = vector.broadcast %149 : vector<1x48xf32> to vector<18x48xf32>
    %151 = arith.mulf %88, %150 : vector<18x48xf32>
    %cst_85 = arith.constant dense<0.000000e+00> : vector<18x18xf32>
    %152 = tpu.matmul %151, %95, %cst_85 {dimension_numbers = #tpu.dot_dimension_numbers<[1], [1], [0], [0], [0, 0, 1, 0], [], []>} : vector<18x48xf32>, vector<18x48xf32>, vector<18x18xf32> -> vector<18x18xf32>
    %cst_86 = arith.constant 0.288675129 : f32
    %153 = vector.broadcast %cst_86 : f32 to vector<18x18xf32>
    %154 = arith.mulf %152, %153 : vector<18x18xf32>
    %155 = arith.addf %154, %81 : vector<18x18xf32>
    %cst_87 = arith.constant dense<0xFF800000> : vector<18xf32>
    %156 = vector.multi_reduction <maximumf>, %155, %cst_87 [1] : vector<18x18xf32> to vector<18xf32>
    %157 = vector.shape_cast %156 : vector<18xf32> to vector<18x1xf32>
    %158 = vector.broadcast %157 : vector<18x1xf32> to vector<18x18xf32>
    %159 = arith.subf %155, %158 : vector<18x18xf32>
    %160 = math.exp %159 : vector<18x18xf32>
    %cst_88 = arith.constant dense<0.000000e+00> : vector<18xf32>
    %161 = vector.multi_reduction <add>, %160, %cst_88 [1] : vector<18x18xf32> to vector<18xf32>
    %162 = vector.shape_cast %161 : vector<18xf32> to vector<18x1xf32>
    %163 = tpu.reciprocal %162 {approx = true} : vector<18x1xf32> -> vector<18x1xf32>
    %164 = vector.broadcast %163 : vector<18x1xf32> to vector<18x18xf32>
    %165 = arith.mulf %160, %164 : vector<18x18xf32>
    %166 = vector.broadcast %149 : vector<1x48xf32> to vector<18x48xf32>
    %167 = arith.mulf %102, %166 : vector<18x48xf32>
    %cst_89 = arith.constant dense<0.000000e+00> : vector<18x48xf32>
    %168 = tpu.matmul %165, %167, %cst_89 {dimension_numbers = #tpu.dot_dimension_numbers<[1], [0], [0], [1], [0, 0, 1, 1], [], []>} : vector<18x18xf32>, vector<18x48xf32>, vector<18x48xf32> -> vector<18x48xf32>
    %169 = arith.addf %147, %168 : vector<18x48xf32>
    %c3 = arith.constant 3 : index
    %c0_90 = arith.constant 0 : index
    %c0_91 = arith.constant 0 : index
    %170 = vector.load %arg10[%c3, %c0_90, %c0_91] : memref<4x1x48xf32, #tpu.memory_space<vmem>>, vector<1x1x48xf32>
    %171 = vector.shape_cast %170 : vector<1x1x48xf32> to vector<1x48xf32>
    %172 = vector.broadcast %171 : vector<1x48xf32> to vector<18x48xf32>
    %173 = arith.mulf %88, %172 : vector<18x48xf32>
    %cst_92 = arith.constant dense<0.000000e+00> : vector<18x18xf32>
    %174 = tpu.matmul %173, %95, %cst_92 {dimension_numbers = #tpu.dot_dimension_numbers<[1], [1], [0], [0], [0, 0, 1, 0], [], []>} : vector<18x48xf32>, vector<18x48xf32>, vector<18x18xf32> -> vector<18x18xf32>
    %cst_93 = arith.constant 0.288675129 : f32
    %175 = vector.broadcast %cst_93 : f32 to vector<18x18xf32>
    %176 = arith.mulf %174, %175 : vector<18x18xf32>
    %177 = arith.addf %176, %81 : vector<18x18xf32>
    %cst_94 = arith.constant dense<0xFF800000> : vector<18xf32>
    %178 = vector.multi_reduction <maximumf>, %177, %cst_94 [1] : vector<18x18xf32> to vector<18xf32>
    %179 = vector.shape_cast %178 : vector<18xf32> to vector<18x1xf32>
    %180 = vector.broadcast %179 : vector<18x1xf32> to vector<18x18xf32>
    %181 = arith.subf %177, %180 : vector<18x18xf32>
    %182 = math.exp %181 : vector<18x18xf32>
    %cst_95 = arith.constant dense<0.000000e+00> : vector<18xf32>
    %183 = vector.multi_reduction <add>, %182, %cst_95 [1] : vector<18x18xf32> to vector<18xf32>
    %184 = vector.shape_cast %183 : vector<18xf32> to vector<18x1xf32>
    %185 = tpu.reciprocal %184 {approx = true} : vector<18x1xf32> -> vector<18x1xf32>
    %186 = vector.broadcast %185 : vector<18x1xf32> to vector<18x18xf32>
    %187 = arith.mulf %182, %186 : vector<18x18xf32>
    %188 = vector.broadcast %171 : vector<1x48xf32> to vector<18x48xf32>
    %189 = arith.mulf %102, %188 : vector<18x48xf32>
    %cst_96 = arith.constant dense<0.000000e+00> : vector<18x48xf32>
    %190 = tpu.matmul %187, %189, %cst_96 {dimension_numbers = #tpu.dot_dimension_numbers<[1], [0], [0], [1], [0, 0, 1, 1], [], []>} : vector<18x18xf32>, vector<18x48xf32>, vector<18x48xf32> -> vector<18x48xf32>
    %191 = arith.addf %169, %190 : vector<18x48xf32>
    %c0_97 = arith.constant 0 : index
    %c0_98 = arith.constant 0 : index
    %c0_99 = arith.constant 0 : index
    %192 = vector.load %arg13[%c0_97, %c0_98, %c0_99] : memref<2x48x48xf32, #tpu.memory_space<vmem>>, vector<1x48x48xf32>
    %193 = vector.shape_cast %192 : vector<1x48x48xf32> to vector<48x48xf32>
    %cst_100 = arith.constant dense<0.000000e+00> : vector<18x48xf32>
    %194 = tpu.matmul %191, %193, %cst_100 {dimension_numbers = #tpu.dot_dimension_numbers<[1], [0], [0], [1], [0, 0, 1, 1], [], []>} : vector<18x48xf32>, vector<48x48xf32>, vector<18x48xf32> -> vector<18x48xf32>
    %195 = arith.addf %80, %194 : vector<18x48xf32>
    %c0_101 = arith.constant 0 : index
    %c0_102 = arith.constant 0 : index
    %c0_103 = arith.constant 0 : index
    %196 = vector.load %arg14[%c0_101, %c0_102, %c0_103] : memref<2x1x48xf32, #tpu.memory_space<vmem>>, vector<1x1x48xf32>
    %197 = vector.shape_cast %196 : vector<1x1x48xf32> to vector<1x48xf32>
    %198 = vector.broadcast %197 : vector<1x48xf32> to vector<18x48xf32>
    %199 = arith.addf %195, %198 : vector<18x48xf32>
    %c0_104 = arith.constant 0 : index
    %c0_105 = arith.constant 0 : index
    %c0_106 = arith.constant 0 : index
    %200 = vector.load %arg15[%c0_104, %c0_105, %c0_106] : memref<2x48x64xf32, #tpu.memory_space<vmem>>, vector<1x48x64xf32>
    %201 = vector.shape_cast %200 : vector<1x48x64xf32> to vector<48x64xf32>
    %cst_107 = arith.constant dense<0.000000e+00> : vector<18x64xf32>
    %202 = tpu.matmul %199, %201, %cst_107 {dimension_numbers = #tpu.dot_dimension_numbers<[1], [0], [0], [1], [0, 0, 1, 1], [], []>} : vector<18x48xf32>, vector<48x64xf32>, vector<18x64xf32> -> vector<18x64xf32>
    %c0_108 = arith.constant 0 : index
    %c0_109 = arith.constant 0 : index
    %c0_110 = arith.constant 0 : index
    %203 = vector.load %arg16[%c0_108, %c0_109, %c0_110] : memref<2x1x64xf32, #tpu.memory_space<vmem>>, vector<1x1x64xf32>
    %204 = vector.shape_cast %203 : vector<1x1x64xf32> to vector<1x64xf32>
    %205 = vector.broadcast %204 : vector<1x64xf32> to vector<18x64xf32>
    %206 = arith.addf %202, %205 : vector<18x64xf32>
    %cst_111 = arith.constant 5.000000e-01 : f32
    %207 = vector.broadcast %cst_111 : f32 to vector<18x64xf32>
    %208 = arith.mulf %207, %206 : vector<18x64xf32>
    %cst_112 = arith.constant 0.707106769 : f32
    %209 = vector.broadcast %cst_112 : f32 to vector<18x64xf32>
    %210 = arith.mulf %206, %209 : vector<18x64xf32>
    %211 = math.absf %210 : vector<18x64xf32>
    %cst_113 = arith.constant 0.327591091 : f32
    %212 = vector.broadcast %cst_113 : f32 to vector<18x64xf32>
    %213 = arith.mulf %212, %211 : vector<18x64xf32>
    %cst_114 = arith.constant 1.000000e+00 : f32
    %214 = vector.broadcast %cst_114 : f32 to vector<18x64xf32>
    %215 = arith.addf %214, %213 : vector<18x64xf32>
    %216 = tpu.reciprocal %215 {approx = true} : vector<18x64xf32> -> vector<18x64xf32>
    %cst_115 = arith.constant 1.06140542 : f32
    %217 = vector.broadcast %cst_115 : f32 to vector<18x64xf32>
    %218 = arith.mulf %217, %216 : vector<18x64xf32>
    %cst_116 = arith.constant -1.45315206 : f32
    %219 = vector.broadcast %cst_116 : f32 to vector<18x64xf32>
    %220 = arith.addf %218, %219 : vector<18x64xf32>
    %221 = arith.mulf %220, %216 : vector<18x64xf32>
    %cst_117 = arith.constant 1.42141378 : f32
    %222 = vector.broadcast %cst_117 : f32 to vector<18x64xf32>
    %223 = arith.addf %221, %222 : vector<18x64xf32>
    %224 = arith.mulf %223, %216 : vector<18x64xf32>
    %cst_118 = arith.constant -0.284496725 : f32
    %225 = vector.broadcast %cst_118 : f32 to vector<18x64xf32>
    %226 = arith.addf %224, %225 : vector<18x64xf32>
    %227 = arith.mulf %226, %216 : vector<18x64xf32>
    %cst_119 = arith.constant 0.254829586 : f32
    %228 = vector.broadcast %cst_119 : f32 to vector<18x64xf32>
    %229 = arith.addf %227, %228 : vector<18x64xf32>
    %230 = arith.mulf %229, %216 : vector<18x64xf32>
    %cst_120 = arith.constant 0.000000e+00 : f32
    %231 = vector.broadcast %cst_120 : f32 to vector<18x64xf32>
    %232 = arith.subf %231, %211 : vector<18x64xf32>
    %233 = arith.mulf %232, %211 : vector<18x64xf32>
    %234 = math.exp %233 : vector<18x64xf32>
    %235 = arith.mulf %230, %234 : vector<18x64xf32>
    %cst_121 = arith.constant 1.000000e+00 : f32
    %236 = vector.broadcast %cst_121 : f32 to vector<18x64xf32>
    %237 = arith.subf %236, %235 : vector<18x64xf32>
    %cst_122 = arith.constant 0.000000e+00 : f32
    %238 = vector.broadcast %cst_122 : f32 to vector<18x64xf32>
    %239 = arith.cmpf oge, %210, %238 : vector<18x64xf32>
    %cst_123 = arith.constant 0.000000e+00 : f32
    %240 = vector.broadcast %cst_123 : f32 to vector<18x64xf32>
    %241 = arith.subf %240, %237 : vector<18x64xf32>
    %242 = arith.select %239, %237, %241 : vector<18x64xi1>, vector<18x64xf32>
    %cst_124 = arith.constant 1.000000e+00 : f32
    %243 = vector.broadcast %cst_124 : f32 to vector<18x64xf32>
    %244 = arith.addf %243, %242 : vector<18x64xf32>
    %245 = arith.mulf %208, %244 : vector<18x64xf32>
    %c0_125 = arith.constant 0 : index
    %c0_126 = arith.constant 0 : index
    %c0_127 = arith.constant 0 : index
    %246 = vector.load %arg17[%c0_125, %c0_126, %c0_127] : memref<2x64x48xf32, #tpu.memory_space<vmem>>, vector<1x64x48xf32>
    %247 = vector.shape_cast %246 : vector<1x64x48xf32> to vector<64x48xf32>
    %cst_128 = arith.constant dense<0.000000e+00> : vector<18x48xf32>
    %248 = tpu.matmul %245, %247, %cst_128 {dimension_numbers = #tpu.dot_dimension_numbers<[1], [0], [0], [1], [0, 0, 1, 1], [], []>} : vector<18x64xf32>, vector<64x48xf32>, vector<18x48xf32> -> vector<18x48xf32>
    %249 = arith.addf %199, %248 : vector<18x48xf32>
    %c0_129 = arith.constant 0 : index
    %c0_130 = arith.constant 0 : index
    %c0_131 = arith.constant 0 : index
    %250 = vector.load %arg18[%c0_129, %c0_130, %c0_131] : memref<2x1x48xf32, #tpu.memory_space<vmem>>, vector<1x1x48xf32>
    %251 = vector.shape_cast %250 : vector<1x1x48xf32> to vector<1x48xf32>
    %252 = vector.broadcast %251 : vector<1x48xf32> to vector<18x48xf32>
    %253 = arith.addf %249, %252 : vector<18x48xf32>
    %c1_132 = arith.constant 1 : index
    %c0_133 = arith.constant 0 : index
    %c0_134 = arith.constant 0 : index
    %c0_135 = arith.constant 0 : index
    %254 = vector.load %arg11[%c1_132, %c0_133, %c0_134, %c0_135] : memref<2x3x48x48xf32, #tpu.memory_space<vmem>>, vector<1x1x48x48xf32>
    %255 = vector.shape_cast %254 : vector<1x1x48x48xf32> to vector<48x48xf32>
    %cst_136 = arith.constant dense<0.000000e+00> : vector<18x48xf32>
    %256 = tpu.matmul %253, %255, %cst_136 {dimension_numbers = #tpu.dot_dimension_numbers<[1], [0], [0], [1], [0, 0, 1, 1], [], []>} : vector<18x48xf32>, vector<48x48xf32>, vector<18x48xf32> -> vector<18x48xf32>
    %c1_137 = arith.constant 1 : index
    %c0_138 = arith.constant 0 : index
    %c0_139 = arith.constant 0 : index
    %c0_140 = arith.constant 0 : index
    %257 = vector.load %arg12[%c1_137, %c0_138, %c0_139, %c0_140] : memref<2x3x1x48xf32, #tpu.memory_space<vmem>>, vector<1x1x1x48xf32>
    %258 = vector.shape_cast %257 : vector<1x1x1x48xf32> to vector<1x48xf32>
    %259 = vector.broadcast %258 : vector<1x48xf32> to vector<18x48xf32>
    %260 = arith.addf %256, %259 : vector<18x48xf32>
    %c1_141 = arith.constant 1 : index
    %c1_142 = arith.constant 1 : index
    %c0_143 = arith.constant 0 : index
    %c0_144 = arith.constant 0 : index
    %261 = vector.load %arg11[%c1_141, %c1_142, %c0_143, %c0_144] : memref<2x3x48x48xf32, #tpu.memory_space<vmem>>, vector<1x1x48x48xf32>
    %262 = vector.shape_cast %261 : vector<1x1x48x48xf32> to vector<48x48xf32>
    %cst_145 = arith.constant dense<0.000000e+00> : vector<18x48xf32>
    %263 = tpu.matmul %253, %262, %cst_145 {dimension_numbers = #tpu.dot_dimension_numbers<[1], [0], [0], [1], [0, 0, 1, 1], [], []>} : vector<18x48xf32>, vector<48x48xf32>, vector<18x48xf32> -> vector<18x48xf32>
    %c1_146 = arith.constant 1 : index
    %c1_147 = arith.constant 1 : index
    %c0_148 = arith.constant 0 : index
    %c0_149 = arith.constant 0 : index
    %264 = vector.load %arg12[%c1_146, %c1_147, %c0_148, %c0_149] : memref<2x3x1x48xf32, #tpu.memory_space<vmem>>, vector<1x1x1x48xf32>
    %265 = vector.shape_cast %264 : vector<1x1x1x48xf32> to vector<1x48xf32>
    %266 = vector.broadcast %265 : vector<1x48xf32> to vector<18x48xf32>
    %267 = arith.addf %263, %266 : vector<18x48xf32>
    %c1_150 = arith.constant 1 : index
    %c2_151 = arith.constant 2 : index
    %c0_152 = arith.constant 0 : index
    %c0_153 = arith.constant 0 : index
    %268 = vector.load %arg11[%c1_150, %c2_151, %c0_152, %c0_153] : memref<2x3x48x48xf32, #tpu.memory_space<vmem>>, vector<1x1x48x48xf32>
    %269 = vector.shape_cast %268 : vector<1x1x48x48xf32> to vector<48x48xf32>
    %cst_154 = arith.constant dense<0.000000e+00> : vector<18x48xf32>
    %270 = tpu.matmul %253, %269, %cst_154 {dimension_numbers = #tpu.dot_dimension_numbers<[1], [0], [0], [1], [0, 0, 1, 1], [], []>} : vector<18x48xf32>, vector<48x48xf32>, vector<18x48xf32> -> vector<18x48xf32>
    %c1_155 = arith.constant 1 : index
    %c2_156 = arith.constant 2 : index
    %c0_157 = arith.constant 0 : index
    %c0_158 = arith.constant 0 : index
    %271 = vector.load %arg12[%c1_155, %c2_156, %c0_157, %c0_158] : memref<2x3x1x48xf32, #tpu.memory_space<vmem>>, vector<1x1x1x48xf32>
    %272 = vector.shape_cast %271 : vector<1x1x1x48xf32> to vector<1x48xf32>
    %273 = vector.broadcast %272 : vector<1x48xf32> to vector<18x48xf32>
    %274 = arith.addf %270, %273 : vector<18x48xf32>
    %cst_159 = arith.constant 0.000000e+00 : f32
    %275 = vector.broadcast %cst_159 : f32 to vector<18x48xf32>
    %c0_160 = arith.constant 0 : index
    %c0_161 = arith.constant 0 : index
    %c0_162 = arith.constant 0 : index
    %276 = vector.load %arg10[%c0_160, %c0_161, %c0_162] : memref<4x1x48xf32, #tpu.memory_space<vmem>>, vector<1x1x48xf32>
    %277 = vector.shape_cast %276 : vector<1x1x48xf32> to vector<1x48xf32>
    %278 = vector.broadcast %277 : vector<1x48xf32> to vector<18x48xf32>
    %279 = arith.mulf %260, %278 : vector<18x48xf32>
    %cst_163 = arith.constant dense<0.000000e+00> : vector<18x18xf32>
    %280 = tpu.matmul %279, %267, %cst_163 {dimension_numbers = #tpu.dot_dimension_numbers<[1], [1], [0], [0], [0, 0, 1, 0], [], []>} : vector<18x48xf32>, vector<18x48xf32>, vector<18x18xf32> -> vector<18x18xf32>
    %cst_164 = arith.constant 0.288675129 : f32
    %281 = vector.broadcast %cst_164 : f32 to vector<18x18xf32>
    %282 = arith.mulf %280, %281 : vector<18x18xf32>
    %283 = arith.addf %282, %81 : vector<18x18xf32>
    %cst_165 = arith.constant dense<0xFF800000> : vector<18xf32>
    %284 = vector.multi_reduction <maximumf>, %283, %cst_165 [1] : vector<18x18xf32> to vector<18xf32>
    %285 = vector.shape_cast %284 : vector<18xf32> to vector<18x1xf32>
    %286 = vector.broadcast %285 : vector<18x1xf32> to vector<18x18xf32>
    %287 = arith.subf %283, %286 : vector<18x18xf32>
    %288 = math.exp %287 : vector<18x18xf32>
    %cst_166 = arith.constant dense<0.000000e+00> : vector<18xf32>
    %289 = vector.multi_reduction <add>, %288, %cst_166 [1] : vector<18x18xf32> to vector<18xf32>
    %290 = vector.shape_cast %289 : vector<18xf32> to vector<18x1xf32>
    %291 = tpu.reciprocal %290 {approx = true} : vector<18x1xf32> -> vector<18x1xf32>
    %292 = vector.broadcast %291 : vector<18x1xf32> to vector<18x18xf32>
    %293 = arith.mulf %288, %292 : vector<18x18xf32>
    %294 = vector.broadcast %277 : vector<1x48xf32> to vector<18x48xf32>
    %295 = arith.mulf %274, %294 : vector<18x48xf32>
    %cst_167 = arith.constant dense<0.000000e+00> : vector<18x48xf32>
    %296 = tpu.matmul %293, %295, %cst_167 {dimension_numbers = #tpu.dot_dimension_numbers<[1], [0], [0], [1], [0, 0, 1, 1], [], []>} : vector<18x18xf32>, vector<18x48xf32>, vector<18x48xf32> -> vector<18x48xf32>
    %297 = arith.addf %275, %296 : vector<18x48xf32>
    %c1_168 = arith.constant 1 : index
    %c0_169 = arith.constant 0 : index
    %c0_170 = arith.constant 0 : index
    %298 = vector.load %arg10[%c1_168, %c0_169, %c0_170] : memref<4x1x48xf32, #tpu.memory_space<vmem>>, vector<1x1x48xf32>
    %299 = vector.shape_cast %298 : vector<1x1x48xf32> to vector<1x48xf32>
    %300 = vector.broadcast %299 : vector<1x48xf32> to vector<18x48xf32>
    %301 = arith.mulf %260, %300 : vector<18x48xf32>
    %cst_171 = arith.constant dense<0.000000e+00> : vector<18x18xf32>
    %302 = tpu.matmul %301, %267, %cst_171 {dimension_numbers = #tpu.dot_dimension_numbers<[1], [1], [0], [0], [0, 0, 1, 0], [], []>} : vector<18x48xf32>, vector<18x48xf32>, vector<18x18xf32> -> vector<18x18xf32>
    %cst_172 = arith.constant 0.288675129 : f32
    %303 = vector.broadcast %cst_172 : f32 to vector<18x18xf32>
    %304 = arith.mulf %302, %303 : vector<18x18xf32>
    %305 = arith.addf %304, %81 : vector<18x18xf32>
    %cst_173 = arith.constant dense<0xFF800000> : vector<18xf32>
    %306 = vector.multi_reduction <maximumf>, %305, %cst_173 [1] : vector<18x18xf32> to vector<18xf32>
    %307 = vector.shape_cast %306 : vector<18xf32> to vector<18x1xf32>
    %308 = vector.broadcast %307 : vector<18x1xf32> to vector<18x18xf32>
    %309 = arith.subf %305, %308 : vector<18x18xf32>
    %310 = math.exp %309 : vector<18x18xf32>
    %cst_174 = arith.constant dense<0.000000e+00> : vector<18xf32>
    %311 = vector.multi_reduction <add>, %310, %cst_174 [1] : vector<18x18xf32> to vector<18xf32>
    %312 = vector.shape_cast %311 : vector<18xf32> to vector<18x1xf32>
    %313 = tpu.reciprocal %312 {approx = true} : vector<18x1xf32> -> vector<18x1xf32>
    %314 = vector.broadcast %313 : vector<18x1xf32> to vector<18x18xf32>
    %315 = arith.mulf %310, %314 : vector<18x18xf32>
    %316 = vector.broadcast %299 : vector<1x48xf32> to vector<18x48xf32>
    %317 = arith.mulf %274, %316 : vector<18x48xf32>
    %cst_175 = arith.constant dense<0.000000e+00> : vector<18x48xf32>
    %318 = tpu.matmul %315, %317, %cst_175 {dimension_numbers = #tpu.dot_dimension_numbers<[1], [0], [0], [1], [0, 0, 1, 1], [], []>} : vector<18x18xf32>, vector<18x48xf32>, vector<18x48xf32> -> vector<18x48xf32>
    %319 = arith.addf %297, %318 : vector<18x48xf32>
    %c2_176 = arith.constant 2 : index
    %c0_177 = arith.constant 0 : index
    %c0_178 = arith.constant 0 : index
    %320 = vector.load %arg10[%c2_176, %c0_177, %c0_178] : memref<4x1x48xf32, #tpu.memory_space<vmem>>, vector<1x1x48xf32>
    %321 = vector.shape_cast %320 : vector<1x1x48xf32> to vector<1x48xf32>
    %322 = vector.broadcast %321 : vector<1x48xf32> to vector<18x48xf32>
    %323 = arith.mulf %260, %322 : vector<18x48xf32>
    %cst_179 = arith.constant dense<0.000000e+00> : vector<18x18xf32>
    %324 = tpu.matmul %323, %267, %cst_179 {dimension_numbers = #tpu.dot_dimension_numbers<[1], [1], [0], [0], [0, 0, 1, 0], [], []>} : vector<18x48xf32>, vector<18x48xf32>, vector<18x18xf32> -> vector<18x18xf32>
    %cst_180 = arith.constant 0.288675129 : f32
    %325 = vector.broadcast %cst_180 : f32 to vector<18x18xf32>
    %326 = arith.mulf %324, %325 : vector<18x18xf32>
    %327 = arith.addf %326, %81 : vector<18x18xf32>
    %cst_181 = arith.constant dense<0xFF800000> : vector<18xf32>
    %328 = vector.multi_reduction <maximumf>, %327, %cst_181 [1] : vector<18x18xf32> to vector<18xf32>
    %329 = vector.shape_cast %328 : vector<18xf32> to vector<18x1xf32>
    %330 = vector.broadcast %329 : vector<18x1xf32> to vector<18x18xf32>
    %331 = arith.subf %327, %330 : vector<18x18xf32>
    %332 = math.exp %331 : vector<18x18xf32>
    %cst_182 = arith.constant dense<0.000000e+00> : vector<18xf32>
    %333 = vector.multi_reduction <add>, %332, %cst_182 [1] : vector<18x18xf32> to vector<18xf32>
    %334 = vector.shape_cast %333 : vector<18xf32> to vector<18x1xf32>
    %335 = tpu.reciprocal %334 {approx = true} : vector<18x1xf32> -> vector<18x1xf32>
    %336 = vector.broadcast %335 : vector<18x1xf32> to vector<18x18xf32>
    %337 = arith.mulf %332, %336 : vector<18x18xf32>
    %338 = vector.broadcast %321 : vector<1x48xf32> to vector<18x48xf32>
    %339 = arith.mulf %274, %338 : vector<18x48xf32>
    %cst_183 = arith.constant dense<0.000000e+00> : vector<18x48xf32>
    %340 = tpu.matmul %337, %339, %cst_183 {dimension_numbers = #tpu.dot_dimension_numbers<[1], [0], [0], [1], [0, 0, 1, 1], [], []>} : vector<18x18xf32>, vector<18x48xf32>, vector<18x48xf32> -> vector<18x48xf32>
    %341 = arith.addf %319, %340 : vector<18x48xf32>
    %c3_184 = arith.constant 3 : index
    %c0_185 = arith.constant 0 : index
    %c0_186 = arith.constant 0 : index
    %342 = vector.load %arg10[%c3_184, %c0_185, %c0_186] : memref<4x1x48xf32, #tpu.memory_space<vmem>>, vector<1x1x48xf32>
    %343 = vector.shape_cast %342 : vector<1x1x48xf32> to vector<1x48xf32>
    %344 = vector.broadcast %343 : vector<1x48xf32> to vector<18x48xf32>
    %345 = arith.mulf %260, %344 : vector<18x48xf32>
    %cst_187 = arith.constant dense<0.000000e+00> : vector<18x18xf32>
    %346 = tpu.matmul %345, %267, %cst_187 {dimension_numbers = #tpu.dot_dimension_numbers<[1], [1], [0], [0], [0, 0, 1, 0], [], []>} : vector<18x48xf32>, vector<18x48xf32>, vector<18x18xf32> -> vector<18x18xf32>
    %cst_188 = arith.constant 0.288675129 : f32
    %347 = vector.broadcast %cst_188 : f32 to vector<18x18xf32>
    %348 = arith.mulf %346, %347 : vector<18x18xf32>
    %349 = arith.addf %348, %81 : vector<18x18xf32>
    %cst_189 = arith.constant dense<0xFF800000> : vector<18xf32>
    %350 = vector.multi_reduction <maximumf>, %349, %cst_189 [1] : vector<18x18xf32> to vector<18xf32>
    %351 = vector.shape_cast %350 : vector<18xf32> to vector<18x1xf32>
    %352 = vector.broadcast %351 : vector<18x1xf32> to vector<18x18xf32>
    %353 = arith.subf %349, %352 : vector<18x18xf32>
    %354 = math.exp %353 : vector<18x18xf32>
    %cst_190 = arith.constant dense<0.000000e+00> : vector<18xf32>
    %355 = vector.multi_reduction <add>, %354, %cst_190 [1] : vector<18x18xf32> to vector<18xf32>
    %356 = vector.shape_cast %355 : vector<18xf32> to vector<18x1xf32>
    %357 = tpu.reciprocal %356 {approx = true} : vector<18x1xf32> -> vector<18x1xf32>
    %358 = vector.broadcast %357 : vector<18x1xf32> to vector<18x18xf32>
    %359 = arith.mulf %354, %358 : vector<18x18xf32>
    %360 = vector.broadcast %343 : vector<1x48xf32> to vector<18x48xf32>
    %361 = arith.mulf %274, %360 : vector<18x48xf32>
    %cst_191 = arith.constant dense<0.000000e+00> : vector<18x48xf32>
    %362 = tpu.matmul %359, %361, %cst_191 {dimension_numbers = #tpu.dot_dimension_numbers<[1], [0], [0], [1], [0, 0, 1, 1], [], []>} : vector<18x18xf32>, vector<18x48xf32>, vector<18x48xf32> -> vector<18x48xf32>
    %363 = arith.addf %341, %362 : vector<18x48xf32>
    %c1_192 = arith.constant 1 : index
    %c0_193 = arith.constant 0 : index
    %c0_194 = arith.constant 0 : index
    %364 = vector.load %arg13[%c1_192, %c0_193, %c0_194] : memref<2x48x48xf32, #tpu.memory_space<vmem>>, vector<1x48x48xf32>
    %365 = vector.shape_cast %364 : vector<1x48x48xf32> to vector<48x48xf32>
    %cst_195 = arith.constant dense<0.000000e+00> : vector<18x48xf32>
    %366 = tpu.matmul %363, %365, %cst_195 {dimension_numbers = #tpu.dot_dimension_numbers<[1], [0], [0], [1], [0, 0, 1, 1], [], []>} : vector<18x48xf32>, vector<48x48xf32>, vector<18x48xf32> -> vector<18x48xf32>
    %367 = arith.addf %253, %366 : vector<18x48xf32>
    %c1_196 = arith.constant 1 : index
    %c0_197 = arith.constant 0 : index
    %c0_198 = arith.constant 0 : index
    %368 = vector.load %arg14[%c1_196, %c0_197, %c0_198] : memref<2x1x48xf32, #tpu.memory_space<vmem>>, vector<1x1x48xf32>
    %369 = vector.shape_cast %368 : vector<1x1x48xf32> to vector<1x48xf32>
    %370 = vector.broadcast %369 : vector<1x48xf32> to vector<18x48xf32>
    %371 = arith.addf %367, %370 : vector<18x48xf32>
    %c1_199 = arith.constant 1 : index
    %c0_200 = arith.constant 0 : index
    %c0_201 = arith.constant 0 : index
    %372 = vector.load %arg15[%c1_199, %c0_200, %c0_201] : memref<2x48x64xf32, #tpu.memory_space<vmem>>, vector<1x48x64xf32>
    %373 = vector.shape_cast %372 : vector<1x48x64xf32> to vector<48x64xf32>
    %cst_202 = arith.constant dense<0.000000e+00> : vector<18x64xf32>
    %374 = tpu.matmul %371, %373, %cst_202 {dimension_numbers = #tpu.dot_dimension_numbers<[1], [0], [0], [1], [0, 0, 1, 1], [], []>} : vector<18x48xf32>, vector<48x64xf32>, vector<18x64xf32> -> vector<18x64xf32>
    %c1_203 = arith.constant 1 : index
    %c0_204 = arith.constant 0 : index
    %c0_205 = arith.constant 0 : index
    %375 = vector.load %arg16[%c1_203, %c0_204, %c0_205] : memref<2x1x64xf32, #tpu.memory_space<vmem>>, vector<1x1x64xf32>
    %376 = vector.shape_cast %375 : vector<1x1x64xf32> to vector<1x64xf32>
    %377 = vector.broadcast %376 : vector<1x64xf32> to vector<18x64xf32>
    %378 = arith.addf %374, %377 : vector<18x64xf32>
    %cst_206 = arith.constant 5.000000e-01 : f32
    %379 = vector.broadcast %cst_206 : f32 to vector<18x64xf32>
    %380 = arith.mulf %379, %378 : vector<18x64xf32>
    %cst_207 = arith.constant 0.707106769 : f32
    %381 = vector.broadcast %cst_207 : f32 to vector<18x64xf32>
    %382 = arith.mulf %378, %381 : vector<18x64xf32>
    %383 = math.absf %382 : vector<18x64xf32>
    %cst_208 = arith.constant 0.327591091 : f32
    %384 = vector.broadcast %cst_208 : f32 to vector<18x64xf32>
    %385 = arith.mulf %384, %383 : vector<18x64xf32>
    %cst_209 = arith.constant 1.000000e+00 : f32
    %386 = vector.broadcast %cst_209 : f32 to vector<18x64xf32>
    %387 = arith.addf %386, %385 : vector<18x64xf32>
    %388 = tpu.reciprocal %387 {approx = true} : vector<18x64xf32> -> vector<18x64xf32>
    %cst_210 = arith.constant 1.06140542 : f32
    %389 = vector.broadcast %cst_210 : f32 to vector<18x64xf32>
    %390 = arith.mulf %389, %388 : vector<18x64xf32>
    %cst_211 = arith.constant -1.45315206 : f32
    %391 = vector.broadcast %cst_211 : f32 to vector<18x64xf32>
    %392 = arith.addf %390, %391 : vector<18x64xf32>
    %393 = arith.mulf %392, %388 : vector<18x64xf32>
    %cst_212 = arith.constant 1.42141378 : f32
    %394 = vector.broadcast %cst_212 : f32 to vector<18x64xf32>
    %395 = arith.addf %393, %394 : vector<18x64xf32>
    %396 = arith.mulf %395, %388 : vector<18x64xf32>
    %cst_213 = arith.constant -0.284496725 : f32
    %397 = vector.broadcast %cst_213 : f32 to vector<18x64xf32>
    %398 = arith.addf %396, %397 : vector<18x64xf32>
    %399 = arith.mulf %398, %388 : vector<18x64xf32>
    %cst_214 = arith.constant 0.254829586 : f32
    %400 = vector.broadcast %cst_214 : f32 to vector<18x64xf32>
    %401 = arith.addf %399, %400 : vector<18x64xf32>
    %402 = arith.mulf %401, %388 : vector<18x64xf32>
    %cst_215 = arith.constant 0.000000e+00 : f32
    %403 = vector.broadcast %cst_215 : f32 to vector<18x64xf32>
    %404 = arith.subf %403, %383 : vector<18x64xf32>
    %405 = arith.mulf %404, %383 : vector<18x64xf32>
    %406 = math.exp %405 : vector<18x64xf32>
    %407 = arith.mulf %402, %406 : vector<18x64xf32>
    %cst_216 = arith.constant 1.000000e+00 : f32
    %408 = vector.broadcast %cst_216 : f32 to vector<18x64xf32>
    %409 = arith.subf %408, %407 : vector<18x64xf32>
    %cst_217 = arith.constant 0.000000e+00 : f32
    %410 = vector.broadcast %cst_217 : f32 to vector<18x64xf32>
    %411 = arith.cmpf oge, %382, %410 : vector<18x64xf32>
    %cst_218 = arith.constant 0.000000e+00 : f32
    %412 = vector.broadcast %cst_218 : f32 to vector<18x64xf32>
    %413 = arith.subf %412, %409 : vector<18x64xf32>
    %414 = arith.select %411, %409, %413 : vector<18x64xi1>, vector<18x64xf32>
    %cst_219 = arith.constant 1.000000e+00 : f32
    %415 = vector.broadcast %cst_219 : f32 to vector<18x64xf32>
    %416 = arith.addf %415, %414 : vector<18x64xf32>
    %417 = arith.mulf %380, %416 : vector<18x64xf32>
    %c1_220 = arith.constant 1 : index
    %c0_221 = arith.constant 0 : index
    %c0_222 = arith.constant 0 : index
    %418 = vector.load %arg17[%c1_220, %c0_221, %c0_222] : memref<2x64x48xf32, #tpu.memory_space<vmem>>, vector<1x64x48xf32>
    %419 = vector.shape_cast %418 : vector<1x64x48xf32> to vector<64x48xf32>
    %cst_223 = arith.constant dense<0.000000e+00> : vector<18x48xf32>
    %420 = tpu.matmul %417, %419, %cst_223 {dimension_numbers = #tpu.dot_dimension_numbers<[1], [0], [0], [1], [0, 0, 1, 1], [], []>} : vector<18x64xf32>, vector<64x48xf32>, vector<18x48xf32> -> vector<18x48xf32>
    %421 = arith.addf %371, %420 : vector<18x48xf32>
    %c1_224 = arith.constant 1 : index
    %c0_225 = arith.constant 0 : index
    %c0_226 = arith.constant 0 : index
    %422 = vector.load %arg18[%c1_224, %c0_225, %c0_226] : memref<2x1x48xf32, #tpu.memory_space<vmem>>, vector<1x1x48xf32>
    %423 = vector.shape_cast %422 : vector<1x1x48xf32> to vector<1x48xf32>
    %424 = vector.broadcast %423 : vector<1x48xf32> to vector<18x48xf32>
    %425 = arith.addf %421, %424 : vector<18x48xf32>
    %c0_227 = arith.constant 0 : index
    %c0_228 = arith.constant 0 : index
    %426 = vector.load %arg19[%c0_227, %c0_228] : memref<48x16xf32, #tpu.memory_space<vmem>>, vector<48x16xf32>
    %cst_229 = arith.constant dense<0.000000e+00> : vector<18x16xf32>
    %427 = tpu.matmul %425, %426, %cst_229 {dimension_numbers = #tpu.dot_dimension_numbers<[1], [0], [0], [1], [0, 0, 1, 1], [], []>} : vector<18x48xf32>, vector<48x16xf32>, vector<18x16xf32> -> vector<18x16xf32>
    %c0_230 = arith.constant 0 : index
    %c0_231 = arith.constant 0 : index
    %428 = vector.load %arg20[%c0_230, %c0_231] : memref<1x16xf32, #tpu.memory_space<vmem>>, vector<1x16xf32>
    %429 = vector.broadcast %428 : vector<1x16xf32> to vector<18x16xf32>
    %430 = arith.addf %427, %429 : vector<18x16xf32>
    %c0_232 = arith.constant 0 : index
    %c0_233 = arith.constant 0 : index
    %431 = vector.load %arg21[%c0_232, %c0_233] : memref<18x16xf32, #tpu.memory_space<vmem>>, vector<18x16xf32>
    tpu.vector_store %arg21[%c0_232, %c0_233], %430 {strides = array<i32>} : memref<18x16xf32, #tpu.memory_space<vmem>>, vector<18x16xf32>,
    return
  }
}

</mosaic_0001>

<bundles_post_ra>
// kernel: transformer_forward.1
= control target key start
LH: loop header
LB: loop body
LE: loop exit
PB: predicated region body
PF: predicated region fallthrough
CT: control target
= control target key end

     0   :  { %s6687_s0 = inlined_call_operand.vmem [shape: f32[16,80], index: 0, kind: input, shape index: {}]   ;;  %s6688_s1 = inlined_call_operand.vmem [shape: f32[80,16], index: 1, kind: input, shape index: {}]   ;;  %s6689_s2 = inlined_call_operand.vmem [shape: f32[1,16], index: 2, kind: input, shape index: {}]   ;;  %s6690_s3 = inlined_call_operand.hbm [shape: f32[1,16], index: 3, kind: input, shape index: {}]   ;;  %s6691_s4 = inlined_call_operand.hbm [shape: f32[1,16], index: 4, kind: input, shape index: {}]   ;;  %s6692_s5 = inlined_call_operand.hbm [shape: f32[16,48], index: 5, kind: input, shape index: {}]   ;;  %s6693_s6 = inlined_call_operand.hbm [shape: f32[1,48], index: 6, kind: input, shape index: {}]   ;;  %s6694_s7 = inlined_call_operand.vmem [shape: f32[18,16], index: 7, kind: input, shape index: {}]   ;;  %s6695_s8 = inlined_call_operand.vmem [shape: f32[18,1], index: 8, kind: input, shape index: {}]   ;;  %s6696_s9 = inlined_call_operand.vmem [shape: f32[18,18], index: 9, kind: input, shape index: {}]   ;;  %s6697_s10 = inlined_call_operand.vmem [shape: f32[4,1,48], index: 10, kind: input, shape index: {}]   ;;  %s6698_s11 = inlined_call_operand.vmem [shape: f32[2,3,48,48], index: 11, kind: input, shape index: {}]   ;;  %s6699_s12 = inlined_call_operand.vmem [shape: f32[2,3,1,48], index: 12, kind: input, shape index: {}]   ;;  %s6700_s13 = inlined_call_operand.vmem [shape: f32[2,48,48], index: 13, kind: input, shape index: {}]   ;;  %s6701_s14 = inlined_call_operand.hbm [shape: f32[2,1,48], index: 14, kind: input, shape index: {}]   ;;  %s6702_s15 = inlined_call_operand.vmem [shape: f32[2,48,64], index: 15, kind: input, shape index: {}]   ;;  %s6703_s16 = inlined_call_operand.hbm [shape: f32[2,1,64], index: 16, kind: input, shape index: {}]   ;;  %s6704_s17 = inlined_call_operand.vmem [shape: f32[2,64,48], index: 17, kind: input, shape index: {}]   ;;  %s6705_s18 = inlined_call_operand.hbm [shape: f32[2,1,48], index: 18, kind: input, shape index: {}]   ;;  %s6706_s19 = inlined_call_operand.vmem [shape: f32[48,16], index: 19, kind: input, shape index: {}]   ;;  %s6707_s20 = inlined_call_operand.hbm [shape: f32[1,16], index: 20, kind: input, shape index: {}]   ;;  %s6708_s21 = inlined_call_operand.vmem [shape: f32[18,16], index: 21, kind: output, shape index: {}]  }
   0x1   :  { %6711 = sst [smem:[#allocation20_spill]] %s6687_s0 }
   0x2   :  { %6712 = sst [smem:[#allocation21_spill]] %s6688_s1 }
   0x3   :  { %6713 = sst [smem:[#allocation22_spill]] %s6689_s2 }
   0x4   :  { %6714 = sst [smem:[#allocation23_spill]] %s6690_s3 }
   0x5   :  { %6715 = sst [smem:[#allocation24_spill]] %s6691_s4 }
   0x6   :  { %6716 = sst [smem:[#allocation25_spill]] %s6692_s5 }
   0x7   :  { %26 = vsyncpa [#allocation3], 0 }
   0x8   :  { %27 = vsyncpa [#allocation5], 0 }
   0x9   :  { %28 = vsyncpa [#allocation8], 0 }
   0xa   :  { %29 = vsyncpa [#allocation11], 0 }
   0xb   :  { %30 = vsyncpa [#allocation14], 0  ;;  %s5283_s2 = smov [#allocation4]   ;;  %s5284_s26 = smov [#allocation7]  }
   0xc   :  { %s53_s25 = sshll.u32 %s5283_s2, 4  ;;  %s75_s27 = sshll.u32 %s5284_s26, 4  ;;  %s54_s25 = int_to_ptr.vmem [resolvable:$true] %s53_s25  ;;  %s76_s27 = int_to_ptr.vmem [resolvable:$true] %s75_s27 }
   0xd   :  { %s5121_s3 = scalar_lea.vmem %s54_s25, 16  ;;  %s5125_s28 = scalar_lea.vmem %s54_s25, 32 }
   0xe   :  { %p5122_p0 = scmp.ne.s32.totalorder %s54_s25, %s5121_s3  ;;  %p5126_p1 = scmp.lt.s32.totalorder %s54_s25, %s54_s25 }
   0xf   :  { %p5127_p2 = scmp.lt.s32.totalorder %s5125_s28, %s5121_s3 }
  0x11   :  { %p5128_p3 = por %p5127_p2, %p5126_p1 }
  0x13   :  { %p5129_p4 = pnand %p5128_p3, %p5122_p0 }
  0x15   :  { %5132 = shalt.err (!%p5129_p4)
}
  0x16   :  { %s6717_s4 = sld [smem:[#allocation24_spill]]  ;;  %s5141_s30 = scalar_lea.vmem %s76_s27, 16 }
  0x17   :  { %p5142_p5 = scmp.ne.s32.totalorder %s76_s27, %s5141_s30  ;;  %s5145_s5 = scalar_lea.vmem %s76_s27, 32 }
  0x18   :  { %p5146_p6 = scmp.lt.s32.totalorder %s76_s27, %s76_s27  ;;  %p5147_p7 = scmp.lt.s32.totalorder %s5145_s5, %s5141_s30 }
  0x1a   :  { %p5148_p8 = por %p5147_p7, %p5146_p6 }
  0x1c   :  { %56 = dma.hbm_to_vmem [thread:$0]  %s6717_s4, 16, %s54_s25, [#allocation5]  }
  0x1d   :  { %p5149_p9 = pnand %p5148_p8, %p5142_p5 }
  0x1f   :  { %5152 = shalt.err (!%p5149_p9)
}
  0x20   :  { %78 = dma.hbm_to_vmem [thread:$0]  %s6693_s6, 16, %s76_s27, [#allocation8]  }
  0x21   :  { %s5285_s1 = smov [#allocation10]   ;;  %s5286_s2 = smov [#allocation2]  }
  0x22   :  { %s112_s24 = sshll.u32 %s5285_s1, 4  ;;  %s43_s26 = sshll.u32 %s5286_s2, 4  ;;  %s113_s24 = int_to_ptr.vmem [resolvable:$true] %s112_s24  ;;  %s44_s26 = int_to_ptr.vmem [resolvable:$true] %s43_s26 }
  0x23   :  { %s5161_s3 = scalar_lea.vmem %s113_s24, 32  ;;  %p5166_p11 = scmp.lt.s32.totalorder %s113_s24, %s113_s24 }
  0x24   :  { %p5162_p10 = scmp.ne.s32.totalorder %s113_s24, %s5161_s3  ;;  %p5167_p12 = scmp.lt.s32.totalorder %s5161_s3, %s5161_s3 }
  0x26   :  { %p5168_p13 = por %p5167_p12, %p5166_p11 }
  0x28   :  { %p5169_p0 = pnand %p5168_p13, %p5162_p10 }
  0x2a   :  { %5172 = shalt.err (!%p5169_p0)
}
  0x2b   :  { %s5287_s25 = smov 16   ;;  %s5288_s28 = smov 1  }
  0x2c   :  { %118 = dma.hbm_to_vmem [thread:$0]  %s6703_s16, 32, %s113_s24, [#allocation11], %s5287_s25, %s5287_s25, %s5288_s28  }
  0x2d   :  { %s5181_s27 = scalar_lea.vmem %s44_s26, 16  ;;  %s5185_s0 = scalar_lea.vmem %s44_s26, 32 }
  0x2e   :  { %p5182_p1 = scmp.ne.s32.totalorder %s44_s26, %s5181_s27  ;;  %p5186_p2 = scmp.lt.s32.totalorder %s44_s26, %s44_s26 }
  0x2f   :  { %p5187_p3 = scmp.lt.s32.totalorder %s5185_s0, %s5181_s27 }
  0x31   :  { %p5188_p4 = por %p5187_p3, %p5186_p2 }
  0x33   :  { %p5189_p5 = pnand %p5188_p4, %p5182_p1 }
  0x35   :  { %5192 = shalt.err (!%p5189_p5)
}
  0x36   :  { %s6718_s5 = sld [smem:[#allocation23_spill]]  ;;  %s5289_s22 = smov [#allocation6]  }
  0x37   :  { %s62_s23 = sshll.u32 %s5289_s22, 4  ;;  %s63_s23 = int_to_ptr.vmem [resolvable:$true] %s62_s23 }
  0x38   :  { %s5201_s1 = scalar_lea.vmem %s63_s23, 256  ;;  %p5206_p7 = scmp.lt.s32.totalorder %s63_s23, %s63_s23 }
  0x39   :  { %p5202_p6 = scmp.ne.s32.totalorder %s63_s23, %s5201_s1  ;;  %p5207_p8 = scmp.lt.s32.totalorder %s5201_s1, %s5201_s1 }
  0x3b   :  { %p5208_p9 = por %p5207_p8, %p5206_p7 }
  0x3c   :  { %46 = dma.hbm_to_vmem [thread:$0]  %s6718_s5, 16, %s44_s26, [#allocation3]  }
  0x3d   :  { %p5209_p10 = pnand %p5208_p9, %p5202_p6 }
  0x3f   :  { %5212 = shalt.err (!%p5209_p10)
}
  0x40   :  { %s5290_s16 = smov 128   ;;  %s5291_s24 = smov 8  }
  0x41   :  { %s6719_s29 = sld [smem:[#allocation25_spill]]  ;;  %s5292_s6 = smov [#allocation9]  }
  0x42   :  { %s98_s27 = sshll.u32 %s5292_s6, 4  ;;  %s5293_s26 = smov [#allocation12]   ;;  %s99_s27 = int_to_ptr.vmem [resolvable:$true] %s98_s27 }
  0x43   :  { %s126_s0 = sshll.u32 %s5293_s26, 4  ;;  %s5221_s4 = scalar_lea.vmem %s99_s27, 32  ;;  %s127_s0 = int_to_ptr.vmem [resolvable:$true] %s126_s0 }
  0x44   :  { %p5222_p11 = scmp.ne.s32.totalorder %s99_s27, %s5221_s4  ;;  %p5226_p12 = scmp.lt.s32.totalorder %s99_s27, %s99_s27 }
  0x45   :  { %p5227_p13 = scmp.lt.s32.totalorder %s5221_s4, %s5221_s4 }
  0x47   :  { %68 = dma.hbm_to_vmem [thread:$0]  %s6719_s29, 256, %s63_s23, [#allocation5], %s5290_s16, %s5290_s16, %s5291_s24  }
  0x48   :  { %p5228_p0 = por %p5227_p13, %p5226_p12 }
  0x4a   :  { %p5229_p1 = pnand %p5228_p0, %p5222_p11 }
  0x4c   :  { %5232 = shalt.err (!%p5229_p1)
}
  0x4d   :  { %104 = dma.hbm_to_vmem [thread:$0]  %s6701_s14, 32, %s99_s27, [#allocation8], %s5287_s25, %s5287_s25, %s5288_s28  }
  0x4e   :  { %s5241_s22 = scalar_lea.vmem %s127_s0, 32  ;;  %p5246_p3 = scmp.lt.s32.totalorder %s127_s0, %s127_s0 }
  0x4f   :  { %p5242_p2 = scmp.ne.s32.totalorder %s127_s0, %s5241_s22  ;;  %p5247_p4 = scmp.lt.s32.totalorder %s5241_s22, %s5241_s22 }
  0x51   :  { %p5248_p5 = por %p5247_p4, %p5246_p3 }
  0x53   :  { %p5249_p6 = pnand %p5248_p5, %p5242_p2 }
  0x55   :  { %5252 = shalt.err (!%p5249_p6)
}
  0x56   :  { %132 = dma.hbm_to_vmem [thread:$0]  %s6705_s18, 32, %s127_s0, [#allocation11], %s5287_s25, %s5287_s25, %s5288_s28  }
  0x57   :  { %s5294_s16 = smov [#allocation13]  }
  0x58   :  { %s141_s24 = sshll.u32 %s5294_s16, 4  ;;  %s142_s24 = int_to_ptr.vmem [resolvable:$true] %s141_s24 }
  0x59   :  { %s5261_s2 = scalar_lea.vmem %s142_s24, 16  ;;  %s5265_s14 = scalar_lea.vmem %s142_s24, 32 }
  0x5a   :  { %p5262_p7 = scmp.ne.s32.totalorder %s142_s24, %s5261_s2  ;;  %p5266_p8 = scmp.lt.s32.totalorder %s142_s24, %s142_s24 }
  0x5b   :  { %p5267_p9 = scmp.lt.s32.totalorder %s5265_s14, %s5261_s2 }
  0x5d   :  { %p5268_p10 = por %p5267_p9, %p5266_p8 }
  0x5f   :  { %p5269_p11 = pnand %p5268_p10, %p5262_p7 }
  0x61   :  { %5272 = shalt.err (!%p5269_p11)
}
  0x62   :  { %144 = dma.hbm_to_vmem [thread:$0]  %s6707_s20, 16, %s142_s24, [#allocation14]  }
  0x63   :  { %5273 = dma.done.wait [#allocation3], 16  }
  0x64   :  { %5274 = vsyncadd [#allocation3], 4294967280 }
  0x65   :  { %5275 = dma.done.wait [#allocation5], 272  }
  0x66   :  { %5276 = vsyncadd [#allocation5], 4294967024 }
  0x67   :  { %5277 = dma.done.wait [#allocation8], 48  }
  0x68   :  { %5278 = vsyncadd [#allocation8], 4294967248 }
  0x69   :  { %5279 = dma.done.wait [#allocation11], 64  }
  0x6a   :  { %5280 = vsyncadd [#allocation11], 4294967232 }
  0x6b   :  { %5281 = dma.done.wait [#allocation14], 16  }
  0x6c   :  { %5282 = vsyncadd [#allocation14], 4294967280  ;;  %s6720_s28 = sld [smem:[#allocation21_spill]]  ;;  %vm188_vm0 = vcmask 654336   ;;  %vm324_vm3 = vcmask 130048   ;;  %vm5296_vm4 = vmmov 0  }
  0x6d   :  { %s6721_s30 = sld [smem:[#allocation20_spill]]  ;;  %vm586_vm5 = vcmask 392192   ;;  %vm1169_vm6 = vcmask 1041408   ;;  %vm980_vm7 = vcmask 146432   ;;  %vm987_vm8 = vcmask 140288  }
  0x6e   :  { %s6722_s5 = sld [smem:[#allocation22_spill]]  ;;  %vm2115_vm10 = vcmask 523264  }
  0x72   :  { %v180_v0 = vld [vmem:[%s6720_s28 + $0x48] sm:$0xff]  ;;  %v179_v1 = vld [vmem:[%s6720_s28 + $0x40] sm:$0xff]  ;;  %v178_v2 = vld [vmem:[%s6720_s28 + $0x38] sm:$0xff] }
  0x73   :  { %4393 = vmatprep.subr.mxu0 %v180_v0  ;;  %v5453_v3 = vld [vmem:[%s6721_s30] sm:$0xff]  ;;  %v177_v4 = vld [vmem:[%s6720_s28 + $0x30] sm:$0xff]  ;;  %v176_v5 = vld [vmem:[%s6720_s28 + $0x28] sm:$0xff] }
  0x74   :  { %4394 = vmatpush3.msra.mxu0 %v180_v0  ;;  %4413 = vmatprep.mubr.msk.f32.mxu0 %vm188_vm0, %v5453_v3  ;;  %v175_v6 = vld [vmem:[%s6720_s28 + $0x20] sm:$0xff]  ;;  %v174_v7 = vld [vmem:[%s6720_s28 + $0x18] sm:$0xff]  ;;  %v173_v8 = vld [vmem:[%s6720_s28 + $0x10] sm:$0xff] }
  0x75   :  { %4395 = vmatprep.subr.mxu0 %v179_v1  ;;  %v172_v9 = vld [vmem:[%s6720_s28 + $0x8] sm:$0xff]  ;;  %v171_v10 = vld [vmem:[%s6720_s28] sm:$0xff] }
  0x76   :  { %4396 = vmatpush3.msra.mxu0 %v179_v1  ;;  %v5481_v11 = vld [vmem:[%s6721_s30 + $0x8] sm:$0xff]  ;;  %v3950_v12 = vld [vmem:[%s6722_s5] ss:$0 sm:$0xff] }
  0x77   :  { %4397 = vmatprep.subr.mxu0 %v178_v2 }
  0x78   :  { %4398 = vmatpush3.msra.mxu0 %v178_v2 }
  0x79   :  { %4399 = vmatprep.subr.mxu0 %v177_v4 }
  0x7a   :  { %4400 = vmatpush3.msra.mxu0 %v177_v4 }
  0x7b   :  { %4401 = vmatprep.subr.mxu0 %v176_v5 }
  0x7c   :  { %4402 = vmatpush3.msra.mxu0 %v176_v5 }
  0x7d   :  { %4403 = vmatprep.subr.mxu0 %v175_v6 }
  0x7e   :  { %4404 = vmatpush3.msra.mxu0 %v175_v6 }
  0x7f   :  { %4405 = vmatprep.subr.mxu0 %v174_v7 }
  0x80   :  { %4406 = vmatpush3.msra.mxu0 %v174_v7 }
  0x81   :  { %4407 = vmatprep.subr.mxu0 %v173_v8 }
  0x82   :  { %4408 = vmatpush3.msra.mxu0 %v173_v8 }
  0x83   :  { %4409 = vmatprep.subr.mxu0 %v172_v9 }
  0x84   :  { %4410 = vmatpush3.msra.mxu0 %v172_v9 }
  0x85   :  { %4411 = vmatprep.subr.mxu0 %v171_v10 }
  0x86   :  { %4412 = vmatpush3.msra.mxu0 %v171_v10 }
  0x87   :  { %4414 = vmatmul.mubr.msk.f32.vlgmr.msra.gmra.mxu0 %vm188_vm0, %v5481_v11  ;;  %vm3939_vm0 = vcmask 123904  }
 0x147   :  { %v4415_v13 = vpop.f32.mrf.mxu0 }
 0x148   :  { %v267_v14 = vadd.f32 %v4415_v13, %v3950_v12 }
 0x149   :  { %v261_v15 = vpop.f32.mrf.mxu0 }
 0x14a   :  { %v273_v16 = vmul.f32 0.70710677, %v267_v14  ;;  %v262_v17 = vadd.f32 %v3950_v12, %v261_v15  ;;  %v271_v62 = vmul.f32 0.5, %v267_v14 }
 0x14c   :  { %v275_v18 = vand.u32 2147483647, %v273_v16  ;;  %v272_v19 = vmul.f32 0.70710677, %v262_v17  ;;  %vm313_vm1 = vcmp.ge.f32.partialorder %v273_v16, 0.0  ;;  %v270_v63 = vmul.f32 0.5, %v262_v17 }
 0x14e   :  { %v277_v20 = vmul.f32 0.3275911, %v275_v18  ;;  %v274_v21 = vand.u32 2147483647, %v272_v19  ;;  %v301_v25 = vsub.f32 0.0, %v275_v18  ;;  %vm312_vm2 = vcmp.ge.f32.partialorder %v272_v19, 0.0 }
 0x150   :  { %v279_v22 = vadd.f32 1.0, %v277_v20  ;;  %v276_v23 = vmul.f32 0.3275911, %v274_v21  ;;  %v300_v26 = vsub.f32 0.0, %v274_v21  ;;  %v303_v27 = vmul.f32 %v301_v25, %v275_v18  ;;  %v371_v18 = vld [vmem:[#allocation6 + $0x8] sm:$0xff] }
 0x151   :  { %4416 = vmatprep.subr.mxu1 %v371_v18 }
 0x152   :  { %4974 = vrcp.f32 %v279_v22  ;;  %v278_v24 = vadd.f32 1.0, %v276_v23  ;;  %v302_v29 = vmul.f32 %v300_v26, %v274_v21  ;;  %v306_v30 = vmul.f32 1.442695, %v303_v27  ;;  %4417 = vmatpush3.msra.mxu1 %v371_v18  ;;  %v3953_v26 = vld [vmem:[#allocation2] ss:$0 sm:$0xff] }
 0x154   :  { %4976 = vrcp.f32 %v278_v24  ;;  %v304_v34 = vmul.f32 1.442695, %v302_v29 }
 0x155   :  { %4978 = vpow2.f32 %v306_v30 }
 0x156   :  { %4980 = vpow2.f32 %v304_v34 }
 0x15f   :  { %v4975_v28 = vpop.eup %4974 }
 0x160   :  { %v283_v31 = vmul.f32 1.0614054, %v4975_v28 }
 0x161   :  { %v4977_v32 = vpop.eup %4976 }
 0x162   :  { %v285_v33 = vadd.f32 -1.4531521, %v283_v31  ;;  %v282_v35 = vmul.f32 1.0614054, %v4977_v32  ;;  %v4979_v49 = vpop.eup %4978 }
 0x163   :  { %v4981_v53 = vpop.eup %4980 }
 0x164   :  { %v287_v36 = vmul.f32 %v4975_v28, %v285_v33  ;;  %v284_v37 = vadd.f32 -1.4531521, %v282_v35  ;;  %v5295_v35 = vmov 0.0  }
 0x165   :  { %4457 = vmatprep.subr.mxu0 %v5295_v35  ;;  %4469 = vmatprep.mubr.msk.f32.mxu0 %vm5296_vm4, %v5295_v35 }
 0x166   :  { %v289_v38 = vadd.f32 1.4214138, %v287_v36  ;;  %v286_v39 = vmul.f32 %v4977_v32, %v284_v37  ;;  %v463_v36 = vld [vmem:[%s6695_s8] sm:$0xff]  ;;  %v464_v37 = vld [vmem:[%s6695_s8 + $0x8] sm:$0xff] }
 0x168   :  { %v291_v40 = vmul.f32 %v4975_v28, %v289_v38  ;;  %v288_v41 = vadd.f32 1.4214138, %v286_v39  ;;  %v5297_v38 = vmov 0   ;;  %v3970_v39 = vld [vmem:[%s6698_s11 + $0x58] sm:$0xff] }
 0x169   :  { %4973 = vset.pattern.permute.xlu1 %v5297_v38  ;;  %4972 = vset.pattern.permute.xlu0 %v5297_v38 }
 0x16a   :  { %v293_v42 = vadd.f32 -0.28449672, %v291_v40  ;;  %v290_v43 = vmul.f32 %v4977_v32, %v288_v41  ;;  %v3969_v40 = vld [vmem:[%s6698_s11 + $0x50] sm:$0xff]  ;;  %4458 = vmatpush3.msra.mxu0 %v3970_v39 }
 0x16b   :  { %v465_v41 = vld [vmem:[%s6695_s8 + $0x10] sm:$0x3]  ;;  %4459 = vmatprep.subr.mxu0 %v5295_v35 }
 0x16c   :  { %v295_v44 = vmul.f32 %v4975_v28, %v293_v42  ;;  %v292_v45 = vadd.f32 -0.28449672, %v290_v43  ;;  %v3968_v42 = vld [vmem:[%s6698_s11 + $0x48] sm:$0xff]  ;;  %4460 = vmatpush3.msra.mxu0 %v3969_v40  ;;  %v3967_v43 = vld [vmem:[%s6698_s11 + $0x40] sm:$0xff] }
 0x16d   :  { %4461 = vmatprep.subr.mxu0 %v5295_v35 }
 0x16e   :  { %v297_v46 = vadd.f32 0.2548296, %v295_v44  ;;  %v294_v47 = vmul.f32 %v4977_v32, %v292_v45  ;;  %4462 = vmatpush3.msra.mxu0 %v3968_v42  ;;  %v3955_v44 = vld [vmem:[#allocation7] ss:$0 sm:$0xff]  ;;  %v3983_v42 = vld [vmem:[%s6699_s12 + $0x2] ss:$0 sm:$0xff] }
 0x16f   :  { %4463 = vmatprep.subr.mxu0 %v5295_v35 }
 0x170   :  { %v299_v48 = vmul.f32 %v4975_v28, %v297_v46  ;;  %v296_v50 = vadd.f32 0.2548296, %v294_v47  ;;  %v3954_v28 = vld [vmem:[#allocation4] ss:$0 sm:$0xff]  ;;  %4464 = vmatpush3.msra.mxu0 %v3967_v43 }
 0x171   :  { %4465 = vmatprep.subr.mxu0 %v5295_v35 }
 0x172   :  { %v309_v51 = vmul.f32 %v4979_v49, %v299_v48  ;;  %v298_v52 = vmul.f32 %v4977_v32, %v296_v50  ;;  %v460_v49 = vld [vmem:[%s6694_s7] sm:$0xff]  ;;  %v578_v50 = vld [vmem:[%s6698_s11 + $0x28] sm:$0xff] }
 0x174   :  { %v311_v54 = vsub.f32 1.0, %v309_v51  ;;  %v308_v55 = vmul.f32 %v4981_v53, %v298_v52  ;;  %v577_v51 = vld [vmem:[%s6698_s11 + $0x20] sm:$0xff]  ;;  %v461_v52 = vld [vmem:[%s6694_s7 + $0x8] sm:$0xff]  ;;  %v576_v53 = vld [vmem:[%s6698_s11 + $0x18] sm:$0xff] }
 0x176   :  { %v315_v56 = vsub.f32 0.0, %v311_v54  ;;  %v310_v57 = vsub.f32 1.0, %v308_v55  ;;  %v462_v55 = vld [vmem:[%s6694_s7 + $0x10] sm:$0x3] }
 0x178   :  { %v317_v58 = vsel %vm313_vm1, %v311_v54, %v315_v56  ;;  %v314_v59 = vsub.f32 0.0, %v310_v57  ;;  %v575_v54 = vld [vmem:[%s6698_s11 + $0x10] sm:$0xff]  ;;  %v574_v56 = vld [vmem:[%s6698_s11 + $0x8] sm:$0xff] }
 0x179   :  { %v319_v60 = vadd.f32 1.0, %v317_v58  ;;  %v573_v58 = vld [vmem:[%s6698_s11] sm:$0xff] }
 0x17a   :  { %v316_v61 = vsel %vm312_vm2, %v310_v57, %v314_v59  ;;  %v3966_v57 = vld [vmem:[%s6698_s11 + $0x38] sm:$0xff]  ;;  %v3965_v59 = vld [vmem:[%s6698_s11 + $0x30] sm:$0xff] }
 0x17b   :  { %v318_v0 = vadd.f32 1.0, %v316_v61  ;;  %v321_v2 = vmul.f32 %v319_v60, %v271_v62  ;;  %4466 = vmatpush3.msra.mxu0 %v3966_v57 }
 0x17c   :  { %4467 = vmatprep.subr.mxu0 %v5295_v35 }
 0x17d   :  { %v320_v1 = vmul.f32 %v318_v0, %v270_v63  ;;  %v323_v6 = vadd.f32 %v321_v2, %v5481_v11  ;;  %v370_v11 = vld [vmem:[#allocation6] sm:$0xff]  ;;  %4468 = vmatpush3.msra.mxu0 %v3965_v59 }
 0x17e   :  { %4418 = vmatprep.subr.mxu1 %v370_v11  ;;  %4499 = vmatprep.subr.mxu0 %v5295_v35  ;;  %v3981_v63 = vld [vmem:[%s6698_s11 + $0x88] sm:$0xff]  ;;  %v3980_v2 = vld [vmem:[%s6698_s11 + $0x80] sm:$0xff] }
 0x17f   :  { %v322_v4 = vadd.f32 %v320_v1, %v5453_v3  ;;  %v328_v7 = vsel %vm324_vm3, %v323_v6, 0.0  ;;  %4419 = vmatpush3.msra.mxu1 %v370_v11 }
 0x180   :  { %4423 = vmatprep.subr.mxu1 %v5295_v35 }
 0x181   :  { %v325_v5 = vsel %vm324_vm3, %v322_v4, 0.0 }
 0x182   :  { %326 = vadd.xlane.f32.xlu0 %v325_v5 }
 0x186   :  { %329 = vadd.xlane.f32.xlu0 %v328_v7  ;;  %v3979_v7 = vld [vmem:[%s6698_s11 + $0x78] sm:$0xff] }
 0x19c   :  { %468 = vperm.xlu0 %4972, %v463_v36  }
 0x20b   :  { %v327_v8 = vpop.xlane.xlu0 %326 }
 0x20c   :  { %v332_v9 = vmul.f32 0.0625, %v327_v8 }
 0x20e   :  { %v334_v10 = vsub.f32 %v322_v4, %v332_v9 }
 0x20f   :  { %v330_v12 = vpop.xlane.xlu0 %329 }
 0x210   :  { %v333_v13 = vmul.f32 0.0625, %v330_v12  ;;  %v336_v14 = vmul.f32 %v334_v10, %v334_v10 }
 0x212   :  { %v335_v15 = vsub.f32 %v323_v6, %v333_v13  ;;  %v338_v16 = vsel %vm324_vm3, %v336_v14, 0.0  ;;  %v3977_v14 = vld [vmem:[%s6698_s11 + $0x68] sm:$0xff] }
 0x213   :  { %339 = vadd.xlane.f32.xlu1 %v338_v16 }
 0x214   :  { %v337_v3 = vmul.f32 %v335_v15, %v335_v15 }
 0x216   :  { %v341_v17 = vsel %vm324_vm3, %v337_v3, 0.0 }
 0x217   :  { %342 = vadd.xlane.f32.xlu1 %v341_v17  ;;  %v469_v60 = vpop.permute.xlu0 %468 }
 0x228   :  { %473 = vperm.xlu1 %4973, %v464_v37  }
 0x22c   :  { %478 = vperm.xlu1 %4973, %v465_v41  }
 0x29c   :  { %v340_v19 = vpop.xlane.xlu1 %339 }
 0x29d   :  { %v344_v20 = vmul.f32 0.0625, %v340_v19 }
 0x29f   :  { %v346_v21 = vadd.f32 1e-05, %v344_v20 }
 0x2a0   :  { %v343_v22 = vpop.xlane.xlu1 %342 }
 0x2a1   :  { %4982 = vrsqrt.f32 %v346_v21  ;;  %v345_v23 = vmul.f32 0.0625, %v343_v22  ;;  %v3972_v22 = vld [vmem:[%s6699_s12 + $0x1] ss:$0 sm:$0xff] }
 0x2a3   :  { %v347_v24 = vadd.f32 1e-05, %v345_v23 }
 0x2a4   :  { %v474_v0 = vpop.permute.xlu1 %473 }
 0x2a5   :  { %4984 = vrsqrt.f32 %v347_v24 }
 0x2a8   :  { %v479_v8 = vpop.permute.xlu1 %478 }
 0x2ae   :  { %v4983_v25 = vpop.eup %4982 }
 0x2af   :  { %v350_v27 = vmul.f32 %v4983_v25, %v334_v10  ;;  %v3978_v10 = vld [vmem:[%s6698_s11 + $0x70] sm:$0xff] }
 0x2b1   :  { %v359_v29 = vmul.f32 %v3953_v26, %v350_v27 }
 0x2b2   :  { %v4985_v30 = vpop.eup %4984 }
 0x2b3   :  { %v351_v31 = vmul.f32 %v4985_v30, %v335_v15  ;;  %v368_v32 = vadd.f32 %v3954_v28, %v359_v29  ;;  %v3976_v15 = vld [vmem:[%s6698_s11 + $0x60] sm:$0xff] }
 0x2b5   :  { %v360_v33 = vmul.f32 %v3953_v26, %v351_v31  ;;  %4420 = vmatprep.mubr.msk.f32.mxu1 %vm324_vm3, %v368_v32 }
 0x2b7   :  { %v369_v34 = vadd.f32 %v3954_v28, %v360_v33  ;;  %v3961_v28 = vld [vmem:[%s6699_s12] ss:$0 sm:$0xff] }
 0x2b8   :  { %v3987_v33 = vld [vmem:[%s6697_s10] ss:$0 sm:$0xff] }
 0x2b9   :  { %4421 = vmatmul.mubr.msk.f32.vlgmr.msra.gmra.mxu1 %vm324_vm3, %v369_v34  ;;  %v3995_v34 = vld [vmem:[%s6697_s10 + $0x1] ss:$0 sm:$0xff] }
 0x2ba   :  { %4427 = vmatprep.mubr.msk.f32.mxu1 %vm5296_vm4, %v5295_v35 }
 0x379   :  { %v4422_v45 = vpop.f32.mrf.mxu1 }
 0x37a   :  { %v457_v46 = vadd.f32 %v4422_v45, %v3955_v44 }
 0x37b   :  { %v451_v47 = vpop.f32.mrf.mxu1 }
 0x37c   :  { %v452_v48 = vadd.f32 %v3955_v44, %v451_v47  ;;  %4424 = vmatpush3.msra.mxu1 %v457_v46 }
 0x37d   :  { %4425 = vmatprep.subr.mxu1 %v5295_v35 }
 0x37e   :  { %4426 = vmatpush3.msra.mxu1 %v452_v48 }
 0x37f   :  { %4428 = vmatmul.mubr.msk.f32.vlgmr.msra.gmra.mxu1 %vm324_vm3, %v460_v49  ;;  %4436 = vmatprep.subr.mxu1 %v5295_v35 }
 0x380   :  { %4430 = vmatprep.mubr.msk.f32.mxu1 %vm5296_vm4, %v5295_v35  ;;  %4437 = vmatpush3.msra.mxu1 %v578_v50 }
 0x381   :  { %4438 = vmatprep.subr.mxu1 %v5295_v35 }
 0x382   :  { %4439 = vmatpush3.msra.mxu1 %v577_v51 }
 0x383   :  { %4431 = vmatmul.mubr.msk.f32.gmra.mxu1 %vm324_vm3, %v461_v52  ;;  %4440 = vmatprep.subr.mxu1 %v5295_v35 }
 0x384   :  { %4433 = vmatprep.mubr.msk.f32.mxu1 %vm5296_vm4, %v5295_v35  ;;  %4441 = vmatpush3.msra.mxu1 %v576_v53 }
 0x385   :  { %4442 = vmatprep.subr.mxu1 %v5295_v35 }
 0x386   :  { %4443 = vmatpush3.msra.mxu1 %v575_v54 }
 0x387   :  { %4434 = vmatmul.mubr.msk.f32.gmra.mxu1 %vm324_vm3, %v462_v55  ;;  %4444 = vmatprep.subr.mxu1 %v5295_v35 }
 0x388   :  { %4448 = vmatprep.mubr.msk.f32.mxu1 %vm5296_vm4, %v5295_v35  ;;  %4445 = vmatpush3.msra.mxu1 %v574_v56 }
 0x389   :  { %4446 = vmatprep.subr.mxu1 %v5295_v35 }
 0x38a   :  { %4447 = vmatpush3.msra.mxu1 %v573_v58 }
 0x38b   :  { %4478 = vmatprep.subr.mxu1 %v5295_v35 }
 0x43f   :  { %v556_v61 = vpop.f32.mrf.mxu1 }
 0x440   :  { %v5579_v62 = vadd.f32 %v556_v61, %v469_v60  ;;  %v5737_v61 = vld [vmem:[%s6696_s9] sm:$0xff] }
 0x441   :  { %v4429_v1 = vpop.f32.mrf.mxu1 }
 0x442   :  { %4449 = vmatmul.mubr.msk.f32.vlgmr.msra.gmra.mxu1 %vm586_vm5, %v5579_v62  ;;  %4470 = vmatmul.mubr.msk.f32.vlgmr.msra.gmra.mxu0 %vm586_vm5, %v5579_v62 }
 0x443   :  { %v561_v4 = vpop.f32.mrf.mxu1  ;;  %4479 = vmatpush3.msra.mxu1 %v3981_v63  ;;  %4451 = vmatprep.mubr.msk.f32.mxu1 %vm5296_vm4, %v5295_v35 }
 0x444   :  { %v5593_v5 = vadd.f32 %v561_v4, %v474_v0  ;;  %4480 = vmatprep.subr.mxu1 %v5295_v35  ;;  %4472 = vmatprep.mubr.msk.f32.mxu0 %vm5296_vm4, %v5295_v35 }
 0x445   :  { %v4432_v6 = vpop.f32.mrf.mxu1  ;;  %4481 = vmatpush3.msra.mxu1 %v3980_v2 }
 0x446   :  { %4452 = vmatmul.mubr.msk.f32.gmra.mxu1 %vm586_vm5, %v5593_v5  ;;  %4473 = vmatmul.mubr.msk.f32.gmra.mxu0 %vm586_vm5, %v5593_v5 }
 0x447   :  { %4482 = vmatprep.subr.mxu1 %v5295_v35  ;;  %v566_v9 = vpop.f32.mrf.mxu1  ;;  %4454 = vmatprep.mubr.msk.f32.mxu1 %vm5296_vm4, %v5295_v35 }
 0x448   :  { %v5611_v12 = vadd.f32 %v566_v9, %v479_v8  ;;  %4483 = vmatpush3.msra.mxu1 %v3979_v7  ;;  %4475 = vmatprep.mubr.msk.f32.mxu0 %vm5296_vm4, %v5295_v35  ;;  %v5744_v8 = vld [vmem:[%s6696_s9 + $0x8] sm:$0xff] }
 0x449   :  { %4484 = vmatprep.subr.mxu1 %v5295_v35  ;;  %v4435_v13 = vpop.f32.mrf.mxu1 }
 0x44a   :  { %4485 = vmatpush3.msra.mxu1 %v3978_v10  ;;  %4476 = vmatmul.mubr.msk.f32.gmra.mxu0 %vm586_vm5, %v5611_v12 }
 0x44b   :  { %4455 = vmatmul.mubr.msk.f32.gmra.mxu1 %vm586_vm5, %v5611_v12  ;;  %4486 = vmatprep.subr.mxu1 %v5295_v35 }
 0x44c   :  { %4487 = vmatpush3.msra.mxu1 %v3977_v14  ;;  %4490 = vmatprep.mubr.msk.f32.mxu1 %vm5296_vm4, %v5295_v35 }
 0x44d   :  { %4488 = vmatprep.subr.mxu1 %v5295_v35  ;;  %4505 = vmatprep.mubr.msk.f32.mxu0 %vm5296_vm4, %v5295_v35 }
 0x44e   :  { %4489 = vmatpush3.msra.mxu1 %v3976_v15 }
 0x44f   :  { %4491 = vmatmul.mubr.msk.f32.vlgmr.msra.gmra.mxu1 %vm586_vm5, %v5579_v62  ;;  %4514 = vmatprep.subr.mxu1 %v5295_v35 }
 0x450   :  { %4493 = vmatprep.mubr.msk.f32.mxu1 %vm5296_vm4, %v5295_v35 }
 0x453   :  { %4494 = vmatmul.mubr.msk.f32.gmra.mxu1 %vm586_vm5, %v5593_v5 }
 0x454   :  { %4496 = vmatprep.mubr.msk.f32.mxu1 %vm5296_vm4, %v5295_v35 }
 0x457   :  { %4497 = vmatmul.mubr.msk.f32.gmra.mxu1 %vm586_vm5, %v5611_v12 }
 0x458   :  { %4520 = vmatprep.mubr.msk.f32.mxu1 %vm5296_vm4, %v5295_v35 }
 0x502   :  { %v662_v16 = vpop.f32.mrf.mxu1  ;;  %v757_v3 = vpop.f32.mrf.mxu0 }
 0x503   :  { %v5665_v32 = vadd.f32 %v3961_v28, %v662_v16  ;;  %v5675_v36 = vadd.f32 %v3972_v22, %v757_v3 }
 0x504   :  { %v4450_v17 = vpop.f32.mrf.mxu1  ;;  %v4471_v18 = vpop.f32.mrf.mxu0 }
 0x505   :  { %v873_v39 = vmul.f32 %v3987_v33, %v5665_v32  ;;  %v1026_v40 = vmul.f32 %v3995_v34, %v5665_v32 }
 0x506   :  { %v667_v11 = vpop.f32.mrf.mxu1  ;;  %v762_v19 = vpop.f32.mrf.mxu0 }
 0x507   :  { %v5659_v29 = vadd.f32 %v3972_v22, %v762_v19  ;;  %v5685_v41 = vadd.f32 %v3961_v28, %v667_v11  ;;  %v5754_v11 = vld [vmem:[%s6696_s9 + $0x10] sm:$0x3] }
 0x508   :  { %v4453_v20 = vpop.f32.mrf.mxu1  ;;  %v4474_v21 = vpop.f32.mrf.mxu0 }
 0x509   :  { %v874_v49 = vmul.f32 %v3987_v33, %v5685_v41  ;;  %v1027_v50 = vmul.f32 %v3995_v34, %v5685_v41 }
 0x50a   :  { %v767_v23 = vpop.f32.mrf.mxu0 }
 0x50b   :  { %v672_v24 = vpop.f32.mrf.mxu1  ;;  %v5648_v25 = vadd.f32 %v3972_v22, %v767_v23 }
 0x50c   :  { %v4477_v26 = vpop.f32.mrf.mxu0  ;;  %v5708_v52 = vadd.f32 %v3961_v28, %v672_v24 }
 0x50d   :  { %v4456_v27 = vpop.f32.mrf.mxu1  ;;  %4500 = vmatpush3.xpose.msk.msra.mxu0 %vm586_vm5, %v5648_v25  ;;  %4515 = vmatpush3.xpose.msk.msra.mxu1 %vm586_vm5, %v5648_v25 }
 0x50e   :  { %4501 = vmatprep.subr.mxu0 %v5295_v35  ;;  %4516 = vmatprep.subr.mxu1 %v5295_v35  ;;  %v875_v57 = vmul.f32 %v3987_v33, %v5708_v52  ;;  %v1028_v58 = vmul.f32 %v3995_v34, %v5708_v52 }
 0x50f   :  { %v852_v30 = vpop.f32.mrf.mxu1 }
 0x510   :  { %v5704_v51 = vadd.f32 %v3983_v42, %v852_v30 }
 0x511   :  { %v4492_v31 = vpop.f32.mrf.mxu1  ;;  %4502 = vmatpush3.xpose.msk.msra.mxu0 %vm586_vm5, %v5659_v29  ;;  %4517 = vmatpush3.xpose.msk.msra.mxu1 %vm586_vm5, %v5659_v29 }
 0x512   :  { %4503 = vmatprep.subr.mxu0 %v5295_v35  ;;  %4518 = vmatprep.subr.mxu1 %v5295_v35  ;;  %v1157_v55 = vmul.f32 %v3995_v34, %v5704_v51  ;;  %v1015_v56 = vmul.f32 %v3987_v33, %v5704_v51 }
 0x513   :  { %v857_v37 = vpop.f32.mrf.mxu1 }
 0x514   :  { %v5694_v45 = vadd.f32 %v3983_v42, %v857_v37 }
 0x515   :  { %v4495_v38 = vpop.f32.mrf.mxu1  ;;  %4504 = vmatpush3.xpose.msk.msra.mxu0 %vm586_vm5, %v5675_v36  ;;  %4519 = vmatpush3.xpose.msk.msra.mxu1 %vm586_vm5, %v5675_v36 }
 0x516   :  { %4529 = vmatprep.subr.mxu0 %v5295_v35  ;;  %4544 = vmatprep.subr.mxu1 %v5295_v35  ;;  %v1158_v53 = vmul.f32 %v3995_v34, %v5694_v45  ;;  %v1016_v54 = vmul.f32 %v3987_v33, %v5694_v45 }
 0x517   :  { %v862_v43 = vpop.f32.mrf.mxu1 }
 0x518   :  { %v5690_v44 = vadd.f32 %v3983_v42, %v862_v43  ;;  %4506 = vmatmul.mubr.msk.f32.vlgmr.msra.gmra.mxu0 %vm586_vm5, %v873_v39  ;;  %4521 = vmatmul.mubr.msk.f32.vlgmr.msra.gmra.mxu1 %vm586_vm5, %v1026_v40 }
 0x519   :  { %v4498_v46 = vpop.f32.mrf.mxu1  ;;  %4508 = vmatprep.mubr.msk.f32.mxu0 %vm5296_vm4, %v5295_v35  ;;  %4523 = vmatprep.mubr.msk.f32.mxu1 %vm5296_vm4, %v5295_v35 }
 0x51a   :  { %v1017_v47 = vmul.f32 %v3987_v33, %v5690_v44  ;;  %v1159_v48 = vmul.f32 %v3995_v34, %v5690_v44 }
 0x51c   :  { %4530 = vmatpush3.msk.msra.mxu0 %vm1169_vm6, %v1159_v48  ;;  %4545 = vmatpush3.msk.msra.mxu1 %vm1169_vm6, %v1017_v47 }
 0x51d   :  { %4509 = vmatmul.mubr.msk.f32.gmra.mxu0 %vm586_vm5, %v874_v49  ;;  %4524 = vmatmul.mubr.msk.f32.gmra.mxu1 %vm586_vm5, %v1027_v50 }
 0x51e   :  { %4531 = vmatprep.subr.mxu0 %v5295_v35  ;;  %4546 = vmatprep.subr.mxu1 %v5295_v35 }
 0x51f   :  { %4532 = vmatpush3.msra.mxu0 %v1158_v53  ;;  %4547 = vmatpush3.msra.mxu1 %v1016_v54 }
 0x520   :  { %4533 = vmatprep.subr.mxu0 %v5295_v35  ;;  %4548 = vmatprep.subr.mxu1 %v5295_v35 }
 0x521   :  { %4511 = vmatprep.mubr.msk.f32.mxu0 %vm5296_vm4, %v5295_v35  ;;  %4526 = vmatprep.mubr.msk.f32.mxu1 %vm5296_vm4, %v5295_v35 }
 0x522   :  { %4534 = vmatpush3.msra.mxu0 %v1157_v55  ;;  %4549 = vmatpush3.msra.mxu1 %v1015_v56 }
 0x523   :  { %4512 = vmatmul.mubr.msk.f32.gmra.mxu0 %vm586_vm5, %v875_v57  ;;  %4527 = vmatmul.mubr.msk.f32.gmra.mxu1 %vm586_vm5, %v1028_v58 }
 0x524   :  { %4535 = vmatprep.mubr.msk.f32.mxu0 %vm5296_vm4, %v5295_v35  ;;  %4559 = vmatprep.subr.mxu0 %v5295_v35 }
 0x525   :  { %4550 = vmatprep.mubr.msk.f32.mxu1 %vm5296_vm4, %v5295_v35  ;;  %4574 = vmatprep.subr.mxu1 %v5295_v35 }
 0x5d8   :  { %v960_v59 = vpop.f32.mrf.mxu0  ;;  %v1104_v60 = vpop.f32.mrf.mxu1 }
 0x5d9   :  { %v1118_v63 = vmul.f32 0.28867513, %v1104_v60  ;;  %v974_v46 = vmul.f32 0.28867513, %v960_v59 }
 0x5da   :  { %v4507_v0 = vpop.f32.mrf.mxu0  ;;  %v4522_v1 = vpop.f32.mrf.mxu1 }
 0x5db   :  { %v1121_v2 = vadd.f32 %v1118_v63, %v5737_v61  ;;  %v5764_v50 = vadd.f32 %v974_v46, %v5737_v61 }
 0x5dd   :  { %v965_v4 = vpop.f32.mrf.mxu0  ;;  %v1109_v6 = vpop.f32.mrf.mxu1  ;;  %v1124_v7 = vsel %vm980_vm7, %v1121_v2, -inf  ;;  %v981_v53 = vsel %vm980_vm7, %v5764_v50, -inf }
 0x5de   :  { %v975_v9 = vmul.f32 0.28867513, %v965_v4  ;;  %v1119_v10 = vmul.f32 0.28867513, %v1109_v6  ;;  %1125 = vmax.xlane.f32.xlu1 %v1124_v7  ;;  %v5788_v4 = vld [vmem:[%s6697_s10 + $0x2] ss:$0 sm:$0xff] }
 0x5df   :  { %v4510_v13 = vpop.f32.mrf.mxu0  ;;  %v4525_v14 = vpop.f32.mrf.mxu1  ;;  %v1353_v6 = vmul.f32 %v5788_v4, %v5665_v32  ;;  %v1354_v7 = vmul.f32 %v5788_v4, %v5685_v41 }
 0x5e0   :  { %v1122_v15 = vadd.f32 %v1119_v10, %v5744_v8  ;;  %v5749_v3 = vadd.f32 %v975_v9, %v5744_v8  ;;  %v5817_v9 = vld [vmem:[%s6697_s10 + $0x3] ss:$0 sm:$0xff] }
 0x5e1   :  { %v1591_v10 = vmul.f32 %v5817_v9, %v5685_v41 }
 0x5e2   :  { %v1127_v16 = vsel %vm980_vm7, %v1122_v15, -inf  ;;  %v984_v22 = vsel %vm980_vm7, %v5749_v3, -inf }
 0x5e3   :  { %v970_v17 = vpop.f32.mrf.mxu0  ;;  %v1114_v18 = vpop.f32.mrf.mxu1  ;;  %1128 = vmax.xlane.f32.xlu0 %v1127_v16 }
 0x5e4   :  { %v1120_v19 = vmul.f32 0.28867513, %v1114_v18  ;;  %v976_v48 = vmul.f32 0.28867513, %v970_v17 }
 0x5e5   :  { %v4513_v20 = vpop.f32.mrf.mxu0  ;;  %v4528_v21 = vpop.f32.mrf.mxu1 }
 0x5e6   :  { %v1123_v23 = vadd.f32 %v1120_v19, %v5754_v11  ;;  %v5769_v54 = vadd.f32 %v976_v48, %v5754_v11 }
 0x5e7   :  { %985 = vmax.xlane.f32.xlu0 %v984_v22 }
 0x5e8   :  { %v1130_v24 = vsel %vm987_vm8, %v1123_v23, -inf  ;;  %v988_v55 = vsel %vm987_vm8, %v5769_v54, -inf }
 0x5e9   :  { %1131 = vmax.xlane.f32.xlu1 %v1130_v24 }
 0x667   :  { %v1126_v26 = vpop.xlane.xlu1 %1125 }
 0x668   :  { %v1133_v27 = vsub.f32 %v1121_v2, %v1126_v26 }
 0x66a   :  { %v1136_v28 = vmul.f32 1.442695, %v1133_v27 }
 0x66c   :  { %4986 = vpow2.f32 %v1136_v28  ;;  %v1129_v30 = vpop.xlane.xlu0 %1128 }
 0x66d   :  { %v1134_v31 = vsub.f32 %v1122_v15, %v1129_v30 }
 0x66f   :  { %v1138_v33 = vmul.f32 1.442695, %v1134_v31 }
 0x670   :  { %v986_v19 = vpop.xlane.xlu0 %985 }
 0x671   :  { %4988 = vpow2.f32 %v1138_v33  ;;  %v992_v24 = vsub.f32 %v5749_v3, %v986_v19 }
 0x672   :  { %v1132_v34 = vpop.xlane.xlu1 %1131 }
 0x673   :  { %v1135_v37 = vsub.f32 %v1123_v23, %v1132_v34 }
 0x675   :  { %v1140_v38 = vmul.f32 1.442695, %v1135_v37  ;;  %v996_v37 = vmul.f32 1.442695, %v992_v24 }
 0x677   :  { %4990 = vpow2.f32 %v1140_v38 }
 0x679   :  { %v4987_v39 = vpop.eup %4986 }
 0x67a   :  { %v1142_v40 = vsel %vm980_vm7, %v4987_v39, 0.0 }
 0x67b   :  { %1143 = vadd.xlane.f32.xlu1 %v1142_v40 }
 0x67e   :  { %v4989_v42 = vpop.eup %4988 }
 0x67f   :  { %v1145_v43 = vsel %vm980_vm7, %v4989_v42, 0.0 }
 0x680   :  { %1146 = vadd.xlane.f32.xlu1 %v1145_v43 }
 0x684   :  { %v4991_v47 = vpop.eup %4990 }
 0x685   :  { %v1148_v49 = vsel %vm987_vm8, %v4991_v47, 0.0 }
 0x686   :  { %1149 = vadd.xlane.f32.xlu1 %v1148_v49 }
 0x68a   :  { %982 = vmax.xlane.f32.xlu1 %v981_v53 }
 0x68e   :  { %989 = vmax.xlane.f32.xlu1 %v988_v55 }
 0x704   :  { %v1144_v56 = vpop.xlane.xlu1 %1143 }
 0x705   :  { %4992 = vrcp.f32 %v1144_v56 }
 0x709   :  { %v1147_v57 = vpop.xlane.xlu1 %1146 }
 0x70a   :  { %4994 = vrcp.f32 %v1147_v57 }
 0x70f   :  { %v1150_v58 = vpop.xlane.xlu1 %1149 }
 0x710   :  { %4996 = vrcp.f32 %v1150_v58 }
 0x712   :  { %v4993_v59 = vpop.eup %4992 }
 0x713   :  { %v1154_v60 = vmul.f32 %v4993_v59, %v4987_v39  ;;  %v983_v41 = vpop.xlane.xlu1 %982 }
 0x714   :  { %v991_v20 = vsub.f32 %v5764_v50, %v983_v41 }
 0x715   :  { %4536 = vmatmul.mubr.msk.f32.vlgmr.msra.gmra.mxu0 %vm980_vm7, %v1154_v60 }
 0x716   :  { %4560 = vmatpush3.xpose.msk.msra.mxu0 %vm586_vm5, %v5648_v25  ;;  %4538 = vmatprep.mubr.msk.f32.mxu0 %vm5296_vm4, %v5295_v35  ;;  %v994_v27 = vmul.f32 1.442695, %v991_v20 }
 0x717   :  { %v4995_v63 = vpop.eup %4994  ;;  %4561 = vmatprep.subr.mxu0 %v5295_v35  ;;  %v990_v21 = vpop.xlane.xlu1 %989 }
 0x718   :  { %v1155_v0 = vmul.f32 %v4995_v63, %v4989_v42  ;;  %v993_v28 = vsub.f32 %v5769_v54, %v990_v21  ;;  %4998 = vpow2.f32 %v994_v27 }
 0x719   :  { %5000 = vpow2.f32 %v996_v37 }
 0x71a   :  { %4539 = vmatmul.mubr.msk.f32.gmra.mxu0 %vm980_vm7, %v1155_v0  ;;  %v998_v39 = vmul.f32 1.442695, %v993_v28 }
 0x71b   :  { %4562 = vmatpush3.xpose.msk.msra.mxu0 %vm586_vm5, %v5659_v29  ;;  %4541 = vmatprep.mubr.msk.f32.mxu0 %vm5296_vm4, %v5295_v35 }
 0x71c   :  { %4563 = vmatprep.subr.mxu0 %v5295_v35  ;;  %5002 = vpow2.f32 %v998_v39 }
 0x71d   :  { %v4997_v1 = vpop.eup %4996 }
 0x71e   :  { %v1156_v2 = vmul.f32 %v4997_v1, %v4991_v47 }
 0x71f   :  { %4564 = vmatpush3.xpose.msk.msra.mxu0 %vm586_vm5, %v5675_v36 }
 0x720   :  { %4542 = vmatmul.mubr.msk.f32.gmra.mxu0 %vm980_vm7, %v1156_v2  ;;  %4589 = vmatprep.subr.mxu0 %v5295_v35 }
 0x721   :  { %4565 = vmatprep.mubr.msk.f32.mxu0 %vm5296_vm4, %v5295_v35 }
 0x724   :  { %4566 = vmatmul.mubr.msk.f32.vlgmr.msra.gmra.mxu0 %vm586_vm5, %v1353_v6 }
 0x725   :  { %4590 = vmatpush3.xpose.msk.msra.mxu0 %vm586_vm5, %v5648_v25  ;;  %4568 = vmatprep.mubr.msk.f32.mxu0 %vm5296_vm4, %v5295_v35  ;;  %v1355_v25 = vmul.f32 %v5788_v4, %v5708_v52  ;;  %v4999_v63 = vpop.eup %4998 }
 0x726   :  { %4591 = vmatprep.subr.mxu0 %v5295_v35  ;;  %v5860_v2 = vpop.eup %5000  ;;  %v1000_v6 = vsel %vm980_vm7, %v4999_v63, 0.0 }
 0x728   :  { %4569 = vmatmul.mubr.msk.f32.gmra.mxu0 %vm586_vm5, %v1354_v7 }
 0x729   :  { %4592 = vmatpush3.xpose.msk.msra.mxu0 %vm586_vm5, %v5659_v29  ;;  %4571 = vmatprep.mubr.msk.f32.mxu0 %vm5296_vm4, %v5295_v35  ;;  %v1590_v29 = vmul.f32 %v5817_v9, %v5665_v32  ;;  %v5864_v7 = vpop.eup %5002 }
 0x72a   :  { %4593 = vmatprep.subr.mxu0 %v5295_v35 }
 0x72c   :  { %4572 = vmatmul.mubr.msk.f32.gmra.mxu0 %vm586_vm5, %v1355_v25  ;;  %v1006_v25 = vsel %vm987_vm8, %v5864_v7, 0.0 }
 0x72d   :  { %4594 = vmatpush3.xpose.msk.msra.mxu0 %vm586_vm5, %v5675_v36  ;;  %4595 = vmatprep.mubr.msk.f32.mxu0 %vm5296_vm4, %v5295_v35  ;;  %v1592_v36 = vmul.f32 %v5817_v9, %v5708_v52 }
 0x72e   :  { %4619 = vmatprep.subr.mxu0 %v5295_v35 }
 0x730   :  { %4596 = vmatmul.mubr.msk.f32.vlgmr.msra.gmra.mxu0 %vm586_vm5, %v1590_v29 }
 0x731   :  { %4598 = vmatprep.mubr.msk.f32.mxu0 %vm5296_vm4, %v5295_v35 }
 0x734   :  { %4599 = vmatmul.mubr.msk.f32.gmra.mxu0 %vm586_vm5, %v1591_v10 }
 0x735   :  { %4601 = vmatprep.mubr.msk.f32.mxu0 %vm5296_vm4, %v5295_v35 }
 0x738   :  { %4602 = vmatmul.mubr.msk.f32.gmra.mxu0 %vm586_vm5, %v1592_v36 }
 0x739   :  { %4631 = vmatprep.mubr.msk.f32.mxu0 %vm5296_vm4, %v5295_v35 }
 0x7d5   :  { %v5840_v32 = vpop.f32.mrf.mxu0 }
 0x7d7   :  { %v4537_v13 = vpop.f32.mrf.mxu0 }
 0x7da   :  { %v5842_v14 = vpop.f32.mrf.mxu0 }
 0x7dc   :  { %v4540_v15 = vpop.f32.mrf.mxu0 }
 0x7e0   :  { %v5844_v16 = vpop.f32.mrf.mxu0 }
 0x7e2   :  { %v4543_v17 = vpop.f32.mrf.mxu0 }
 0x7e4   :  { %v1431_v18 = vpop.f32.mrf.mxu0 }
 0x7e5   :  { %v1445_v52 = vmul.f32 0.28867513, %v1431_v18 }
 0x7e6   :  { %v4567_v22 = vpop.f32.mrf.mxu0 }
 0x7e7   :  { %v1448_v23 = vadd.f32 %v1445_v52, %v5737_v61 }
 0x7e8   :  { %v1436_v26 = vpop.f32.mrf.mxu0 }
 0x7e9   :  { %v1446_v30 = vmul.f32 0.28867513, %v1436_v26  ;;  %v1451_v31 = vsel %vm980_vm7, %v1448_v23, -inf }
 0x7ea   :  { %1452 = vmax.xlane.f32.xlu0 %v1451_v31  ;;  %v4570_v33 = vpop.f32.mrf.mxu0 }
 0x7eb   :  { %v1449_v34 = vadd.f32 %v1446_v30, %v5744_v8 }
 0x7ec   :  { %v1441_v38 = vpop.f32.mrf.mxu0 }
 0x7ed   :  { %v1447_v40 = vmul.f32 0.28867513, %v1441_v38  ;;  %v1454_v42 = vsel %vm980_vm7, %v1449_v34, -inf }
 0x7ee   :  { %1455 = vmax.xlane.f32.xlu1 %v1454_v42  ;;  %v4573_v3 = vpop.f32.mrf.mxu0 }
 0x7ef   :  { %v1450_v43 = vadd.f32 %v1447_v40, %v5754_v11 }
 0x7f0   :  { %v1668_v46 = vpop.f32.mrf.mxu0 }
 0x7f1   :  { %v1682_v47 = vmul.f32 0.28867513, %v1668_v46  ;;  %v1457_v48 = vsel %vm987_vm8, %v1450_v43, -inf }
 0x7f2   :  { %1458 = vmax.xlane.f32.xlu0 %v1457_v48  ;;  %v4597_v49 = vpop.f32.mrf.mxu0 }
 0x7f3   :  { %v1685_v50 = vadd.f32 %v1682_v47, %v5737_v61  ;;  %v1486_v49 = vmul.f32 %v5788_v4, %v5690_v44 }
 0x7f4   :  { %v1673_v53 = vpop.f32.mrf.mxu0 }
 0x7f5   :  { %v1683_v54 = vmul.f32 0.28867513, %v1673_v53  ;;  %v1688_v55 = vsel %vm980_vm7, %v1685_v50, -inf  ;;  %v1485_v53 = vmul.f32 %v5788_v4, %v5694_v45 }
 0x7f6   :  { %1689 = vmax.xlane.f32.xlu1 %v1688_v55  ;;  %v4600_v56 = vpop.f32.mrf.mxu0 }
 0x7f7   :  { %v1686_v57 = vadd.f32 %v1683_v54, %v5744_v8  ;;  %v1003_v8 = vsel %vm980_vm7, %v5860_v2, 0.0 }
 0x7f8   :  { %v1678_v58 = vpop.f32.mrf.mxu0 }
 0x7f9   :  { %v1684_v59 = vmul.f32 0.28867513, %v1678_v58  ;;  %v1691_v60 = vsel %vm980_vm7, %v1686_v57, -inf  ;;  %v1484_v58 = vmul.f32 %v5788_v4, %v5704_v51 }
 0x7fa   :  { %1692 = vmax.xlane.f32.xlu0 %v1691_v60  ;;  %v4603_v0 = vpop.f32.mrf.mxu0 }
 0x7fb   :  { %v1687_v1 = vadd.f32 %v1684_v59, %v5754_v11 }
 0x7fd   :  { %v1694_v61 = vsel %vm987_vm8, %v1687_v1, -inf }
 0x7fe   :  { %1695 = vmax.xlane.f32.xlu1 %v1694_v61  ;;  %1001 = vadd.xlane.f32.xlu0 %v1000_v6  ;;  %v1723_v61 = vmul.f32 %v5817_v9, %v5690_v44  ;;  %v1721_v44 = vmul.f32 %v5817_v9, %v5704_v51 }
 0x802   :  { %1004 = vadd.xlane.f32.xlu1 %v1003_v8  ;;  %1007 = vadd.xlane.f32.xlu0 %v1006_v25  ;;  %v1722_v8 = vmul.f32 %v5817_v9, %v5694_v45 }
 0x873   :  { %v1453_v29 = vpop.xlane.xlu0 %1452 }
 0x874   :  { %v1460_v11 = vsub.f32 %v1448_v23, %v1453_v29 }
 0x876   :  { %v1463_v10 = vmul.f32 1.442695, %v1460_v11 }
 0x877   :  { %v1456_v36 = vpop.xlane.xlu1 %1455 }
 0x878   :  { %5004 = vpow2.f32 %v1463_v10  ;;  %v1461_v13 = vsub.f32 %v1449_v34, %v1456_v36 }
 0x87a   :  { %v1465_v15 = vmul.f32 1.442695, %v1461_v13 }
 0x87b   :  { %v1459_v41 = vpop.xlane.xlu0 %1458 }
 0x87c   :  { %5006 = vpow2.f32 %v1465_v15  ;;  %v1462_v17 = vsub.f32 %v1450_v43, %v1459_v41 }
 0x87e   :  { %v1467_v18 = vmul.f32 1.442695, %v1462_v17 }
 0x87f   :  { %v1690_v19 = vpop.xlane.xlu1 %1689 }
 0x880   :  { %5008 = vpow2.f32 %v1467_v18  ;;  %v1697_v20 = vsub.f32 %v1685_v50, %v1690_v19 }
 0x882   :  { %v1700_v52 = vmul.f32 1.442695, %v1697_v20 }
 0x883   :  { %v1693_v21 = vpop.xlane.xlu0 %1692 }
 0x884   :  { %5010 = vpow2.f32 %v1700_v52  ;;  %v1698_v22 = vsub.f32 %v1686_v57, %v1693_v21  ;;  %v1824_v21 = vld [vmem:[%s6700_s13 + $0x28] sm:$0xff] }
 0x885   :  { %v5005_v24 = vpop.eup %5004  ;;  %4620 = vmatpush3.msra.mxu0 %v1824_v21 }
 0x886   :  { %v1702_v26 = vmul.f32 1.442695, %v1698_v22  ;;  %v1469_v23 = vsel %vm980_vm7, %v5005_v24, 0.0  ;;  %v1823_v22 = vld [vmem:[%s6700_s13 + $0x20] sm:$0xff]  ;;  %4621 = vmatprep.subr.mxu0 %v5295_v35 }
 0x887   :  { %1470 = vadd.xlane.f32.xlu1 %v1469_v23  ;;  %v1002_v27 = vpop.xlane.xlu0 %1001  ;;  %v1696_v28 = vpop.xlane.xlu1 %1695  ;;  %4622 = vmatpush3.msra.mxu0 %v1823_v22  ;;  %v1820_v23 = vld [vmem:[%s6700_s13 + $0x8] sm:$0xff] }
 0x888   :  { %5012 = vpow2.f32 %v1702_v26  ;;  %v1699_v30 = vsub.f32 %v1687_v1, %v1696_v28  ;;  %4623 = vmatprep.subr.mxu0 %v5295_v35  ;;  %v1821_v26 = vld [vmem:[%s6700_s13 + $0x10] sm:$0xff]  ;;  %v1932_v28 = vld [vmem:[%s6702_s15 + $0x28] sm:$0xff] }
 0x889   :  { %v5007_v31 = vpop.eup %5006  ;;  %5014 = vrcp.f32 %v1002_v27  ;;  %v1819_v27 = vld [vmem:[%s6700_s13] sm:$0xff] }
 0x88a   :  { %v1704_v33 = vmul.f32 1.442695, %v1699_v30  ;;  %v1472_v34 = vsel %vm980_vm7, %v5007_v31, 0.0  ;;  %v1931_v30 = vld [vmem:[%s6702_s15 + $0x20] sm:$0xff] }
 0x88b   :  { %1473 = vadd.xlane.f32.xlu0 %v1472_v34  ;;  %v1005_v37 = vpop.xlane.xlu1 %1004  ;;  %v1008_v39 = vpop.xlane.xlu0 %1007 }
 0x88c   :  { %5016 = vpow2.f32 %v1704_v33 }
 0x88d   :  { %v5872_v38 = vpop.eup %5008  ;;  %5018 = vrcp.f32 %v1005_v37 }
 0x88e   :  { %v1475_v40 = vsel %vm987_vm8, %v5872_v38, 0.0  ;;  %5020 = vrcp.f32 %v1008_v39 }
 0x88f   :  { %1476 = vadd.xlane.f32.xlu1 %v1475_v40 }
 0x891   :  { %v5876_v42 = vpop.eup %5010 }
 0x892   :  { %v1706_v3 = vsel %vm980_vm7, %v5876_v42, 0.0 }
 0x893   :  { %1707 = vadd.xlane.f32.xlu0 %v1706_v3 }
 0x895   :  { %v5880_v43 = vpop.eup %5012 }
 0x896   :  { %v5015_v46 = vpop.eup %5014  ;;  %v1709_v47 = vsel %vm980_vm7, %v5880_v43, 0.0 }
 0x897   :  { %v1012_v48 = vmul.f32 %v5015_v46, %v4999_v63  ;;  %1710 = vadd.xlane.f32.xlu1 %v1709_v47 }
 0x899   :  { %v5886_v50 = vpop.eup %5016  ;;  %4551 = vmatmul.mubr.msk.f32.vlgmr.msra.gmra.mxu1 %vm980_vm7, %v1012_v48 }
 0x89a   :  { %4575 = vmatpush3.msk.msra.mxu1 %vm1169_vm6, %v1486_v49  ;;  %4553 = vmatprep.mubr.msk.f32.mxu1 %vm5296_vm4, %v5295_v35  ;;  %v1712_v54 = vsel %vm987_vm8, %v5886_v50, 0.0  ;;  %v5019_v55 = vpop.eup %5018 }
 0x89b   :  { %4576 = vmatprep.subr.mxu1 %v5295_v35  ;;  %1713 = vadd.xlane.f32.xlu0 %v1712_v54  ;;  %v1013_v56 = vmul.f32 %v5019_v55, %v5860_v2  ;;  %v5021_v57 = vpop.eup %5020 }
 0x89c   :  { %4577 = vmatpush3.msra.mxu1 %v1485_v53  ;;  %v1014_v59 = vmul.f32 %v5021_v57, %v5864_v7 }
 0x89d   :  { %4578 = vmatprep.subr.mxu1 %v5295_v35  ;;  %4554 = vmatmul.mubr.msk.f32.gmra.mxu1 %vm980_vm7, %v1013_v56 }
 0x89e   :  { %4579 = vmatpush3.msra.mxu1 %v1484_v58  ;;  %4556 = vmatprep.mubr.msk.f32.mxu1 %vm5296_vm4, %v5295_v35  ;;  %v1928_v58 = vld [vmem:[%s6702_s15 + $0x8] sm:$0xff] }
 0x89f   :  { %4604 = vmatprep.subr.mxu1 %v5295_v35 }
 0x8a1   :  { %4557 = vmatmul.mubr.msk.f32.gmra.mxu1 %vm980_vm7, %v1014_v59  ;;  %v1927_v59 = vld [vmem:[%s6702_s15] sm:$0xff] }
 0x8a2   :  { %4580 = vmatprep.mubr.msk.f32.mxu1 %vm5296_vm4, %v5295_v35 }
 0x910   :  { %v1471_v60 = vpop.xlane.xlu1 %1470 }
 0x911   :  { %5022 = vrcp.f32 %v1471_v60 }
 0x914   :  { %v1474_v63 = vpop.xlane.xlu0 %1473 }
 0x915   :  { %5024 = vrcp.f32 %v1474_v63  ;;  %v4037_v63 = vld [vmem:[#allocation9] ss:$0 sm:$0xff] }
 0x918   :  { %v1477_v4 = vpop.xlane.xlu1 %1476 }
 0x919   :  { %5026 = vrcp.f32 %v1477_v4 }
 0x91c   :  { %v1708_v0 = vpop.xlane.xlu0 %1707 }
 0x91d   :  { %5028 = vrcp.f32 %v1708_v0 }
 0x91e   :  { %v5023_v1 = vpop.eup %5022 }
 0x91f   :  { %v1481_v2 = vmul.f32 %v5023_v1, %v5005_v24  ;;  %v1822_v24 = vld [vmem:[%s6700_s13 + $0x18] sm:$0xff] }
 0x920   :  { %v1711_v6 = vpop.xlane.xlu1 %1710  ;;  %4624 = vmatpush3.msra.mxu0 %v1822_v24 }
 0x921   :  { %5030 = vrcp.f32 %v1711_v6  ;;  %4581 = vmatmul.mubr.msk.f32.vlgmr.msra.gmra.mxu1 %vm980_vm7, %v1481_v2  ;;  %4625 = vmatprep.subr.mxu0 %v5295_v35 }
 0x922   :  { %v5025_v7 = vpop.eup %5024  ;;  %4605 = vmatpush3.msk.msra.mxu1 %vm1169_vm6, %v1723_v61  ;;  %4583 = vmatprep.mubr.msk.f32.mxu1 %vm5296_vm4, %v5295_v35 }
 0x923   :  { %4606 = vmatprep.subr.mxu1 %v5295_v35  ;;  %v1482_v25 = vmul.f32 %v5025_v7, %v5007_v31  ;;  %4626 = vmatpush3.msra.mxu0 %v1821_v26  ;;  %v1930_v31 = vld [vmem:[%s6702_s15 + $0x18] sm:$0xff] }
 0x924   :  { %4607 = vmatpush3.msra.mxu1 %v1722_v8  ;;  %v1714_v29 = vpop.xlane.xlu0 %1713  ;;  %4627 = vmatprep.subr.mxu0 %v5295_v35 }
 0x925   :  { %5032 = vrcp.f32 %v1714_v29  ;;  %4608 = vmatprep.subr.mxu1 %v5295_v35  ;;  %4584 = vmatmul.mubr.msk.f32.gmra.mxu1 %vm980_vm7, %v1482_v25  ;;  %v2114_v29 = vld [vmem:[%s6704_s17 + $0x38] sm:$0xff] }
 0x926   :  { %v5027_v11 = vpop.eup %5026  ;;  %4609 = vmatpush3.msra.mxu1 %v1721_v44  ;;  %4586 = vmatprep.mubr.msk.f32.mxu1 %vm5296_vm4, %v5295_v35  ;;  %v2112_v44 = vld [vmem:[%s6704_s17 + $0x28] sm:$0xff] }
 0x927   :  { %v1483_v45 = vmul.f32 %v5027_v11, %v5872_v38  ;;  %4640 = vmatprep.subr.mxu1 %v5295_v35  ;;  %4628 = vmatpush3.msra.mxu0 %v1820_v23  ;;  %v2111_v11 = vld [vmem:[%s6704_s17 + $0x20] sm:$0xff] }
 0x928   :  { %4629 = vmatprep.subr.mxu0 %v5295_v35 }
 0x929   :  { %4587 = vmatmul.mubr.msk.f32.gmra.mxu1 %vm980_vm7, %v1483_v45  ;;  %4630 = vmatpush3.msra.mxu0 %v1819_v27  ;;  %v2110_v45 = vld [vmem:[%s6704_s17 + $0x18] sm:$0xff] }
 0x92a   :  { %v5029_v10 = vpop.eup %5028  ;;  %4610 = vmatprep.mubr.msk.f32.mxu1 %vm5296_vm4, %v5295_v35  ;;  %4661 = vmatprep.subr.mxu0 %v5295_v35 }
 0x92b   :  { %v1718_v51 = vmul.f32 %v5029_v10, %v5876_v42  ;;  %v2109_v10 = vld [vmem:[%s6704_s17 + $0x10] sm:$0xff] }
 0x92d   :  { %4611 = vmatmul.mubr.msk.f32.vlgmr.msra.gmra.mxu1 %vm980_vm7, %v1718_v51  ;;  %v2108_v51 = vld [vmem:[%s6704_s17 + $0x8] sm:$0xff] }
 0x92e   :  { %v5031_v9 = vpop.eup %5030  ;;  %4613 = vmatprep.mubr.msk.f32.mxu1 %vm5296_vm4, %v5295_v35  ;;  %4641 = vmatpush3.msra.mxu1 %v1932_v28 }
 0x92f   :  { %v1719_v36 = vmul.f32 %v5031_v9, %v5880_v43  ;;  %4642 = vmatprep.subr.mxu1 %v5295_v35  ;;  %v2107_v9 = vld [vmem:[%s6704_s17] sm:$0xff] }
 0x930   :  { %4643 = vmatpush3.msra.mxu1 %v1931_v30 }
 0x931   :  { %4614 = vmatmul.mubr.msk.f32.gmra.mxu1 %vm980_vm7, %v1719_v36  ;;  %4644 = vmatprep.subr.mxu1 %v5295_v35  ;;  %v4051_v36 = vld [vmem:[%s6698_s11 + $0xb8] sm:$0xff] }
 0x932   :  { %v5033_v13 = vpop.eup %5032  ;;  %4616 = vmatprep.mubr.msk.f32.mxu1 %vm5296_vm4, %v5295_v35  ;;  %4645 = vmatpush3.msra.mxu1 %v1930_v31 }
 0x933   :  { %v1720_v15 = vmul.f32 %v5033_v13, %v5886_v50  ;;  %4646 = vmatprep.subr.mxu1 %v5295_v35  ;;  %v4050_v13 = vld [vmem:[%s6698_s11 + $0xb0] sm:$0xff] }
 0x935   :  { %4617 = vmatmul.mubr.msk.f32.gmra.mxu1 %vm980_vm7, %v1720_v15  ;;  %v4049_v15 = vld [vmem:[%s6698_s11 + $0xa8] sm:$0xff] }
 0x936   :  { %4652 = vmatprep.mubr.msk.f32.mxu1 %vm5296_vm4, %v5295_v35 }
 0x959   :  { %v1331_v41 = vpop.f32.mrf.mxu1 }
 0x95a   :  { %v1332_v40 = vadd.f32 %v1331_v41, %v5840_v32  ;;  %v4038_v41 = vld [vmem:[#allocation10] ss:$0 sm:$0xff] }
 0x95b   :  { %v4552_v17 = vpop.f32.mrf.mxu1 }
 0x95d   :  { %v1336_v18 = vpop.f32.mrf.mxu1 }
 0x95e   :  { %v1337_v46 = vadd.f32 %v1336_v18, %v5842_v14 }
 0x95f   :  { %v4555_v19 = vpop.f32.mrf.mxu1 }
 0x961   :  { %v1341_v20 = vpop.f32.mrf.mxu1 }
 0x962   :  { %v1342_v53 = vadd.f32 %v1341_v20, %v5844_v16  ;;  %v1929_v16 = vld [vmem:[%s6702_s15 + $0x10] sm:$0xff] }
 0x963   :  { %v4558_v52 = vpop.f32.mrf.mxu1  ;;  %4647 = vmatpush3.msra.mxu1 %v1929_v16 }
 0x964   :  { %4648 = vmatprep.subr.mxu1 %v5295_v35 }
 0x965   :  { %4649 = vmatpush3.msra.mxu1 %v1928_v58 }
 0x966   :  { %4650 = vmatprep.subr.mxu1 %v5295_v35 }
 0x967   :  { %4651 = vmatpush3.msra.mxu1 %v1927_v59 }
 0x968   :  { %4686 = vmatprep.subr.mxu1 %v5295_v35 }
 0x9e1   :  { %v1565_v33 = vpop.f32.mrf.mxu1 }
 0x9e2   :  { %v1579_v3 = vadd.f32 %v1565_v33, %v1332_v40 }
 0x9e3   :  { %v4582_v34 = vpop.f32.mrf.mxu1 }
 0x9e5   :  { %v1570_v37 = vpop.f32.mrf.mxu1 }
 0x9e6   :  { %v1580_v49 = vadd.f32 %v1570_v37, %v1337_v46 }
 0x9e7   :  { %v4585_v38 = vpop.f32.mrf.mxu1 }
 0x9e9   :  { %v1575_v39 = vpop.f32.mrf.mxu1 }
 0x9ea   :  { %v1581_v56 = vadd.f32 %v1575_v39, %v1342_v53 }
 0x9eb   :  { %v4588_v42 = vpop.f32.mrf.mxu1 }
 0x9ed   :  { %v1802_v43 = vpop.f32.mrf.mxu1 }
 0x9ee   :  { %v1816_v47 = vadd.f32 %v1802_v43, %v1579_v3 }
 0x9ef   :  { %v4612_v48 = vpop.f32.mrf.mxu1 }
 0x9f0   :  { %4632 = vmatmul.mubr.msk.f32.vlgmr.msra.gmra.mxu0 %vm586_vm5, %v1816_v47 }
 0x9f1   :  { %v1807_v50 = vpop.f32.mrf.mxu1  ;;  %4634 = vmatprep.mubr.msk.f32.mxu0 %vm5296_vm4, %v5295_v35  ;;  %4662 = vmatpush3.msra.mxu0 %v2114_v29 }
 0x9f2   :  { %v1817_v54 = vadd.f32 %v1807_v50, %v1580_v49  ;;  %4663 = vmatprep.subr.mxu0 %v5295_v35 }
 0x9f3   :  { %v4615_v55 = vpop.f32.mrf.mxu1 }
 0x9f4   :  { %4635 = vmatmul.mubr.msk.f32.gmra.mxu0 %vm586_vm5, %v1817_v54 }
 0x9f5   :  { %v1812_v32 = vpop.f32.mrf.mxu1  ;;  %4637 = vmatprep.mubr.msk.f32.mxu0 %vm5296_vm4, %v5295_v35 }
 0x9f6   :  { %v1818_v14 = vadd.f32 %v1812_v32, %v1581_v56 }
 0x9f7   :  { %v4618_v57 = vpop.f32.mrf.mxu1 }
 0x9f8   :  { %4638 = vmatmul.mubr.msk.f32.gmra.mxu0 %vm586_vm5, %v1818_v14 }
 0x9f9   :  { %4677 = vmatprep.mubr.msk.f32.mxu0 %vm5296_vm4, %v5295_v35 }
 0xab0   :  { %v1900_v60 = vpop.f32.mrf.mxu0 }
 0xab1   :  { %v1914_v4 = vadd.f32 %v1900_v60, %v5579_v62 }
 0xab2   :  { %v4633_v0 = vpop.f32.mrf.mxu0 }
 0xab3   :  { %v6002_v1 = vadd.f32 %v4037_v63, %v1914_v4 }
 0xab4   :  { %v1905_v2 = vpop.f32.mrf.mxu0 }
 0xab5   :  { %v1915_v61 = vadd.f32 %v1905_v2, %v5593_v5  ;;  %4653 = vmatmul.mubr.msk.f32.vlgmr.msra.gmra.mxu1 %vm586_vm5, %v6002_v1 }
 0xab6   :  { %v4636_v6 = vpop.f32.mrf.mxu0  ;;  %4655 = vmatprep.mubr.msk.f32.mxu1 %vm5296_vm4, %v5295_v35  ;;  %4687 = vmatpush3.msra.mxu1 %v4051_v36 }
 0xab7   :  { %v6009_v7 = vadd.f32 %v4037_v63, %v1915_v61  ;;  %4688 = vmatprep.subr.mxu1 %v5295_v35 }
 0xab8   :  { %v1910_v8 = vpop.f32.mrf.mxu0  ;;  %4689 = vmatpush3.msra.mxu1 %v4050_v13 }
 0xab9   :  { %v1916_v25 = vadd.f32 %v1910_v8, %v5611_v12  ;;  %4656 = vmatmul.mubr.msk.f32.gmra.mxu1 %vm586_vm5, %v6009_v7  ;;  %v2113_v12 = vld [vmem:[%s6704_s17 + $0x30] sm:$0xff]  ;;  %4690 = vmatprep.subr.mxu1 %v5295_v35 }
 0xaba   :  { %v4639_v62 = vpop.f32.mrf.mxu0  ;;  %4658 = vmatprep.mubr.msk.f32.mxu1 %vm5296_vm4, %v5295_v35  ;;  %4664 = vmatpush3.msra.mxu0 %v2113_v12 }
 0xabb   :  { %v6016_v5 = vadd.f32 %v4037_v63, %v1916_v25  ;;  %4665 = vmatprep.subr.mxu0 %v5295_v35  ;;  %4691 = vmatpush3.msra.mxu1 %v4049_v15 }
 0xabc   :  { %4666 = vmatpush3.msra.mxu0 %v2112_v44  ;;  %4692 = vmatprep.subr.mxu1 %v5295_v35 }
 0xabd   :  { %4659 = vmatmul.mubr.msk.f32.gmra.mxu1 %vm586_vm5, %v6016_v5  ;;  %4667 = vmatprep.subr.mxu0 %v5295_v35 }
 0xabe   :  { %4698 = vmatprep.mubr.msk.f32.mxu1 %vm5296_vm4, %v5295_v35  ;;  %4668 = vmatpush3.msra.mxu0 %v2111_v11 }
 0xabf   :  { %4669 = vmatprep.subr.mxu0 %v5295_v35 }
 0xac0   :  { %4670 = vmatpush3.msra.mxu0 %v2110_v45 }
 0xac1   :  { %4671 = vmatprep.subr.mxu0 %v5295_v35 }
 0xac2   :  { %4672 = vmatpush3.msra.mxu0 %v2109_v10 }
 0xac3   :  { %4673 = vmatprep.subr.mxu0 %v5295_v35 }
 0xac4   :  { %4674 = vmatpush3.msra.mxu0 %v2108_v51 }
 0xac5   :  { %4675 = vmatprep.subr.mxu0 %v5295_v35 }
 0xac6   :  { %4676 = vmatpush3.msra.mxu0 %v2107_v9 }
 0xac7   :  { %4728 = vmatprep.subr.mxu0 %v5295_v35 }
 0xb75   :  { %v2015_v17 = vpop.f32.mrf.mxu1 }
 0xb76   :  { %v6066_v18 = vadd.f32 %v4038_v41, %v2015_v17 }
 0xb77   :  { %v4654_v19 = vpop.f32.mrf.mxu1 }
 0xb78   :  { %v6069_v20 = vmul.f32 0.70710677, %v6066_v18 }
 0xb79   :  { %v2020_v52 = vpop.f32.mrf.mxu1 }
 0xb7a   :  { %v2035_v21 = vand.u32 2147483647, %v6069_v20  ;;  %v6072_v22 = vadd.f32 %v4038_v41, %v2020_v52  ;;  %vm2092_vm9 = vcmp.ge.f32.partialorder %v6069_v20, 0.0 }
 0xb7b   :  { %v4657_v24 = vpop.f32.mrf.mxu1 }
 0xb7c   :  { %v2038_v26 = vmul.f32 0.3275911, %v2035_v21  ;;  %v6075_v23 = vmul.f32 0.70710677, %v6072_v22  ;;  %v2074_v42 = vsub.f32 0.0, %v2035_v21  ;;  %v2030_v20 = vmul.f32 0.5, %v6072_v22 }
 0xb7d   :  { %v2025_v27 = vpop.f32.mrf.mxu1  ;;  %v4071_v22 = vld [vmem:[%s6698_s11 + $0x108] sm:$0xff] }
 0xb7e   :  { %v2041_v28 = vadd.f32 1.0, %v2038_v26  ;;  %v2036_v30 = vand.u32 2147483647, %v6075_v23  ;;  %v6078_v31 = vadd.f32 %v4038_v41, %v2025_v27  ;;  %v2077_v43 = vmul.f32 %v2074_v42, %v2035_v21  ;;  %v4073_v42 = vld [vmem:[%s6698_s11 + $0x118] sm:$0xff] }
 0xb7f   :  { %v4660_v33 = vpop.f32.mrf.mxu1  ;;  %vm2093_vm11 = vcmp.ge.f32.partialorder %v6075_v23, 0.0 }
 0xb80   :  { %5034 = vrcp.f32 %v2041_v28  ;;  %v2039_v34 = vmul.f32 0.3275911, %v2036_v30  ;;  %v6081_v37 = vmul.f32 0.70710677, %v6078_v31  ;;  %v2075_v46 = vsub.f32 0.0, %v2036_v30 }
 0xb81   :  { %v2080_v49 = vmul.f32 1.442695, %v2077_v43  ;;  %v2029_v28 = vmul.f32 0.5, %v6066_v18  ;;  %v4072_v18 = vld [vmem:[%s6698_s11 + $0x110] sm:$0xff] }
 0xb82   :  { %v2042_v38 = vadd.f32 1.0, %v2039_v34  ;;  %v2037_v39 = vand.u32 2147483647, %v6081_v37  ;;  %v2078_v50 = vmul.f32 %v2075_v46, %v2036_v30  ;;  %vm2094_vm12 = vcmp.ge.f32.partialorder %v6081_v37, 0.0  ;;  %v4048_v37 = vld [vmem:[%s6698_s11 + $0xa0] sm:$0xff] }
 0xb83   :  { %4693 = vmatpush3.msra.mxu1 %v4048_v37 }
 0xb84   :  { %5036 = vrcp.f32 %v2042_v38  ;;  %v2040_v40 = vmul.f32 0.3275911, %v2037_v39  ;;  %v2076_v53 = vsub.f32 0.0, %v2037_v39  ;;  %v2082_v14 = vmul.f32 1.442695, %v2078_v50  ;;  %4694 = vmatprep.subr.mxu1 %v5295_v35 }
 0xb86   :  { %v2043_v3 = vadd.f32 1.0, %v2040_v40  ;;  %v2079_v57 = vmul.f32 %v2076_v53, %v2037_v39 }
 0xb88   :  { %5038 = vrcp.f32 %v2043_v3  ;;  %v2084_v0 = vmul.f32 1.442695, %v2079_v57  ;;  %v4045_v57 = vld [vmem:[#allocation12] ss:$0 sm:$0xff] }
 0xb89   :  { %5040 = vpow2.f32 %v2080_v49  ;;  %v2031_v49 = vmul.f32 0.5, %v6078_v31  ;;  %v4070_v31 = vld [vmem:[%s6698_s11 + $0x100] sm:$0xff] }
 0xb8a   :  { %5042 = vpow2.f32 %v2082_v14 }
 0xb8b   :  { %5044 = vpow2.f32 %v2084_v0 }
 0xb8d   :  { %v5035_v47 = vpop.eup %5034 }
 0xb8e   :  { %v2047_v48 = vmul.f32 1.0614054, %v5035_v47 }
 0xb90   :  { %v2050_v54 = vadd.f32 -1.4531521, %v2047_v48 }
 0xb91   :  { %v5037_v55 = vpop.eup %5036 }
 0xb92   :  { %v2053_v56 = vmul.f32 %v5035_v47, %v2050_v54  ;;  %v2048_v32 = vmul.f32 1.0614054, %v5037_v55  ;;  %v4047_v54 = vld [vmem:[%s6698_s11 + $0x98] sm:$0xff] }
 0xb93   :  { %4695 = vmatpush3.msra.mxu1 %v4047_v54 }
 0xb94   :  { %v2056_v16 = vadd.f32 1.4214138, %v2053_v56  ;;  %v2051_v58 = vadd.f32 -1.4531521, %v2048_v32  ;;  %4696 = vmatprep.subr.mxu1 %v5295_v35  ;;  %v4046_v56 = vld [vmem:[%s6698_s11 + $0x90] sm:$0xff] }
 0xb95   :  { %v5039_v59 = vpop.eup %5038  ;;  %v4068_v32 = vld [vmem:[%s6698_s11 + $0xf0] sm:$0xff]  ;;  %4697 = vmatpush3.msra.mxu1 %v4046_v56 }
 0xb96   :  { %v2059_v60 = vmul.f32 %v5035_v47, %v2056_v16  ;;  %v2054_v63 = vmul.f32 %v5037_v55, %v2051_v58  ;;  %v2049_v4 = vmul.f32 1.0614054, %v5039_v59  ;;  %v5041_v10 = vpop.eup %5040  ;;  %4707 = vmatprep.subr.mxu1 %v5295_v35 }
 0xb97   :  { %v5043_v17 = vpop.eup %5042 }
 0xb98   :  { %v2062_v2 = vadd.f32 -0.28449672, %v2059_v60  ;;  %v2057_v61 = vadd.f32 1.4214138, %v2054_v63  ;;  %v2052_v6 = vadd.f32 -1.4531521, %v2049_v4  ;;  %v5045_v34 = vpop.eup %5044 }
 0xb99   :  { %v4062_v60 = vld [vmem:[%s6698_s11 + $0xe8] sm:$0xff] }
 0xb9a   :  { %v2065_v8 = vmul.f32 %v5035_v47, %v2062_v2  ;;  %v2060_v25 = vmul.f32 %v5037_v55, %v2057_v61  ;;  %v2055_v62 = vmul.f32 %v5039_v59, %v2052_v6  ;;  %v4059_v6 = vld [vmem:[%s6698_s11 + $0xd0] sm:$0xff] }
 0xb9c   :  { %v2068_v29 = vadd.f32 0.2548296, %v2065_v8  ;;  %v2063_v12 = vadd.f32 -0.28449672, %v2060_v25  ;;  %v2058_v44 = vadd.f32 1.4214138, %v2055_v62 }
 0xb9e   :  { %v2071_v11 = vmul.f32 %v5035_v47, %v2068_v29  ;;  %v2066_v45 = vmul.f32 %v5037_v55, %v2063_v12  ;;  %v2061_v51 = vmul.f32 %v5039_v59, %v2058_v44  ;;  %v4057_v29 = vld [vmem:[%s6698_s11 + $0xc0] sm:$0xff] }
 0xba0   :  { %v2086_v9 = vmul.f32 %v5041_v10, %v2071_v11  ;;  %v2069_v36 = vadd.f32 0.2548296, %v2066_v45  ;;  %v2064_v13 = vadd.f32 -0.28449672, %v2061_v51 }
 0xba2   :  { %v2089_v15 = vsub.f32 1.0, %v2086_v9  ;;  %v2072_v41 = vmul.f32 %v5037_v55, %v2069_v36  ;;  %v2067_v19 = vmul.f32 %v5039_v59, %v2064_v13  ;;  %v4069_v55 = vld [vmem:[%s6698_s11 + $0xf8] sm:$0xff] }
 0xba4   :  { %v2095_v52 = vsub.f32 0.0, %v2089_v15  ;;  %v2087_v21 = vmul.f32 %v5043_v17, %v2072_v41  ;;  %v2070_v24 = vadd.f32 0.2548296, %v2067_v19 }
 0xba6   :  { %v2098_v26 = vsel %vm2092_vm9, %v2089_v15, %v2095_v52  ;;  %v2090_v27 = vsub.f32 1.0, %v2087_v21  ;;  %v2073_v33 = vmul.f32 %v5039_v59, %v2070_v24 }
 0xba7   :  { %v2101_v30 = vadd.f32 1.0, %v2098_v26  ;;  %v4064_v26 = vld [vmem:[%s6699_s12 + $0x4] ss:$0 sm:$0xff] }
 0xba8   :  { %v2096_v38 = vsub.f32 0.0, %v2090_v27  ;;  %v2088_v40 = vmul.f32 %v5045_v34, %v2073_v33  ;;  %v4053_v33 = vld [vmem:[%s6699_s12 + $0x3] ss:$0 sm:$0xff] }
 0xba9   :  { %v2104_v39 = vmul.f32 %v2101_v30, %v2029_v28 }
 0xbaa   :  { %v2099_v3 = vsel %vm2093_vm11, %v2090_v27, %v2096_v38  ;;  %v2091_v46 = vsub.f32 1.0, %v2088_v40 }
 0xbab   :  { %v2102_v43 = vadd.f32 1.0, %v2099_v3  ;;  %4678 = vmatmul.mubr.msk.f32.vlgmr.msra.gmra.mxu0 %vm2115_vm10, %v2104_v39  ;;  %v4075_v39 = vld [vmem:[%s6699_s12 + $0x5] ss:$0 sm:$0xff]  ;;  %v5106_v3 = vld [vmem:[%s6697_s10] ss:$0 sm:$0xff] }
 0xbac   :  { %4680 = vmatprep.mubr.msk.f32.mxu0 %vm5296_vm4, %v5295_v35  ;;  %4729 = vmatpush3.msra.mxu0 %v4073_v42  ;;  %v2097_v47 = vsub.f32 0.0, %v2091_v46 }
 0xbad   :  { %v2105_v23 = vmul.f32 %v2102_v43, %v2030_v20  ;;  %4730 = vmatprep.subr.mxu0 %v5295_v35  ;;  %v5107_v43 = vld [vmem:[%s6697_s10 + $0x1] ss:$0 sm:$0xff] }
 0xbae   :  { %4731 = vmatpush3.msra.mxu0 %v4072_v18  ;;  %v2100_v48 = vsel %vm2094_vm12, %v2091_v46, %v2097_v47 }
 0xbaf   :  { %4681 = vmatmul.mubr.msk.f32.gmra.mxu0 %vm2115_vm10, %v2105_v23  ;;  %4732 = vmatprep.subr.mxu0 %v5295_v35  ;;  %v2103_v50 = vadd.f32 1.0, %v2100_v48 }
 0xbb0   :  { %4683 = vmatprep.mubr.msk.f32.mxu0 %vm5296_vm4, %v5295_v35  ;;  %4733 = vmatpush3.msra.mxu0 %v4071_v22 }
 0xbb1   :  { %4734 = vmatprep.subr.mxu0 %v5295_v35  ;;  %v2106_v53 = vmul.f32 %v2103_v50, %v2031_v49 }
 0xbb2   :  { %4735 = vmatpush3.msra.mxu0 %v4070_v31 }
 0xbb3   :  { %4684 = vmatmul.mubr.msk.f32.gmra.mxu0 %vm2115_vm10, %v2106_v53  ;;  %4736 = vmatprep.subr.mxu0 %v5295_v35 }
 0xbb4   :  { %4740 = vmatprep.mubr.msk.f32.mxu0 %vm5296_vm4, %v5295_v35  ;;  %4737 = vmatpush3.msra.mxu0 %v4069_v55 }
 0xbb5   :  { %4738 = vmatprep.subr.mxu0 %v5295_v35 }
 0xbb6   :  { %4739 = vmatpush3.msra.mxu0 %v4068_v32 }
 0xbb7   :  { %4764 = vmatprep.subr.mxu0 %v5295_v35 }
 0xc6b   :  { %v2191_v14 = vpop.f32.mrf.mxu0 }
 0xc6c   :  { %v2205_v16 = vadd.f32 %v2191_v14, %v6002_v1  ;;  %v4061_v1 = vld [vmem:[%s6698_s11 + $0xe0] sm:$0xff] }
 0xc6d   :  { %v4679_v58 = vpop.f32.mrf.mxu0 }
 0xc6e   :  { %v6136_v59 = vadd.f32 %v4045_v57, %v2205_v16 }
 0xc6f   :  { %v2196_v63 = vpop.f32.mrf.mxu0 }
 0xc70   :  { %v2206_v4 = vadd.f32 %v2196_v63, %v6009_v7  ;;  %4699 = vmatmul.mubr.msk.f32.vlgmr.msra.gmra.mxu1 %vm586_vm5, %v6136_v59  ;;  %4741 = vmatmul.mubr.msk.f32.vlgmr.msra.gmra.mxu0 %vm586_vm5, %v6136_v59  ;;  %v4060_v7 = vld [vmem:[%s6698_s11 + $0xd8] sm:$0xff]  ;;  %v6296_v63 = vld [vmem:[%s6696_s9] sm:$0xff] }
 0xc71   :  { %v4682_v0 = vpop.f32.mrf.mxu0  ;;  %4708 = vmatpush3.msra.mxu1 %v4062_v60  ;;  %4701 = vmatprep.mubr.msk.f32.mxu1 %vm5296_vm4, %v5295_v35 }
 0xc72   :  { %v6151_v2 = vadd.f32 %v4045_v57, %v2206_v4  ;;  %4709 = vmatprep.subr.mxu1 %v5295_v35  ;;  %4743 = vmatprep.mubr.msk.f32.mxu0 %vm5296_vm4, %v5295_v35 }
 0xc73   :  { %4710 = vmatpush3.msra.mxu1 %v4061_v1  ;;  %v2201_v61 = vpop.f32.mrf.mxu0 }
 0xc74   :  { %4702 = vmatmul.mubr.msk.f32.gmra.mxu1 %vm586_vm5, %v6151_v2  ;;  %4711 = vmatprep.subr.mxu1 %v5295_v35  ;;  %v2207_v8 = vadd.f32 %v2201_v61, %v6016_v5  ;;  %v4058_v5 = vld [vmem:[%s6698_s11 + $0xc8] sm:$0xff] }
 0xc75   :  { %4744 = vmatmul.mubr.msk.f32.gmra.mxu0 %vm586_vm5, %v6151_v2  ;;  %4712 = vmatpush3.msra.mxu1 %v4060_v7  ;;  %v4685_v25 = vpop.f32.mrf.mxu0 }
 0xc76   :  { %4713 = vmatprep.subr.mxu1 %v5295_v35  ;;  %4704 = vmatprep.mubr.msk.f32.mxu1 %vm5296_vm4, %v5295_v35  ;;  %v6171_v62 = vadd.f32 %v4045_v57, %v2207_v8  ;;  %v6303_v25 = vld [vmem:[%s6696_s9 + $0x8] sm:$0xff] }
 0xc77   :  { %4714 = vmatpush3.msra.mxu1 %v4059_v6  ;;  %4746 = vmatprep.mubr.msk.f32.mxu0 %vm5296_vm4, %v5295_v35 }
 0xc78   :  { %4715 = vmatprep.subr.mxu1 %v5295_v35  ;;  %4705 = vmatmul.mubr.msk.f32.gmra.mxu1 %vm586_vm5, %v6171_v62 }
 0xc79   :  { %4747 = vmatmul.mubr.msk.f32.gmra.mxu0 %vm586_vm5, %v6171_v62  ;;  %4716 = vmatpush3.msra.mxu1 %v4058_v5 }
 0xc7a   :  { %4719 = vmatprep.mubr.msk.f32.mxu1 %vm5296_vm4, %v5295_v35  ;;  %4717 = vmatprep.subr.mxu1 %v5295_v35 }
 0xc7b   :  { %4770 = vmatprep.mubr.msk.f32.mxu0 %vm5296_vm4, %v5295_v35  ;;  %4718 = vmatpush3.msra.mxu1 %v4057_v29 }
 0xc7c   :  { %4720 = vmatmul.mubr.msk.f32.vlgmr.msra.gmra.mxu1 %vm586_vm5, %v6136_v59  ;;  %4749 = vmatprep.subr.mxu1 %v5295_v35 }
 0xc7d   :  { %4722 = vmatprep.mubr.msk.f32.mxu1 %vm5296_vm4, %v5295_v35 }
 0xc80   :  { %4723 = vmatmul.mubr.msk.f32.gmra.mxu1 %vm586_vm5, %v6151_v2 }
 0xc81   :  { %4725 = vmatprep.mubr.msk.f32.mxu1 %vm5296_vm4, %v5295_v35 }
 0xc84   :  { %4726 = vmatmul.mubr.msk.f32.gmra.mxu1 %vm586_vm5, %v6171_v62 }
 0xc85   :  { %4755 = vmatprep.mubr.msk.f32.mxu1 %vm5296_vm4, %v5295_v35 }
 0xd30   :  { %v2308_v12 = vpop.f32.mrf.mxu1  ;;  %v2498_v44 = vpop.f32.mrf.mxu0 }
 0xd31   :  { %v6224_v38 = vadd.f32 %v4053_v33, %v2308_v12  ;;  %v6257_v48 = vadd.f32 %v4075_v39, %v2498_v44 }
 0xd32   :  { %v4700_v11 = vpop.f32.mrf.mxu1  ;;  %v4742_v45 = vpop.f32.mrf.mxu0 }
 0xd33   :  { %v2512_v20 = vmul.f32 %v5106_v3, %v6224_v38  ;;  %v2655_v46 = vmul.f32 %v5107_v43, %v6224_v38  ;;  %v2786_v54 = vmul.f32 %v5107_v43, %v6257_v48  ;;  %v2652_v55 = vmul.f32 %v5106_v3, %v6257_v48 }
 0xd34   :  { %v2313_v10 = vpop.f32.mrf.mxu1 }
 0xd35   :  { %v2503_v51 = vpop.f32.mrf.mxu0  ;;  %v6251_v23 = vadd.f32 %v4053_v33, %v2313_v10 }
 0xd36   :  { %v4703_v9 = vpop.f32.mrf.mxu1  ;;  %v6247_v18 = vadd.f32 %v4075_v39, %v2503_v51  ;;  %v6310_v51 = vld [vmem:[%s6696_s9 + $0x10] sm:$0x3] }
 0xd37   :  { %v4745_v36 = vpop.f32.mrf.mxu0  ;;  %v2513_v37 = vmul.f32 %v5106_v3, %v6251_v23  ;;  %v2656_v31 = vmul.f32 %v5107_v43, %v6251_v23 }
 0xd38   :  { %v2318_v13 = vpop.f32.mrf.mxu1  ;;  %v2787_v49 = vmul.f32 %v5107_v43, %v6247_v18  ;;  %v2653_v50 = vmul.f32 %v5106_v3, %v6247_v18 }
 0xd39   :  { %v2508_v15 = vpop.f32.mrf.mxu0  ;;  %v6265_v53 = vadd.f32 %v4053_v33, %v2318_v13 }
 0xd3a   :  { %v4706_v41 = vpop.f32.mrf.mxu1  ;;  %v6231_v40 = vadd.f32 %v4075_v39, %v2508_v15 }
 0xd3b   :  { %v4748_v17 = vpop.f32.mrf.mxu0  ;;  %v2514_v56 = vmul.f32 %v5106_v3, %v6265_v53  ;;  %v2657_v32 = vmul.f32 %v5107_v43, %v6265_v53 }
 0xd3c   :  { %v2403_v19 = vpop.f32.mrf.mxu1  ;;  %v2654_v47 = vmul.f32 %v5106_v3, %v6231_v40  ;;  %v2788_v22 = vmul.f32 %v5107_v43, %v6231_v40 }
 0xd3d   :  { %v6233_v42 = vadd.f32 %v4064_v26, %v2403_v19 }
 0xd3e   :  { %v4721_v52 = vpop.f32.mrf.mxu1 }
 0xd40   :  { %v2408_v21 = vpop.f32.mrf.mxu1 }
 0xd41   :  { %v6218_v34 = vadd.f32 %v4064_v26, %v2408_v21 }
 0xd42   :  { %v4724_v24 = vpop.f32.mrf.mxu1 }
 0xd44   :  { %v2413_v27 = vpop.f32.mrf.mxu1 }
 0xd45   :  { %v6207_v28 = vadd.f32 %v4064_v26, %v2413_v27 }
 0xd46   :  { %v4727_v30 = vpop.f32.mrf.mxu1 }
 0xd47   :  { %4750 = vmatpush3.xpose.msk.msra.mxu1 %vm586_vm5, %v6207_v28  ;;  %4765 = vmatpush3.xpose.msk.msra.mxu0 %vm586_vm5, %v6207_v28 }
 0xd48   :  { %4751 = vmatprep.subr.mxu1 %v5295_v35  ;;  %4766 = vmatprep.subr.mxu0 %v5295_v35 }
 0xd4b   :  { %4752 = vmatpush3.xpose.msk.msra.mxu1 %vm586_vm5, %v6218_v34  ;;  %4767 = vmatpush3.xpose.msk.msra.mxu0 %vm586_vm5, %v6218_v34 }
 0xd4c   :  { %4753 = vmatprep.subr.mxu1 %v5295_v35  ;;  %4768 = vmatprep.subr.mxu0 %v5295_v35 }
 0xd4f   :  { %4754 = vmatpush3.xpose.msk.msra.mxu1 %vm586_vm5, %v6233_v42  ;;  %4769 = vmatpush3.xpose.msk.msra.mxu0 %vm586_vm5, %v6233_v42 }
 0xd50   :  { %4779 = vmatprep.subr.mxu1 %v5295_v35  ;;  %4794 = vmatprep.subr.mxu0 %v5295_v35 }
 0xd52   :  { %4756 = vmatmul.mubr.msk.f32.vlgmr.msra.gmra.mxu1 %vm586_vm5, %v2512_v20  ;;  %4771 = vmatmul.mubr.msk.f32.vlgmr.msra.gmra.mxu0 %vm586_vm5, %v2655_v46 }
 0xd53   :  { %4780 = vmatpush3.msk.msra.mxu1 %vm1169_vm6, %v2788_v22  ;;  %4795 = vmatpush3.msk.msra.mxu0 %vm1169_vm6, %v2654_v47 }
 0xd54   :  { %4781 = vmatprep.subr.mxu1 %v5295_v35  ;;  %4796 = vmatprep.subr.mxu0 %v5295_v35 }
 0xd55   :  { %4758 = vmatprep.mubr.msk.f32.mxu1 %vm5296_vm4, %v5295_v35  ;;  %4773 = vmatprep.mubr.msk.f32.mxu0 %vm5296_vm4, %v5295_v35 }
 0xd56   :  { %4782 = vmatpush3.msra.mxu1 %v2787_v49  ;;  %4797 = vmatpush3.msra.mxu0 %v2653_v50 }
 0xd57   :  { %4759 = vmatmul.mubr.msk.f32.gmra.mxu1 %vm586_vm5, %v2513_v37  ;;  %4774 = vmatmul.mubr.msk.f32.gmra.mxu0 %vm586_vm5, %v2656_v31 }
 0xd58   :  { %4783 = vmatprep.subr.mxu1 %v5295_v35  ;;  %4798 = vmatprep.subr.mxu0 %v5295_v35 }
 0xd59   :  { %4784 = vmatpush3.msra.mxu1 %v2786_v54  ;;  %4799 = vmatpush3.msra.mxu0 %v2652_v55 }
 0xd5a   :  { %4761 = vmatprep.mubr.msk.f32.mxu1 %vm5296_vm4, %v5295_v35  ;;  %4776 = vmatprep.mubr.msk.f32.mxu0 %vm5296_vm4, %v5295_v35 }
 0xd5b   :  { %4762 = vmatmul.mubr.msk.f32.gmra.mxu1 %vm586_vm5, %v2514_v56  ;;  %4777 = vmatmul.mubr.msk.f32.gmra.mxu0 %vm586_vm5, %v2657_v32 }
 0xd5c   :  { %4785 = vmatprep.mubr.msk.f32.mxu1 %vm5296_vm4, %v5295_v35  ;;  %4809 = vmatprep.subr.mxu1 %v5295_v35 }
 0xd5d   :  { %4800 = vmatprep.mubr.msk.f32.mxu0 %vm5296_vm4, %v5295_v35  ;;  %4824 = vmatprep.subr.mxu0 %v5295_v35 }
 0xe12   :  { %v2599_v14 = vpop.f32.mrf.mxu1  ;;  %v2733_v57 = vpop.f32.mrf.mxu0 }
 0xe13   :  { %v2747_v16 = vmul.f32 0.28867513, %v2733_v57  ;;  %v2613_v33 = vmul.f32 0.28867513, %v2599_v14 }
 0xe14   :  { %v4757_v58 = vpop.f32.mrf.mxu1  ;;  %v4772_v60 = vpop.f32.mrf.mxu0 }
 0xe15   :  { %v2750_v4 = vadd.f32 %v6296_v63, %v2747_v16  ;;  %v6317_v46 = vadd.f32 %v6296_v63, %v2613_v33 }
 0xe17   :  { %v2604_v1 = vpop.f32.mrf.mxu1  ;;  %v2738_v0 = vpop.f32.mrf.mxu0  ;;  %v2753_v7 = vsel %vm980_vm7, %v2750_v4, -inf  ;;  %v2619_v49 = vsel %vm980_vm7, %v6317_v46, -inf }
 0xe18   :  { %v2748_v61 = vmul.f32 0.28867513, %v2738_v0  ;;  %2754 = vmax.xlane.f32.xlu1 %v2753_v7  ;;  %v2614_v3 = vmul.f32 0.28867513, %v2604_v1  ;;  %v6352_v1 = vld [vmem:[%s6697_s10 + $0x2] ss:$0 sm:$0xff] }
 0xe19   :  { %v4760_v6 = vpop.f32.mrf.mxu1  ;;  %v4775_v8 = vpop.f32.mrf.mxu0  ;;  %v2973_v0 = vmul.f32 %v6352_v1, %v6224_v38  ;;  %v2974_v7 = vmul.f32 %v6352_v1, %v6251_v23 }
 0xe1a   :  { %v2751_v5 = vadd.f32 %v6303_v25, %v2748_v61  ;;  %v6323_v50 = vadd.f32 %v6303_v25, %v2614_v3 }
 0xe1b   :  { %v2609_v29 = vpop.f32.mrf.mxu1  ;;  %v2743_v12 = vpop.f32.mrf.mxu0 }
 0xe1c   :  { %v2749_v44 = vmul.f32 0.28867513, %v2743_v12  ;;  %v2756_v11 = vsel %vm980_vm7, %v2751_v5, -inf  ;;  %v2615_v20 = vmul.f32 0.28867513, %v2609_v29  ;;  %v2622_v31 = vsel %vm980_vm7, %v6323_v50, -inf }
 0xe1d   :  { %2757 = vmax.xlane.f32.xlu0 %v2756_v11  ;;  %v4763_v45 = vpop.f32.mrf.mxu1  ;;  %v4778_v10 = vpop.f32.mrf.mxu0 }
 0xe1e   :  { %v2752_v9 = vadd.f32 %v6310_v51, %v2749_v44  ;;  %v6326_v37 = vadd.f32 %v6310_v51, %v2615_v20 }
 0xe20   :  { %v2759_v36 = vsel %vm987_vm8, %v2752_v9, -inf  ;;  %v2625_v54 = vsel %vm987_vm8, %v6326_v37, -inf }
 0xe21   :  { %2760 = vmax.xlane.f32.xlu1 %v2759_v36 }
 0xea1   :  { %v2755_v13 = vpop.xlane.xlu1 %2754 }
 0xea2   :  { %v2762_v15 = vsub.f32 %v2750_v4, %v2755_v13 }
 0xea4   :  { %v2765_v41 = vmul.f32 1.442695, %v2762_v15 }
 0xea6   :  { %5046 = vpow2.f32 %v2765_v41  ;;  %v2758_v17 = vpop.xlane.xlu0 %2757 }
 0xea7   :  { %v2763_v19 = vsub.f32 %v2751_v5, %v2758_v17 }
 0xea9   :  { %v2767_v52 = vmul.f32 1.442695, %v2763_v19 }
 0xeaa   :  { %v2761_v21 = vpop.xlane.xlu1 %2760 }
 0xeab   :  { %5048 = vpow2.f32 %v2767_v52  ;;  %v2764_v24 = vsub.f32 %v2752_v9, %v2761_v21 }
 0xead   :  { %v2769_v26 = vmul.f32 1.442695, %v2764_v24 }
 0xeaf   :  { %5050 = vpow2.f32 %v2769_v26 }
 0xeb3   :  { %v5047_v27 = vpop.eup %5046 }
 0xeb4   :  { %v2771_v30 = vsel %vm980_vm7, %v5047_v27, 0.0 }
 0xeb5   :  { %2772 = vadd.xlane.f32.xlu0 %v2771_v30 }
 0xeb8   :  { %v5049_v39 = vpop.eup %5048 }
 0xeb9   :  { %v2774_v43 = vsel %vm980_vm7, %v5049_v39, 0.0 }
 0xeba   :  { %2775 = vadd.xlane.f32.xlu1 %v2774_v43 }
 0xebc   :  { %v5051_v47 = vpop.eup %5050 }
 0xebd   :  { %v2777_v22 = vsel %vm987_vm8, %v5051_v47, 0.0 }
 0xebe   :  { %2778 = vadd.xlane.f32.xlu0 %v2777_v22  ;;  %2620 = vmax.xlane.f32.xlu1 %v2619_v49 }
 0xec2   :  { %2623 = vmax.xlane.f32.xlu0 %v2622_v31  ;;  %2626 = vmax.xlane.f32.xlu1 %v2625_v54 }
 0xf3e   :  { %v2773_v55 = vpop.xlane.xlu0 %2772 }
 0xf3f   :  { %5052 = vrcp.f32 %v2773_v55 }
 0xf43   :  { %v2776_v56 = vpop.xlane.xlu1 %2775 }
 0xf44   :  { %5054 = vrcp.f32 %v2776_v56 }
 0xf47   :  { %v2779_v32 = vpop.xlane.xlu0 %2778 }
 0xf48   :  { %5056 = vrcp.f32 %v2779_v32 }
 0xf4b   :  { %v2624_v10 = vpop.xlane.xlu0 %2623 }
 0xf4c   :  { %v5053_v14 = vpop.eup %5052  ;;  %v2629_v15 = vsub.f32 %v6323_v50, %v2624_v10 }
 0xf4d   :  { %v2783_v57 = vmul.f32 %v5053_v14, %v5047_v27 }
 0xf4e   :  { %v2633_v27 = vmul.f32 1.442695, %v2629_v15 }
 0xf4f   :  { %4786 = vmatmul.mubr.msk.f32.vlgmr.msra.gmra.mxu1 %vm980_vm7, %v2783_v57 }
 0xf50   :  { %4810 = vmatpush3.xpose.msk.msra.mxu1 %vm586_vm5, %v6207_v28  ;;  %4788 = vmatprep.mubr.msk.f32.mxu1 %vm5296_vm4, %v5295_v35 }
 0xf51   :  { %v5055_v16 = vpop.eup %5054  ;;  %4811 = vmatprep.subr.mxu1 %v5295_v35 }
 0xf52   :  { %v2784_v58 = vmul.f32 %v5055_v16, %v5049_v39 }
 0xf54   :  { %4789 = vmatmul.mubr.msk.f32.gmra.mxu1 %vm980_vm7, %v2784_v58 }
 0xf55   :  { %v5057_v60 = vpop.eup %5056  ;;  %4812 = vmatpush3.xpose.msk.msra.mxu1 %vm586_vm5, %v6218_v34  ;;  %4791 = vmatprep.mubr.msk.f32.mxu1 %vm5296_vm4, %v5295_v35 }
 0xf56   :  { %4813 = vmatprep.subr.mxu1 %v5295_v35  ;;  %v2785_v4 = vmul.f32 %v5057_v60, %v5051_v47 }
 0xf58   :  { %4792 = vmatmul.mubr.msk.f32.gmra.mxu1 %vm980_vm7, %v2785_v4 }
 0xf59   :  { %4814 = vmatpush3.xpose.msk.msra.mxu1 %vm586_vm5, %v6233_v42  ;;  %4815 = vmatprep.mubr.msk.f32.mxu1 %vm5296_vm4, %v5295_v35 }
 0xf5a   :  { %4839 = vmatprep.subr.mxu1 %v5295_v35 }
 0xf5c   :  { %4816 = vmatmul.mubr.msk.f32.vlgmr.msra.gmra.mxu1 %vm586_vm5, %v2973_v0 }
 0xf5d   :  { %4840 = vmatpush3.xpose.msk.msra.mxu1 %vm586_vm5, %v6207_v28  ;;  %4818 = vmatprep.mubr.msk.f32.mxu1 %vm5296_vm4, %v5295_v35  ;;  %v2975_v28 = vmul.f32 %v6352_v1, %v6265_v53 }
 0xf5e   :  { %4841 = vmatprep.subr.mxu1 %v5295_v35 }
 0xf60   :  { %4819 = vmatmul.mubr.msk.f32.gmra.mxu1 %vm586_vm5, %v2974_v7 }
 0xf61   :  { %4842 = vmatpush3.xpose.msk.msra.mxu1 %vm586_vm5, %v6218_v34  ;;  %4821 = vmatprep.mubr.msk.f32.mxu1 %vm5296_vm4, %v5295_v35  ;;  %v6381_v34 = vld [vmem:[%s6697_s10 + $0x3] ss:$0 sm:$0xff] }
 0xf62   :  { %4843 = vmatprep.subr.mxu1 %v5295_v35  ;;  %v3202_v61 = vmul.f32 %v6381_v34, %v6224_v38  ;;  %v3204_v6 = vmul.f32 %v6381_v34, %v6265_v53 }
 0xf64   :  { %4822 = vmatmul.mubr.msk.f32.gmra.mxu1 %vm586_vm5, %v2975_v28 }
 0xf65   :  { %4844 = vmatpush3.xpose.msk.msra.mxu1 %vm586_vm5, %v6233_v42  ;;  %4845 = vmatprep.mubr.msk.f32.mxu1 %vm5296_vm4, %v5295_v35  ;;  %v3203_v42 = vmul.f32 %v6381_v34, %v6251_v23  ;;  %v2621_v23 = vpop.xlane.xlu1 %2620 }
 0xf66   :  { %4869 = vmatprep.subr.mxu1 %v5295_v35  ;;  %v2628_v45 = vsub.f32 %v6317_v46, %v2621_v23 }
 0xf68   :  { %4846 = vmatmul.mubr.msk.f32.vlgmr.msra.gmra.mxu1 %vm586_vm5, %v3202_v61  ;;  %v2631_v17 = vmul.f32 1.442695, %v2628_v45 }
 0xf69   :  { %4848 = vmatprep.mubr.msk.f32.mxu1 %vm5296_vm4, %v5295_v35  ;;  %v2627_v9 = vpop.xlane.xlu1 %2626 }
 0xf6a   :  { %v2630_v19 = vsub.f32 %v6326_v37, %v2627_v9  ;;  %5058 = vpow2.f32 %v2631_v17 }
 0xf6b   :  { %5060 = vpow2.f32 %v2633_v27 }
 0xf6c   :  { %4849 = vmatmul.mubr.msk.f32.gmra.mxu1 %vm586_vm5, %v3203_v42  ;;  %v2635_v33 = vmul.f32 1.442695, %v2630_v19 }
 0xf6d   :  { %4851 = vmatprep.mubr.msk.f32.mxu1 %vm5296_vm4, %v5295_v35 }
 0xf6e   :  { %5062 = vpow2.f32 %v2635_v33 }
 0xf70   :  { %4852 = vmatmul.mubr.msk.f32.gmra.mxu1 %vm586_vm5, %v3204_v6 }
 0xf71   :  { %4881 = vmatprep.mubr.msk.f32.mxu1 %vm5296_vm4, %v5295_v35 }
 0xf77   :  { %v5059_v16 = vpop.eup %5058 }
 0xf78   :  { %v6419_v4 = vpop.eup %5060 }
 0xf79   :  { %v2640_v28 = vsel %vm980_vm7, %v6419_v4, 0.0 }
 0xf7b   :  { %v6423_v7 = vpop.eup %5062 }
0x100f   :  { %v6399_v38 = vpop.f32.mrf.mxu1 }
0x1011   :  { %v4787_v8 = vpop.f32.mrf.mxu1 }
0x1014   :  { %v6401_v5 = vpop.f32.mrf.mxu1 }
0x1016   :  { %v4790_v29 = vpop.f32.mrf.mxu1 }
0x1018   :  { %v6403_v12 = vpop.f32.mrf.mxu1 }
0x101a   :  { %v4793_v44 = vpop.f32.mrf.mxu1 }
0x101c   :  { %v3051_v11 = vpop.f32.mrf.mxu1 }
0x101d   :  { %v3065_v53 = vmul.f32 0.28867513, %v3051_v11 }
0x101e   :  { %v4817_v36 = vpop.f32.mrf.mxu1 }
0x101f   :  { %v3068_v13 = vadd.f32 %v6296_v63, %v3065_v53 }
0x1020   :  { %v3056_v41 = vpop.f32.mrf.mxu1 }
0x1021   :  { %v3066_v52 = vmul.f32 0.28867513, %v3056_v41  ;;  %v3071_v21 = vsel %vm980_vm7, %v3068_v13, -inf }
0x1022   :  { %3072 = vmax.xlane.f32.xlu0 %v3071_v21  ;;  %v4820_v24 = vpop.f32.mrf.mxu1 }
0x1023   :  { %v3069_v26 = vadd.f32 %v6303_v25, %v3066_v52 }
0x1024   :  { %v3061_v30 = vpop.f32.mrf.mxu1 }
0x1025   :  { %v3067_v39 = vmul.f32 0.28867513, %v3061_v30  ;;  %v3074_v3 = vsel %vm980_vm7, %v3069_v26, -inf }
0x1026   :  { %3075 = vmax.xlane.f32.xlu1 %v3074_v3  ;;  %v4823_v20 = vpop.f32.mrf.mxu1 }
0x1027   :  { %v3070_v43 = vadd.f32 %v6310_v51, %v3067_v39 }
0x1028   :  { %v3280_v46 = vpop.f32.mrf.mxu1 }
0x1029   :  { %v3294_v47 = vmul.f32 0.28867513, %v3280_v46  ;;  %v3077_v22 = vsel %vm987_vm8, %v3070_v43, -inf }
0x102a   :  { %3078 = vmax.xlane.f32.xlu0 %v3077_v22  ;;  %v4847_v49 = vpop.f32.mrf.mxu1 }
0x102b   :  { %v3297_v50 = vadd.f32 %v6296_v63, %v3294_v47  ;;  %v2637_v63 = vsel %vm980_vm7, %v5059_v16, 0.0  ;;  %v3106_v49 = vmul.f32 %v6352_v1, %v6231_v40 }
0x102c   :  { %v3285_v37 = vpop.f32.mrf.mxu1 }
0x102d   :  { %v3295_v31 = vmul.f32 0.28867513, %v3285_v37  ;;  %v3300_v54 = vsel %vm980_vm7, %v3297_v50, -inf  ;;  %v3105_v37 = vmul.f32 %v6352_v1, %v6247_v18 }
0x102e   :  { %3301 = vmax.xlane.f32.xlu1 %v3300_v54  ;;  %v4850_v55 = vpop.f32.mrf.mxu1 }
0x102f   :  { %v3298_v56 = vadd.f32 %v6303_v25, %v3295_v31  ;;  %v2643_v25 = vsel %vm987_vm8, %v6423_v7, 0.0 }
0x1030   :  { %v3290_v32 = vpop.f32.mrf.mxu1 }
0x1031   :  { %v3296_v14 = vmul.f32 0.28867513, %v3290_v32  ;;  %v3303_v57 = vsel %vm980_vm7, %v3298_v56, -inf  ;;  %v3104_v32 = vmul.f32 %v6352_v1, %v6257_v48 }
0x1032   :  { %3304 = vmax.xlane.f32.xlu0 %v3303_v57  ;;  %v4853_v58 = vpop.f32.mrf.mxu1 }
0x1033   :  { %v3299_v60 = vadd.f32 %v6310_v51, %v3296_v14 }
0x1035   :  { %v3306_v0 = vsel %vm987_vm8, %v3299_v60, -inf }
0x1036   :  { %2638 = vadd.xlane.f32.xlu0 %v2637_v63  ;;  %3307 = vmax.xlane.f32.xlu1 %v3306_v0  ;;  %v3335_v63 = vmul.f32 %v6381_v34, %v6231_v40  ;;  %v3333_v40 = vmul.f32 %v6381_v34, %v6257_v48 }
0x103a   :  { %2644 = vadd.xlane.f32.xlu0 %v2643_v25  ;;  %2641 = vadd.xlane.f32.xlu1 %v2640_v28  ;;  %v3334_v25 = vmul.f32 %v6381_v34, %v6247_v18 }
0x10ab   :  { %v3073_v61 = vpop.xlane.xlu0 %3072 }
0x10ac   :  { %v3080_v51 = vsub.f32 %v3068_v13, %v3073_v61 }
0x10ae   :  { %v3083_v42 = vmul.f32 1.442695, %v3080_v51 }
0x10af   :  { %v3076_v6 = vpop.xlane.xlu1 %3075 }
0x10b0   :  { %5064 = vpow2.f32 %v3083_v42  ;;  %v3081_v8 = vsub.f32 %v3069_v26, %v3076_v6 }
0x10b2   :  { %v3085_v29 = vmul.f32 1.442695, %v3081_v8 }
0x10b3   :  { %v3079_v23 = vpop.xlane.xlu0 %3078 }
0x10b4   :  { %5066 = vpow2.f32 %v3085_v29  ;;  %v3082_v44 = vsub.f32 %v3070_v43, %v3079_v23 }
0x10b6   :  { %v3087_v11 = vmul.f32 1.442695, %v3082_v44 }
0x10b7   :  { %v3302_v45 = vpop.xlane.xlu1 %3301 }
0x10b8   :  { %5068 = vpow2.f32 %v3087_v11  ;;  %v3309_v10 = vsub.f32 %v3297_v50, %v3302_v45 }
0x10ba   :  { %v3312_v53 = vmul.f32 1.442695, %v3309_v10 }
0x10bb   :  { %v3305_v9 = vpop.xlane.xlu0 %3304 }
0x10bc   :  { %5070 = vpow2.f32 %v3312_v53  ;;  %v3310_v36 = vsub.f32 %v3298_v56, %v3305_v9  ;;  %v4124_v9 = vld [vmem:[%s6700_s13 + $0x58] sm:$0xff] }
0x10bd   :  { %v5065_v15 = vpop.eup %5064  ;;  %4870 = vmatpush3.msra.mxu1 %v4124_v9 }
0x10be   :  { %v3314_v41 = vmul.f32 1.442695, %v3310_v36  ;;  %v3089_v13 = vsel %vm980_vm7, %v5065_v15, 0.0  ;;  %v4123_v36 = vld [vmem:[%s6700_s13 + $0x50] sm:$0xff]  ;;  %4871 = vmatprep.subr.mxu1 %v5295_v35 }
0x10bf   :  { %v2639_v17 = vpop.xlane.xlu0 %2638  ;;  %3090 = vadd.xlane.f32.xlu1 %v3089_v13  ;;  %v3308_v19 = vpop.xlane.xlu1 %3307  ;;  %4872 = vmatpush3.msra.mxu1 %v4123_v36  ;;  %v4120_v13 = vld [vmem:[%s6700_s13 + $0x38] sm:$0xff] }
0x10c0   :  { %5072 = vpow2.f32 %v3314_v41  ;;  %v3311_v52 = vsub.f32 %v3299_v60, %v3308_v19  ;;  %4873 = vmatprep.subr.mxu1 %v5295_v35  ;;  %v4121_v41 = vld [vmem:[%s6700_s13 + $0x40] sm:$0xff]  ;;  %v4134_v19 = vld [vmem:[%s6702_s15 + $0x58] sm:$0xff] }
0x10c1   :  { %v5067_v21 = vpop.eup %5066  ;;  %5074 = vrcp.f32 %v2639_v17  ;;  %v4119_v17 = vld [vmem:[%s6700_s13 + $0x30] sm:$0xff] }
0x10c2   :  { %v3316_v24 = vmul.f32 1.442695, %v3311_v52  ;;  %v3092_v26 = vsel %vm980_vm7, %v5067_v21, 0.0  ;;  %v4133_v52 = vld [vmem:[%s6702_s15 + $0x50] sm:$0xff] }
0x10c3   :  { %3093 = vadd.xlane.f32.xlu0 %v3092_v26  ;;  %v2642_v27 = vpop.xlane.xlu1 %2641  ;;  %v2645_v33 = vpop.xlane.xlu0 %2644 }
0x10c4   :  { %5076 = vpow2.f32 %v3316_v24 }
0x10c5   :  { %v6431_v30 = vpop.eup %5068  ;;  %5078 = vrcp.f32 %v2642_v27 }
0x10c6   :  { %v3095_v39 = vsel %vm987_vm8, %v6431_v30, 0.0  ;;  %5080 = vrcp.f32 %v2645_v33 }
0x10c7   :  { %3096 = vadd.xlane.f32.xlu1 %v3095_v39 }
0x10c9   :  { %v6435_v3 = vpop.eup %5070 }
0x10ca   :  { %v3318_v20 = vsel %vm980_vm7, %v6435_v3, 0.0 }
0x10cb   :  { %3319 = vadd.xlane.f32.xlu0 %v3318_v20 }
0x10cd   :  { %v6439_v43 = vpop.eup %5072 }
0x10ce   :  { %v5075_v46 = vpop.eup %5074  ;;  %v3321_v47 = vsel %vm980_vm7, %v6439_v43, 0.0 }
0x10cf   :  { %v2649_v22 = vmul.f32 %v5075_v46, %v5059_v16  ;;  %3322 = vadd.xlane.f32.xlu1 %v3321_v47 }
0x10d1   :  { %v6445_v50 = vpop.eup %5076  ;;  %4801 = vmatmul.mubr.msk.f32.vlgmr.msra.gmra.mxu0 %vm980_vm7, %v2649_v22 }
0x10d2   :  { %4825 = vmatpush3.msk.msra.mxu0 %vm1169_vm6, %v3106_v49  ;;  %4803 = vmatprep.mubr.msk.f32.mxu0 %vm5296_vm4, %v5295_v35  ;;  %v3324_v31 = vsel %vm987_vm8, %v6445_v50, 0.0  ;;  %v5079_v54 = vpop.eup %5078 }
0x10d3   :  { %4826 = vmatprep.subr.mxu0 %v5295_v35  ;;  %3325 = vadd.xlane.f32.xlu0 %v3324_v31  ;;  %v2650_v55 = vmul.f32 %v5079_v54, %v6419_v4  ;;  %v5081_v56 = vpop.eup %5080 }
0x10d4   :  { %4827 = vmatpush3.msra.mxu0 %v3105_v37  ;;  %v2651_v14 = vmul.f32 %v5081_v56, %v6423_v7 }
0x10d5   :  { %4828 = vmatprep.subr.mxu0 %v5295_v35  ;;  %4804 = vmatmul.mubr.msk.f32.gmra.mxu0 %vm980_vm7, %v2650_v55 }
0x10d6   :  { %4829 = vmatpush3.msra.mxu0 %v3104_v32  ;;  %4806 = vmatprep.mubr.msk.f32.mxu0 %vm5296_vm4, %v5295_v35  ;;  %v4130_v32 = vld [vmem:[%s6702_s15 + $0x38] sm:$0xff] }
0x10d7   :  { %4854 = vmatprep.subr.mxu0 %v5295_v35 }
0x10d9   :  { %4807 = vmatmul.mubr.msk.f32.gmra.mxu0 %vm980_vm7, %v2651_v14  ;;  %v4129_v14 = vld [vmem:[%s6702_s15 + $0x30] sm:$0xff] }
0x10da   :  { %4830 = vmatprep.mubr.msk.f32.mxu0 %vm5296_vm4, %v5295_v35 }
0x1148   :  { %v3091_v57 = vpop.xlane.xlu1 %3090 }
0x1149   :  { %5082 = vrcp.f32 %v3091_v57 }
0x114c   :  { %v3094_v16 = vpop.xlane.xlu0 %3093 }
0x114d   :  { %5084 = vrcp.f32 %v3094_v16  ;;  %v4128_v16 = vld [vmem:[#allocation9 + $0x1] ss:$0 sm:$0xff] }
0x1150   :  { %v3097_v1 = vpop.xlane.xlu1 %3096 }
0x1151   :  { %5086 = vrcp.f32 %v3097_v1 }
0x1154   :  { %v3320_v58 = vpop.xlane.xlu0 %3319 }
0x1155   :  { %5088 = vrcp.f32 %v3320_v58 }
0x1156   :  { %v5083_v60 = vpop.eup %5082 }
0x1157   :  { %v3101_v4 = vmul.f32 %v5083_v60, %v5065_v15  ;;  %v4122_v15 = vld [vmem:[%s6700_s13 + $0x48] sm:$0xff] }
0x1158   :  { %v3323_v0 = vpop.xlane.xlu1 %3322  ;;  %4874 = vmatpush3.msra.mxu1 %v4122_v15 }
0x1159   :  { %5090 = vrcp.f32 %v3323_v0  ;;  %4831 = vmatmul.mubr.msk.f32.vlgmr.msra.gmra.mxu0 %vm980_vm7, %v3101_v4  ;;  %4875 = vmatprep.subr.mxu1 %v5295_v35 }
0x115a   :  { %v5085_v7 = vpop.eup %5084  ;;  %4855 = vmatpush3.msk.msra.mxu0 %vm1169_vm6, %v3335_v63  ;;  %4833 = vmatprep.mubr.msk.f32.mxu0 %vm5296_vm4, %v5295_v35 }
0x115b   :  { %4856 = vmatprep.subr.mxu0 %v5295_v35  ;;  %v3102_v28 = vmul.f32 %v5085_v7, %v5067_v21  ;;  %4876 = vmatpush3.msra.mxu1 %v4121_v41  ;;  %v4132_v21 = vld [vmem:[%s6702_s15 + $0x48] sm:$0xff] }
0x115c   :  { %4857 = vmatpush3.msra.mxu0 %v3334_v25  ;;  %v3326_v61 = vpop.xlane.xlu0 %3325  ;;  %4877 = vmatprep.subr.mxu1 %v5295_v35 }
0x115d   :  { %5092 = vrcp.f32 %v3326_v61  ;;  %4858 = vmatprep.subr.mxu0 %v5295_v35  ;;  %4834 = vmatmul.mubr.msk.f32.gmra.mxu0 %vm980_vm7, %v3102_v28  ;;  %v4146_v61 = vld [vmem:[%s6704_s17 + $0x78] sm:$0xff] }
0x115e   :  { %v5087_v51 = vpop.eup %5086  ;;  %4859 = vmatpush3.msra.mxu0 %v3333_v40  ;;  %4836 = vmatprep.mubr.msk.f32.mxu0 %vm5296_vm4, %v5295_v35  ;;  %v4144_v40 = vld [vmem:[%s6704_s17 + $0x68] sm:$0xff] }
0x115f   :  { %v3103_v18 = vmul.f32 %v5087_v51, %v6431_v30  ;;  %4890 = vmatprep.subr.mxu0 %v5295_v35  ;;  %4878 = vmatpush3.msra.mxu1 %v4120_v13  ;;  %v4143_v51 = vld [vmem:[%s6704_s17 + $0x60] sm:$0xff] }
0x1160   :  { %4879 = vmatprep.subr.mxu1 %v5295_v35 }
0x1161   :  { %4837 = vmatmul.mubr.msk.f32.gmra.mxu0 %vm980_vm7, %v3103_v18  ;;  %4880 = vmatpush3.msra.mxu1 %v4119_v17  ;;  %v4142_v18 = vld [vmem:[%s6704_s17 + $0x58] sm:$0xff] }
0x1162   :  { %v5089_v42 = vpop.eup %5088  ;;  %4860 = vmatprep.mubr.msk.f32.mxu0 %vm5296_vm4, %v5295_v35  ;;  %4911 = vmatprep.subr.mxu1 %v5295_v35 }
0x1163   :  { %v3330_v48 = vmul.f32 %v5089_v42, %v6435_v3  ;;  %v4141_v42 = vld [vmem:[%s6704_s17 + $0x50] sm:$0xff] }
0x1165   :  { %4861 = vmatmul.mubr.msk.f32.vlgmr.msra.gmra.mxu0 %vm980_vm7, %v3330_v48  ;;  %v4140_v48 = vld [vmem:[%s6704_s17 + $0x48] sm:$0xff] }
0x1166   :  { %v5091_v34 = vpop.eup %5090  ;;  %4863 = vmatprep.mubr.msk.f32.mxu0 %vm5296_vm4, %v5295_v35  ;;  %4891 = vmatpush3.msra.mxu0 %v4134_v19 }
0x1167   :  { %v3331_v6 = vmul.f32 %v5091_v34, %v6439_v43  ;;  %4892 = vmatprep.subr.mxu0 %v5295_v35  ;;  %v4139_v34 = vld [vmem:[%s6704_s17 + $0x40] sm:$0xff] }
0x1168   :  { %4893 = vmatpush3.msra.mxu0 %v4133_v52 }
0x1169   :  { %4864 = vmatmul.mubr.msk.f32.gmra.mxu0 %vm980_vm7, %v3331_v6  ;;  %4894 = vmatprep.subr.mxu0 %v5295_v35  ;;  %v3840_v6 = vld [vmem:[%s6706_s19 + $0x28] sm:$0xff] }
0x116a   :  { %v5093_v8 = vpop.eup %5092  ;;  %4866 = vmatprep.mubr.msk.f32.mxu0 %vm5296_vm4, %v5295_v35  ;;  %4895 = vmatpush3.msra.mxu0 %v4132_v21 }
0x116b   :  { %v3332_v29 = vmul.f32 %v5093_v8, %v6445_v50  ;;  %4896 = vmatprep.subr.mxu0 %v5295_v35  ;;  %v3839_v8 = vld [vmem:[%s6706_s19 + $0x20] sm:$0xff] }
0x116d   :  { %4867 = vmatmul.mubr.msk.f32.gmra.mxu0 %vm980_vm7, %v3332_v29  ;;  %v3838_v29 = vld [vmem:[%s6706_s19 + $0x18] sm:$0xff] }
0x116e   :  { %4902 = vmatprep.mubr.msk.f32.mxu0 %vm5296_vm4, %v5295_v35 }
0x1191   :  { %v2959_v23 = vpop.f32.mrf.mxu0 }
0x1192   :  { %v2960_v39 = vadd.f32 %v2959_v23, %v6399_v38  ;;  %v4135_v23 = vld [vmem:[#allocation10 + $0x1] ss:$0 sm:$0xff] }
0x1193   :  { %v4802_v44 = vpop.f32.mrf.mxu0 }
0x1195   :  { %v2964_v11 = vpop.f32.mrf.mxu0 }
0x1196   :  { %v2965_v46 = vadd.f32 %v2964_v11, %v6401_v5 }
0x1197   :  { %v4805_v45 = vpop.f32.mrf.mxu0 }
0x1199   :  { %v2969_v10 = vpop.f32.mrf.mxu0 }
0x119a   :  { %v2970_v37 = vadd.f32 %v2969_v10, %v6403_v12  ;;  %v4131_v12 = vld [vmem:[%s6702_s15 + $0x40] sm:$0xff] }
0x119b   :  { %v4808_v53 = vpop.f32.mrf.mxu0  ;;  %4897 = vmatpush3.msra.mxu0 %v4131_v12 }
0x119c   :  { %4898 = vmatprep.subr.mxu0 %v5295_v35 }
0x119d   :  { %4899 = vmatpush3.msra.mxu0 %v4130_v32 }
0x119e   :  { %4900 = vmatprep.subr.mxu0 %v5295_v35 }
0x119f   :  { %4901 = vmatpush3.msra.mxu0 %v4129_v14 }
0x11a0   :  { %4936 = vmatprep.subr.mxu0 %v5295_v35 }
0x1219   :  { %v3185_v24 = vpop.f32.mrf.mxu0 }
0x121a   :  { %v3199_v20 = vadd.f32 %v3185_v24, %v2960_v39 }
0x121b   :  { %v4832_v26 = vpop.f32.mrf.mxu0 }
0x121d   :  { %v3190_v27 = vpop.f32.mrf.mxu0 }
0x121e   :  { %v3200_v49 = vadd.f32 %v3190_v27, %v2965_v46 }
0x121f   :  { %v4835_v30 = vpop.f32.mrf.mxu0 }
0x1221   :  { %v3195_v33 = vpop.f32.mrf.mxu0 }
0x1222   :  { %v3201_v55 = vadd.f32 %v3195_v33, %v2970_v37 }
0x1223   :  { %v4838_v3 = vpop.f32.mrf.mxu0 }
0x1225   :  { %v3414_v43 = vpop.f32.mrf.mxu0 }
0x1226   :  { %v3428_v47 = vadd.f32 %v3414_v43, %v3199_v20 }
0x1227   :  { %v4862_v22 = vpop.f32.mrf.mxu0 }
0x1228   :  { %4882 = vmatmul.mubr.msk.f32.vlgmr.msra.gmra.mxu1 %vm586_vm5, %v3428_v47 }
0x1229   :  { %v3419_v50 = vpop.f32.mrf.mxu0  ;;  %4884 = vmatprep.mubr.msk.f32.mxu1 %vm5296_vm4, %v5295_v35  ;;  %4912 = vmatpush3.msra.mxu1 %v4146_v61 }
0x122a   :  { %v3429_v31 = vadd.f32 %v3419_v50, %v3200_v49  ;;  %4913 = vmatprep.subr.mxu1 %v5295_v35 }
0x122b   :  { %v4865_v54 = vpop.f32.mrf.mxu0 }
0x122c   :  { %4885 = vmatmul.mubr.msk.f32.gmra.mxu1 %vm586_vm5, %v3429_v31 }
0x122d   :  { %v3424_v38 = vpop.f32.mrf.mxu0  ;;  %4887 = vmatprep.mubr.msk.f32.mxu1 %vm5296_vm4, %v5295_v35 }
0x122e   :  { %v3430_v5 = vadd.f32 %v3424_v38, %v3201_v55 }
0x122f   :  { %v4868_v56 = vpop.f32.mrf.mxu0 }
0x1230   :  { %4888 = vmatmul.mubr.msk.f32.gmra.mxu1 %vm586_vm5, %v3430_v5 }
0x1231   :  { %4927 = vmatprep.mubr.msk.f32.mxu1 %vm5296_vm4, %v5295_v35 }
0x12e8   :  { %v3513_v57 = vpop.f32.mrf.mxu1 }
0x12e9   :  { %v3527_v1 = vadd.f32 %v3513_v57, %v6136_v59 }
0x12ea   :  { %v4883_v58 = vpop.f32.mrf.mxu1 }
0x12eb   :  { %v6561_v60 = vadd.f32 %v4128_v16, %v3527_v1 }
0x12ec   :  { %v3518_v4 = vpop.f32.mrf.mxu1 }
0x12ed   :  { %v3528_v63 = vadd.f32 %v3518_v4, %v6151_v2  ;;  %4903 = vmatmul.mubr.msk.f32.vlgmr.msra.gmra.mxu0 %vm586_vm5, %v6561_v60 }
0x12ee   :  { %v4886_v0 = vpop.f32.mrf.mxu1  ;;  %4905 = vmatprep.mubr.msk.f32.mxu0 %vm5296_vm4, %v5295_v35  ;;  %4937 = vmatpush3.msra.mxu0 %v3840_v6 }
0x12ef   :  { %v6568_v7 = vadd.f32 %v4128_v16, %v3528_v63  ;;  %4938 = vmatprep.subr.mxu0 %v5295_v35 }
0x12f0   :  { %v3523_v25 = vpop.f32.mrf.mxu1  ;;  %4939 = vmatpush3.msra.mxu0 %v3839_v8 }
0x12f1   :  { %v3529_v28 = vadd.f32 %v3523_v25, %v6171_v62  ;;  %4906 = vmatmul.mubr.msk.f32.gmra.mxu0 %vm586_vm5, %v6568_v7  ;;  %v4145_v62 = vld [vmem:[%s6704_s17 + $0x70] sm:$0xff]  ;;  %4940 = vmatprep.subr.mxu0 %v5295_v35 }
0x12f2   :  { %v4889_v59 = vpop.f32.mrf.mxu1  ;;  %4908 = vmatprep.mubr.msk.f32.mxu0 %vm5296_vm4, %v5295_v35  ;;  %4914 = vmatpush3.msra.mxu1 %v4145_v62 }
0x12f3   :  { %v6575_v2 = vadd.f32 %v4128_v16, %v3529_v28  ;;  %4915 = vmatprep.subr.mxu1 %v5295_v35  ;;  %4941 = vmatpush3.msra.mxu0 %v3838_v29 }
0x12f4   :  { %4916 = vmatpush3.msra.mxu1 %v4144_v40  ;;  %4942 = vmatprep.subr.mxu0 %v5295_v35 }
0x12f5   :  { %4909 = vmatmul.mubr.msk.f32.gmra.mxu0 %vm586_vm5, %v6575_v2  ;;  %4917 = vmatprep.subr.mxu1 %v5295_v35 }
0x12f6   :  { %4948 = vmatprep.mubr.msk.f32.mxu0 %vm5296_vm4, %v5295_v35  ;;  %4918 = vmatpush3.msra.mxu1 %v4143_v51 }
0x12f7   :  { %4919 = vmatprep.subr.mxu1 %v5295_v35 }
0x12f8   :  { %4920 = vmatpush3.msra.mxu1 %v4142_v18 }
0x12f9   :  { %4921 = vmatprep.subr.mxu1 %v5295_v35 }
0x12fa   :  { %4922 = vmatpush3.msra.mxu1 %v4141_v42 }
0x12fb   :  { %4923 = vmatprep.subr.mxu1 %v5295_v35 }
0x12fc   :  { %4924 = vmatpush3.msra.mxu1 %v4140_v48 }
0x12fd   :  { %4925 = vmatprep.subr.mxu1 %v5295_v35 }
0x12fe   :  { %4926 = vmatpush3.msra.mxu1 %v4139_v34 }
0x13ad   :  { %v3631_v44 = vpop.f32.mrf.mxu0 }
0x13ae   :  { %v6624_v11 = vadd.f32 %v4135_v23, %v3631_v44 }
0x13af   :  { %v4904_v45 = vpop.f32.mrf.mxu0 }
0x13b0   :  { %v6627_v10 = vmul.f32 0.70710677, %v6624_v11 }
0x13b1   :  { %v3636_v53 = vpop.f32.mrf.mxu0 }
0x13b2   :  { %v3651_v9 = vand.u32 2147483647, %v6627_v10  ;;  %v6630_v36 = vadd.f32 %v4135_v23, %v3636_v53  ;;  %vm3708_vm13 = vcmp.ge.f32.partialorder %v6627_v10, 0.0 }
0x13b3   :  { %v4907_v15 = vpop.f32.mrf.mxu0 }
0x13b4   :  { %v3654_v41 = vmul.f32 0.3275911, %v3651_v9  ;;  %v6633_v13 = vmul.f32 0.70710677, %v6630_v36  ;;  %v3690_v3 = vsub.f32 0.0, %v3651_v9 }
0x13b5   :  { %v3641_v17 = vpop.f32.mrf.mxu0 }
0x13b6   :  { %v3657_v19 = vadd.f32 1.0, %v3654_v41  ;;  %v3652_v52 = vand.u32 2147483647, %v6633_v13  ;;  %v6636_v21 = vadd.f32 %v4135_v23, %v3641_v17  ;;  %v3693_v43 = vmul.f32 %v3690_v3, %v3651_v9 }
0x13b7   :  { %v4910_v24 = vpop.f32.mrf.mxu0  ;;  %vm3709_vm14 = vcmp.ge.f32.partialorder %v6633_v13, 0.0 }
0x13b8   :  { %5094 = vrcp.f32 %v3657_v19  ;;  %v3655_v26 = vmul.f32 0.3275911, %v3652_v52  ;;  %v6639_v27 = vmul.f32 0.70710677, %v6636_v21  ;;  %v3691_v46 = vsub.f32 0.0, %v3652_v52 }
0x13b9   :  { %v3696_v49 = vmul.f32 1.442695, %v3693_v43  ;;  %v3645_v19 = vmul.f32 0.5, %v6624_v11  ;;  %v3647_v13 = vmul.f32 0.5, %v6636_v21  ;;  %v3835_v21 = vld [vmem:[%s6706_s19] sm:$0xff] }
0x13ba   :  { %v3658_v30 = vadd.f32 1.0, %v3655_v26  ;;  %v3653_v33 = vand.u32 2147483647, %v6639_v27  ;;  %v3694_v50 = vmul.f32 %v3691_v46, %v3652_v52  ;;  %vm3710_vm15 = vcmp.ge.f32.partialorder %v6639_v27, 0.0  ;;  %v3836_v27 = vld [vmem:[%s6706_s19 + $0x8] sm:$0xff] }
0x13bc   :  { %5096 = vrcp.f32 %v3658_v30  ;;  %v3656_v39 = vmul.f32 0.3275911, %v3653_v33  ;;  %v3692_v37 = vsub.f32 0.0, %v3653_v33  ;;  %v3698_v5 = vmul.f32 1.442695, %v3694_v50 }
0x13be   :  { %v3659_v20 = vadd.f32 1.0, %v3656_v39  ;;  %v3695_v56 = vmul.f32 %v3692_v37, %v3653_v33  ;;  %v4150_v37 = vld [vmem:[#allocation12 + $0x1] ss:$0 sm:$0xff] }
0x13c0   :  { %5098 = vrcp.f32 %v3659_v20  ;;  %v3700_v58 = vmul.f32 1.442695, %v3695_v56  ;;  %v3646_v20 = vmul.f32 0.5, %v6630_v36 }
0x13c1   :  { %5100 = vpow2.f32 %v3696_v49  ;;  %v3837_v49 = vld [vmem:[%s6706_s19 + $0x10] sm:$0xff] }
0x13c2   :  { %5102 = vpow2.f32 %v3698_v5  ;;  %4943 = vmatpush3.msra.mxu0 %v3837_v49 }
0x13c3   :  { %5104 = vpow2.f32 %v3700_v58  ;;  %4944 = vmatprep.subr.mxu0 %v5295_v35 }
0x13c4   :  { %4945 = vmatpush3.msra.mxu0 %v3836_v27 }
0x13c5   :  { %v5095_v47 = vpop.eup %5094  ;;  %4946 = vmatprep.subr.mxu0 %v5295_v35 }
0x13c6   :  { %v3663_v22 = vmul.f32 1.0614054, %v5095_v47  ;;  %4947 = vmatpush3.msra.mxu0 %v3835_v21 }
0x13c8   :  { %v3666_v31 = vadd.f32 -1.4531521, %v3663_v22 }
0x13c9   :  { %v5097_v54 = vpop.eup %5096 }
0x13ca   :  { %v3669_v55 = vmul.f32 %v5095_v47, %v3666_v31  ;;  %v3664_v38 = vmul.f32 1.0614054, %v5097_v54 }
0x13cc   :  { %v3672_v12 = vadd.f32 1.4214138, %v3669_v55  ;;  %v3667_v32 = vadd.f32 -1.4531521, %v3664_v38 }
0x13cd   :  { %v5099_v14 = vpop.eup %5098 }
0x13ce   :  { %v3675_v57 = vmul.f32 %v5095_v47, %v3672_v12  ;;  %v3670_v16 = vmul.f32 %v5097_v54, %v3667_v32  ;;  %v3665_v1 = vmul.f32 1.0614054, %v5099_v14  ;;  %v5101_v42 = vpop.eup %5100 }
0x13cf   :  { %v5103_v44 = vpop.eup %5102 }
0x13d0   :  { %v3678_v4 = vadd.f32 -0.28449672, %v3675_v57  ;;  %v3673_v63 = vadd.f32 1.4214138, %v3670_v16  ;;  %v3668_v0 = vadd.f32 -1.4531521, %v3665_v1  ;;  %v5105_v26 = vpop.eup %5104 }
0x13d2   :  { %v3681_v25 = vmul.f32 %v5095_v47, %v3678_v4  ;;  %v3676_v28 = vmul.f32 %v5097_v54, %v3673_v63  ;;  %v3671_v59 = vmul.f32 %v5099_v14, %v3668_v0 }
0x13d4   :  { %v3684_v61 = vadd.f32 0.2548296, %v3681_v25  ;;  %v3679_v62 = vadd.f32 -0.28449672, %v3676_v28  ;;  %v3674_v40 = vadd.f32 1.4214138, %v3671_v59 }
0x13d6   :  { %v3687_v51 = vmul.f32 %v5095_v47, %v3684_v61  ;;  %v3682_v18 = vmul.f32 %v5097_v54, %v3679_v62  ;;  %v3677_v48 = vmul.f32 %v5099_v14, %v3674_v40 }
0x13d8   :  { %v3702_v34 = vmul.f32 %v5101_v42, %v3687_v51  ;;  %v3685_v6 = vadd.f32 0.2548296, %v3682_v18  ;;  %v3680_v8 = vadd.f32 -0.28449672, %v3677_v48 }
0x13da   :  { %v3705_v29 = vsub.f32 1.0, %v3702_v34  ;;  %v3688_v23 = vmul.f32 %v5097_v54, %v3685_v6  ;;  %v3683_v45 = vmul.f32 %v5099_v14, %v3680_v8 }
0x13dc   :  { %v3711_v53 = vsub.f32 0.0, %v3705_v29  ;;  %v3703_v9 = vmul.f32 %v5103_v44, %v3688_v23  ;;  %v3686_v15 = vadd.f32 0.2548296, %v3683_v45 }
0x13de   :  { %v3714_v41 = vsel %vm3708_vm13, %v3705_v29, %v3711_v53  ;;  %v3706_v17 = vsub.f32 1.0, %v3703_v9  ;;  %v3689_v24 = vmul.f32 %v5099_v14, %v3686_v15 }
0x13df   :  { %v3717_v52 = vadd.f32 1.0, %v3714_v41 }
0x13e0   :  { %v3712_v30 = vsub.f32 0.0, %v3706_v17  ;;  %v3704_v39 = vmul.f32 %v5105_v26, %v3689_v24 }
0x13e1   :  { %v3720_v33 = vmul.f32 %v3717_v52, %v3645_v19 }
0x13e2   :  { %v3715_v3 = vsel %vm3709_vm14, %v3706_v17, %v3712_v30  ;;  %v3707_v46 = vsub.f32 1.0, %v3704_v39 }
0x13e3   :  { %v3718_v43 = vadd.f32 1.0, %v3715_v3  ;;  %4928 = vmatmul.mubr.msk.f32.vlgmr.msra.gmra.mxu1 %vm2115_vm10, %v3720_v33 }
0x13e4   :  { %4930 = vmatprep.mubr.msk.f32.mxu1 %vm5296_vm4, %v5295_v35  ;;  %v3713_v11 = vsub.f32 0.0, %v3707_v46 }
0x13e5   :  { %v3721_v10 = vmul.f32 %v3718_v43, %v3646_v20 }
0x13e6   :  { %v3716_v47 = vsel %vm3710_vm15, %v3707_v46, %v3713_v11 }
0x13e7   :  { %4931 = vmatmul.mubr.msk.f32.gmra.mxu1 %vm2115_vm10, %v3721_v10  ;;  %v3719_v22 = vadd.f32 1.0, %v3716_v47 }
0x13e8   :  { %4933 = vmatprep.mubr.msk.f32.mxu1 %vm5296_vm4, %v5295_v35 }
0x13e9   :  { %v3722_v36 = vmul.f32 %v3719_v22, %v3647_v13 }
0x13eb   :  { %4934 = vmatmul.mubr.msk.f32.gmra.mxu1 %vm2115_vm10, %v3722_v36 }
0x14a3   :  { %v3807_v50 = vpop.f32.mrf.mxu1 }
0x14a4   :  { %v3821_v31 = vadd.f32 %v3807_v50, %v6561_v60 }
0x14a5   :  { %v4929_v54 = vpop.f32.mrf.mxu1 }
0x14a6   :  { %v3832_v55 = vadd.f32 %v4150_v37, %v3821_v31 }
0x14a7   :  { %v3812_v38 = vpop.f32.mrf.mxu1 }
0x14a8   :  { %v3822_v5 = vadd.f32 %v3812_v38, %v6568_v7  ;;  %4949 = vmatmul.mubr.msk.f32.vlgmr.msra.gmra.mxu0 %vm586_vm5, %v3832_v55  ;;  %v4151_v7 = vld [vmem:[#allocation13] ss:$0 sm:$0xff] }
0x14a9   :  { %v4932_v56 = vpop.f32.mrf.mxu1  ;;  %4951 = vmatprep.mubr.msk.f32.mxu0 %vm5296_vm4, %v5295_v35 }
0x14aa   :  { %v3833_v12 = vadd.f32 %v4150_v37, %v3822_v5 }
0x14ab   :  { %v3817_v32 = vpop.f32.mrf.mxu1 }
0x14ac   :  { %4952 = vmatmul.mubr.msk.f32.gmra.mxu0 %vm586_vm5, %v3833_v12  ;;  %v3823_v14 = vadd.f32 %v3817_v32, %v6575_v2 }
0x14ad   :  { %4954 = vmatprep.mubr.msk.f32.mxu0 %vm5296_vm4, %v5295_v35  ;;  %v4935_v60 = vpop.f32.mrf.mxu1 }
0x14ae   :  { %v3834_v57 = vadd.f32 %v4150_v37, %v3823_v14 }
0x14b0   :  { %4955 = vmatmul.mubr.msk.f32.gmra.mxu0 %vm586_vm5, %v3834_v57 }
0x1568   :  { %v3923_v16 = vpop.f32.mrf.mxu0 }
0x1569   :  { %v3924_v1 = vadd.f32 %v4151_v7, %v3923_v16 }
0x156a   :  { %v4950_v58 = vpop.f32.mrf.mxu0 }
0x156b   :  { %3937 = vst.msk [vmem:[%s6708_s21] sm:$0xff] %vm324_vm3, %v3924_v1 }
0x156c   :  { %v3928_v4 = vpop.f32.mrf.mxu0 }
0x156d   :  { %v3929_v63 = vadd.f32 %v4151_v7, %v3928_v4 }
0x156e   :  { %v4953_v0 = vpop.f32.mrf.mxu0 }
0x156f   :  { %3938 = vst.msk [vmem:[%s6708_s21 + $0x8] sm:$0xff] %vm324_vm3, %v3929_v63 }
0x1570   :  { %v3933_v35 = vpop.f32.mrf.mxu0 }
0x1571   :  { %v3934_v2 = vadd.f32 %v4151_v7, %v3933_v35 }
0x1572   :  { %v4956_v25 = vpop.f32.mrf.mxu0 }
0x1573   :  { %3940 = vst.msk [vmem:[%s6708_s21 + $0x10] sm:$0x3] %vm3939_vm0, %v3934_v2 }
0x1574   :  { %3945 = vsyncpa [#allocation3], 1 }
0x1575   :  { %3946 = vsyncpa [#allocation5], 1 }
0x1576   :  { %3947 = vsyncpa [#allocation8], 1 }
0x1577   :  { %3948 = vsyncpa [#allocation11], 1 }
0x1578   :  { %3949 = vsyncpa [#allocation14], 1 }

</bundles_post_ra>
